<compile_context>
chip_gen: v7x
topology: tpu7x:2x2x1
jax: 0.10.0
libtpu: 0.0.40
codegen_flags: <defaults>
</compile_context>

<pallas_src>
import functools

import numpy as np

import jax
import jax.numpy as jnp
from jax import lax
from jax.experimental import pallas as pl
from jax.experimental.pallas import tpu as pltpu


LANES = 128  # lane width / padding target for every matmul operand


# ------------------------------ Pallas kernel -------------------------------

def _cnn_cifar_kernel(x_ref, w1_ref, b1_ref, w2_ref, b2_ref,
                      fw1_ref, fb1_ref, fw2_ref, fb2_ref, fw3_ref, fb3_ref,
                      out_ref, wp1_ref, p1_ref, wp2_ref, *, img_tile):
    """Whole CNNCifar forward for IMG_TILE images.

    x_ref   : (T*32, 128) f32   stacked image slabs; row = img*32 + h, lane = w*3+c
    w1_ref  : (5, 128, 256) bf16  banded conv1 weights (one per kernel row)
    b1_ref  : (1, 256) f32
    w2_ref  : (5, 128, 256) bf16  banded conv2 weights
    b2_ref  : (1, 256) f32
    fw1_ref : (640, 128) bf16   fc1 weight, K = 5 pooled rows x 128 lanes
    fw2_ref : (128, 128) bf16   fc2 (120x84 valid); fw3_ref likewise (84xC valid)
    out_ref : (T, 128) f32      logits (first num_classes lanes valid)
    wp1_ref : (T*32, 128) f32   scratch: conv1 width-pooled rows
    p1_ref  : (T*16, 128) f32   scratch: conv2 input slab (pooled conv1)
    wp2_ref : (T*16, 128) f32   scratch: conv2 width-pooled rows
    """
    f32, bf16 = jnp.float32, jnp.bfloat16
    T = img_tile
    M1 = T * 32 - 4   # conv1 matmul rows: row r -> image r//32, oh = r%32 (valid oh<28)
    M2 = T * 16 - 4   # conv2 matmul rows: row r -> image r//16, oh2 = r%16 (valid oh2<10)

    # ---- conv1 (5x5, 3->6) + ReLU + width pool: whole tile in one M=M1 matmul chain
    acc = jnp.dot(x_ref[0:M1, :].astype(bf16), w1_ref[0],
                  preferred_element_type=f32)
    for kh in range(1, 5):
        acc += jnp.dot(x_ref[kh:kh + M1, :].astype(bf16), w1_ref[kh],
                       preferred_element_type=f32)
    acc = jnp.maximum(acc + b1_ref[...], 0.0)                        # (M1, 256)
    wp1_ref[0:M1, :] = jnp.maximum(acc[:, :LANES], acc[:, LANES:])   # width pool

    # ---- conv1 height pool, vectorized: p1[i*16+t] = max(wp1[i*32+2t], wp1[i*32+2t+1])
    # Rows t=14,15 of each image come from garbage conv rows (oh 28..31) / the
    # unwritten tail of wp1_ref, but valid conv2 outputs (oh2<=9) only ever read
    # p1 rows i*16 + 0..13, so the garbage is never consumed.
    ev = wp1_ref[pl.ds(0, T * 16, stride=2), :]
    od = wp1_ref[pl.ds(1, T * 16, stride=2), :]
    p1_ref[...] = jnp.maximum(ev, od)                                # (T*16, 128)

    # ---- conv2 (5x5, 6->16) + ReLU + width pool
    acc = jnp.dot(p1_ref[0:M2, :].astype(bf16), w2_ref[0],
                  preferred_element_type=f32)
    for kh in range(1, 5):
        acc += jnp.dot(p1_ref[kh:kh + M2, :].astype(bf16), w2_ref[kh],
                       preferred_element_type=f32)
    acc = jnp.maximum(acc + b2_ref[...], 0.0)                        # (M2, 256)
    wp2_ref[0:M2, :] = jnp.maximum(acc[:, :LANES], acc[:, LANES:])

    # ---- conv2 height pool fused with fc1 input gather -> (T, 640), one matmul.
    # Segment ph holds pooled row ph of every image: max of rows i*16+2ph, i*16+2ph+1
    # (all within the valid oh2<10 region -> no garbage reaches fc1).
    segs = []
    for ph in range(5):
        e = wp2_ref[pl.ds(2 * ph, T, stride=16), :]
        o = wp2_ref[pl.ds(2 * ph + 1, T, stride=16), :]
        segs.append(jnp.maximum(e, o))                               # (T, 128)
    fc1_in = jnp.concatenate(segs, axis=1)                           # (T, 640)

    # ---- fc1 (400->120), fc2 (120->84), fc3 (84->classes) with M = IMG_TILE
    h = jnp.maximum(
        jnp.dot(fc1_in.astype(bf16), fw1_ref[...],
                preferred_element_type=f32) + fb1_ref[...], 0.0)
    h = jnp.maximum(
        jnp.dot(h.astype(bf16), fw2_ref[...],
                preferred_element_type=f32) + fb2_ref[...], 0.0)
    out_ref[...] = (jnp.dot(h.astype(bf16), fw3_ref[...],
                            preferred_element_type=f32) + fb3_ref[...])


# --------------------------- host-side weight packing -----------------------

def _pack_banded_conv(w_oihw, bias, w_in, kpad=LANES, half=LANES):
    """Banded conv weight for the (H, W*Cin) slab formulation.

    wb[kh, w*Cin+ci, col(ow, co)] = w[co, ci, kh, w-ow]; columns ordered
    [even-ow block | odd-ow block], each block (OW/2)*Cout valid, zero-padded to
    `half` lanes; matching broadcast bias (1, 2*half)."""
    w = np.asarray(w_oihw, np.float32)
    b = np.asarray(bias, np.float32)
    cout, cin, kh_sz, kw_sz = w.shape
    ow_sz = w_in - kw_sz + 1
    assert ow_sz % 2 == 0 and (ow_sz // 2) * cout <= half and w_in * cin <= kpad
    wb = np.zeros((kh_sz, kpad, 2 * half), np.float32)
    bb = np.zeros((1, 2 * half), np.float32)
    for ow in range(ow_sz):
        col0 = (ow % 2) * half + (ow // 2) * cout
        bb[0, col0:col0 + cout] = b
        for kh in range(kh_sz):
            for kw in range(kw_sz):
                wpos = ow + kw
                for ci in range(cin):
                    wb[kh, wpos * cin + ci, col0:col0 + cout] = w[:, ci, kh, kw]
    return wb, bb


def _pack_fc1(fc1_w, fc1_b):
    """fc1 (120, 400) -> (640, 128): K segment ph (128 lanes) holds pooled conv2
    row ph with lane index pw*16 + c; torch flatten order is c*25 + ph*5 + pw."""
    w = np.asarray(fc1_w, np.float32)
    b = np.asarray(fc1_b, np.float32)
    wp = np.zeros((5 * LANES, LANES), np.float32)
    for ph in range(5):
        for pw in range(5):
            for c in range(16):
                wp[ph * LANES + pw * 16 + c, :120] = w[:, c * 25 + ph * 5 + pw]
    bp = np.zeros((1, LANES), np.float32)
    bp[0, :120] = b
    return wp, bp


def _pack_fc(fc_w, fc_b, kpad=LANES, npad=LANES):
    """torch Linear weight (out, in) -> zero-padded (kpad, npad) matmul weight."""
    w = np.asarray(fc_w, np.float32)
    b = np.asarray(fc_b, np.float32)
    o, i = w.shape
    assert i <= kpad and o <= npad
    wp = np.zeros((kpad, npad), np.float32)
    wp[:i, :o] = w.T
    bp = np.zeros((1, npad), np.float32)
    bp[0, :o] = b
    return wp, bp


def pack_params(params):
    """One-time host-side packing: banded convs, permuted/padded fc weights,
    bf16 matmul operands, f32 biases."""
    assert params["fc3_w"].shape[0] <= LANES, "num_classes must be <= 128"
    w1, b1 = _pack_banded_conv(params["conv1_w"], params["conv1_b"], w_in=32)
    w2, b2 = _pack_banded_conv(params["conv2_w"], params["conv2_b"], w_in=14)
    fw1, fb1 = _pack_fc1(params["fc1_w"], params["fc1_b"])
    fw2, fb2 = _pack_fc(params["fc2_w"], params["fc2_b"])
    fw3, fb3 = _pack_fc(params["fc3_w"], params["fc3_b"])
    bf = lambda a: jnp.asarray(a, jnp.bfloat16)
    f32 = lambda a: jnp.asarray(a, jnp.float32)
    return {"w1": bf(w1), "b1": f32(b1), "w2": bf(w2), "b2": f32(b2),
            "fw1": bf(fw1), "fb1": f32(fb1), "fw2": bf(fw2), "fb2": f32(fb2),
            "fw3": bf(fw3), "fb3": f32(fb3)}


# ------------------------------- forward pass --------------------------------

def cnn_cifar_forward(packed, x_nchw, *, num_classes, img_tile=8):
    """x_nchw: (B, 3, 32, 32) float32, same layout as the PyTorch module input."""
    assert img_tile % 8 == 0, "img_tile must be a multiple of 8 (sublane-aligned output)"
    B = x_nchw.shape[0]
    assert x_nchw.shape[1:] == (3, 32, 32)
    n_tiles = -(-B // img_tile)
    Bp = n_tiles * img_tile

    # Host-side glue only: NCHW -> (B, H, W*C) slab, pad lanes to 128, pad batch
    # to a multiple of img_tile, and stack images along sublanes.
    x = jnp.transpose(x_nchw, (0, 2, 3, 1)).reshape(B, 32, 32 * 3)
    x = jnp.pad(x, ((0, Bp - B), (0, 0), (0, LANES - 32 * 3)))
    x = x.reshape(Bp * 32, LANES)

    c3 = lambda b: (0, 0, 0)
    c2 = lambda b: (0, 0)
    out = pl.pallas_call(
        functools.partial(_cnn_cifar_kernel, img_tile=img_tile),
        out_shape=jax.ShapeDtypeStruct((Bp, LANES), jnp.float32),
        grid=(n_tiles,),
        in_specs=[
            pl.BlockSpec((img_tile * 32, LANES), lambda b: (b, 0)),  # image slabs
            pl.BlockSpec((5, LANES, 2 * LANES), c3),                 # conv1 banded w
            pl.BlockSpec((1, 2 * LANES), c2),                        # conv1 bias
            pl.BlockSpec((5, LANES, 2 * LANES), c3),                 # conv2 banded w
            pl.BlockSpec((1, 2 * LANES), c2),                        # conv2 bias
            pl.BlockSpec((5 * LANES, LANES), c2),                    # fc1 w (K=640)
            pl.BlockSpec((1, LANES), c2),                            # fc1 bias
            pl.BlockSpec((LANES, LANES), c2),                        # fc2 w
            pl.BlockSpec((1, LANES), c2),                            # fc2 bias
            pl.BlockSpec((LANES, LANES), c2),                        # fc3 w
            pl.BlockSpec((1, LANES), c2),                            # fc3 bias
        ],
        out_specs=pl.BlockSpec((img_tile, LANES), lambda b: (b, 0)),
        scratch_shapes=[
            pltpu.VMEM((img_tile * 32, LANES), jnp.float32),   # conv1 width-pooled
            pltpu.VMEM((img_tile * 16, LANES), jnp.float32),   # conv2 input slab
            pltpu.VMEM((img_tile * 16, LANES), jnp.float32),   # conv2 width-pooled
        ],
        compiler_params=pltpu.CompilerParams(
            dimension_semantics=("parallel",),   # v7x: grid steps across both TCs
            vmem_limit_bytes=32 * 1024 * 1024,
        ),
    )(x, packed["w1"], packed["b1"], packed["w2"], packed["b2"],
      packed["fw1"], packed["fb1"], packed["fw2"], packed["fb2"],
      packed["fw3"], packed["fb3"])
    return out[:B, :num_classes]


# ----------------------- pure-JAX reference (for checking) -------------------

def reference_forward(params, x, num_classes):
    def conv(z, w, b):
        y = lax.conv_general_dilated(z, w, (1, 1), "VALID",
                                     dimension_numbers=("NCHW", "OIHW", "NCHW"))
        return y + b[None, :, None, None]

    def pool(z):
        return lax.reduce_window(z, -jnp.inf, lax.max,
                                 (1, 1, 2, 2), (1, 1, 2, 2), "VALID")

    y = pool(jnp.maximum(conv(x, params["conv1_w"], params["conv1_b"]), 0.0))
    y = pool(jnp.maximum(conv(y, params["conv2_w"], params["conv2_b"]), 0.0))
    y = y.reshape(y.shape[0], 16 * 5 * 5)                 # NCHW flatten, as torch
    y = jnp.maximum(y @ params["fc1_w"].T + params["fc1_b"], 0.0)
    y = jnp.maximum(y @ params["fc2_w"].T + params["fc2_b"], 0.0)
    return (y @ params["fc3_w"].T + params["fc3_b"])[:, :num_classes]


# ----------------------------------- init ------------------------------------

def init_params(key, num_classes=10):
    ks = jax.random.split(key, 10)

    def u(k, shape, fan_in):
        bound = 1.0 / np.sqrt(float(fan_in))
        return jax.random.uniform(k, shape, jnp.float32, -bound, bound)

    return {
        "conv1_w": u(ks[0], (6, 3, 5, 5), 75),     "conv1_b": u(ks[1], (6,), 75),
        "conv2_w": u(ks[2], (16, 6, 5, 5), 150),   "conv2_b": u(ks[3], (16,), 150),
        "fc1_w":   u(ks[4], (120, 400), 400),      "fc1_b":   u(ks[5], (120,), 400),
        "fc2_w":   u(ks[6], (84, 120), 120),       "fc2_b":   u(ks[7], (84,), 120),
        "fc3_w":   u(ks[8], (num_classes, 84), 84),
        "fc3_b":   u(ks[9], (num_classes,), 84),
    }


if __name__ == "__main__":
    key = jax.random.PRNGKey(0)
    kx, kp = jax.random.split(key)
    # 32x32x3 input is required by the module (16*5*5 flatten after 2x conv+pool).
    B, num_classes = 16, 10
    x = jax.random.normal(kx, (B, 3, 32, 32), jnp.float32)

    params = init_params(kp, num_classes)
    packed = pack_params(params)                    # one-time host-side packing

    fwd = jax.jit(functools.partial(cnn_cifar_forward,
                                    num_classes=num_classes, img_tile=8))
    out = jax.block_until_ready(fwd(packed, x))
    assert out.shape == (B, num_classes) and out.dtype == jnp.float32

    # sanity-check against a pure-JAX/XLA reference (bf16 MXU operands => loose tol)
    ref = jax.block_until_ready(reference_forward(params, x, num_classes))
    err = jnp.max(jnp.abs(out - ref))
    assert jnp.allclose(out, ref, atol=0.2, rtol=0.2), f"max abs err {err}"

    print("KERNEL_OK")
</pallas_src>

<mosaic_0001>
module attributes {stable_mosaic.version = 11 : i64} {
  func.func @_cnn_cifar_kernel(%arg0: i32, %arg1: memref<256x128xf32, #tpu.memory_space<vmem>>, %arg2: memref<5x128x256xbf16, #tpu.memory_space<vmem>>, %arg3: memref<1x256xf32, #tpu.memory_space<vmem>>, %arg4: memref<5x128x256xbf16, #tpu.memory_space<vmem>>, %arg5: memref<1x256xf32, #tpu.memory_space<vmem>>, %arg6: memref<640x128xbf16, #tpu.memory_space<vmem>>, %arg7: memref<1x128xf32, #tpu.memory_space<vmem>>, %arg8: memref<128x128xbf16, #tpu.memory_space<vmem>>, %arg9: memref<1x128xf32, #tpu.memory_space<vmem>>, %arg10: memref<128x128xbf16, #tpu.memory_space<vmem>>, %arg11: memref<1x128xf32, #tpu.memory_space<vmem>>, %arg12: memref<8x128xf32, #tpu.memory_space<vmem>>, %arg13: memref<256x128xf32, #tpu.memory_space<vmem>>, %arg14: memref<128x128xf32, #tpu.memory_space<vmem>>, %arg15: memref<128x128xf32, #tpu.memory_space<vmem>>) attributes {dimension_semantics = [#tpu.dimension_semantics<parallel>], iteration_bounds = array<i64: 2>, scalar_prefetch = 0 : i64, scratch_operands = 3 : i64, tpu.core_type = #tpu.core_type<tc>, window_params = [{transform_indices = @transform_0, window_bounds = array<i64: 256, 128>}, {pipeline_mode = #tpu.pipeline_mode<synchronous>, transform_indices = @transform_1, window_bounds = array<i64: 5, 128, 256>}, {pipeline_mode = #tpu.pipeline_mode<synchronous>, transform_indices = @transform_2, window_bounds = array<i64: 1, 256>}, {pipeline_mode = #tpu.pipeline_mode<synchronous>, transform_indices = @transform_3, window_bounds = array<i64: 5, 128, 256>}, {pipeline_mode = #tpu.pipeline_mode<synchronous>, transform_indices = @transform_4, window_bounds = array<i64: 1, 256>}, {pipeline_mode = #tpu.pipeline_mode<synchronous>, transform_indices = @transform_5, window_bounds = array<i64: 640, 128>}, {pipeline_mode = #tpu.pipeline_mode<synchronous>, transform_indices = @transform_6, window_bounds = array<i64: 1, 128>}, {pipeline_mode = #tpu.pipeline_mode<synchronous>, transform_indices = @transform_7, window_bounds = array<i64: 128, 128>}, {pipeline_mode = #tpu.pipeline_mode<synchronous>, transform_indices = @transform_8, window_bounds = array<i64: 1, 128>}, {pipeline_mode = #tpu.pipeline_mode<synchronous>, transform_indices = @transform_9, window_bounds = array<i64: 128, 128>}, {pipeline_mode = #tpu.pipeline_mode<synchronous>, transform_indices = @transform_10, window_bounds = array<i64: 1, 128>}, {transform_indices = @transform_11, window_bounds = array<i64: 8, 128>}]} {
    %c0 = arith.constant 0 : index
    %c0_0 = arith.constant 0 : index
    %0 = vector.load %arg1[%c0, %c0_0] : memref<256x128xf32, #tpu.memory_space<vmem>>, vector<252x128xf32>
    %1 = arith.truncf %0 : vector<252x128xf32> to vector<252x128xbf16>
    %c0_1 = arith.constant 0 : index
    %c0_2 = arith.constant 0 : index
    %c0_3 = arith.constant 0 : index
    %2 = vector.load %arg2[%c0_1, %c0_2, %c0_3] : memref<5x128x256xbf16, #tpu.memory_space<vmem>>, vector<1x128x256xbf16>
    %3 = vector.shape_cast %2 : vector<1x128x256xbf16> to vector<128x256xbf16>
    %cst = arith.constant dense<0.000000e+00> : vector<252x256xf32>
    %4 = tpu.matmul %1, %3, %cst {dimension_numbers = #tpu.dot_dimension_numbers<[1], [0], [0], [1], [0, 0, 1, 1], [], []>} : vector<252x128xbf16>, vector<128x256xbf16>, vector<252x256xf32> -> vector<252x256xf32>
    %c1 = arith.constant 1 : index
    %c0_4 = arith.constant 0 : index
    %5 = vector.load %arg1[%c1, %c0_4] : memref<256x128xf32, #tpu.memory_space<vmem>>, vector<252x128xf32>
    %6 = arith.truncf %5 : vector<252x128xf32> to vector<252x128xbf16>
    %c1_5 = arith.constant 1 : index
    %c0_6 = arith.constant 0 : index
    %c0_7 = arith.constant 0 : index
    %7 = vector.load %arg2[%c1_5, %c0_6, %c0_7] : memref<5x128x256xbf16, #tpu.memory_space<vmem>>, vector<1x128x256xbf16>
    %8 = vector.shape_cast %7 : vector<1x128x256xbf16> to vector<128x256xbf16>
    %cst_8 = arith.constant dense<0.000000e+00> : vector<252x256xf32>
    %9 = tpu.matmul %6, %8, %cst_8 {dimension_numbers = #tpu.dot_dimension_numbers<[1], [0], [0], [1], [0, 0, 1, 1], [], []>} : vector<252x128xbf16>, vector<128x256xbf16>, vector<252x256xf32> -> vector<252x256xf32>
    %10 = arith.addf %4, %9 : vector<252x256xf32>
    %c2 = arith.constant 2 : index
    %c0_9 = arith.constant 0 : index
    %11 = vector.load %arg1[%c2, %c0_9] : memref<256x128xf32, #tpu.memory_space<vmem>>, vector<252x128xf32>
    %12 = arith.truncf %11 : vector<252x128xf32> to vector<252x128xbf16>
    %c2_10 = arith.constant 2 : index
    %c0_11 = arith.constant 0 : index
    %c0_12 = arith.constant 0 : index
    %13 = vector.load %arg2[%c2_10, %c0_11, %c0_12] : memref<5x128x256xbf16, #tpu.memory_space<vmem>>, vector<1x128x256xbf16>
    %14 = vector.shape_cast %13 : vector<1x128x256xbf16> to vector<128x256xbf16>
    %cst_13 = arith.constant dense<0.000000e+00> : vector<252x256xf32>
    %15 = tpu.matmul %12, %14, %cst_13 {dimension_numbers = #tpu.dot_dimension_numbers<[1], [0], [0], [1], [0, 0, 1, 1], [], []>} : vector<252x128xbf16>, vector<128x256xbf16>, vector<252x256xf32> -> vector<252x256xf32>
    %16 = arith.addf %10, %15 : vector<252x256xf32>
    %c3 = arith.constant 3 : index
    %c0_14 = arith.constant 0 : index
    %17 = vector.load %arg1[%c3, %c0_14] : memref<256x128xf32, #tpu.memory_space<vmem>>, vector<252x128xf32>
    %18 = arith.truncf %17 : vector<252x128xf32> to vector<252x128xbf16>
    %c3_15 = arith.constant 3 : index
    %c0_16 = arith.constant 0 : index
    %c0_17 = arith.constant 0 : index
    %19 = vector.load %arg2[%c3_15, %c0_16, %c0_17] : memref<5x128x256xbf16, #tpu.memory_space<vmem>>, vector<1x128x256xbf16>
    %20 = vector.shape_cast %19 : vector<1x128x256xbf16> to vector<128x256xbf16>
    %cst_18 = arith.constant dense<0.000000e+00> : vector<252x256xf32>
    %21 = tpu.matmul %18, %20, %cst_18 {dimension_numbers = #tpu.dot_dimension_numbers<[1], [0], [0], [1], [0, 0, 1, 1], [], []>} : vector<252x128xbf16>, vector<128x256xbf16>, vector<252x256xf32> -> vector<252x256xf32>
    %22 = arith.addf %16, %21 : vector<252x256xf32>
    %c4 = arith.constant 4 : index
    %c0_19 = arith.constant 0 : index
    %23 = vector.load %arg1[%c4, %c0_19] : memref<256x128xf32, #tpu.memory_space<vmem>>, vector<252x128xf32>
    %24 = arith.truncf %23 : vector<252x128xf32> to vector<252x128xbf16>
    %c4_20 = arith.constant 4 : index
    %c0_21 = arith.constant 0 : index
    %c0_22 = arith.constant 0 : index
    %25 = vector.load %arg2[%c4_20, %c0_21, %c0_22] : memref<5x128x256xbf16, #tpu.memory_space<vmem>>, vector<1x128x256xbf16>
    %26 = vector.shape_cast %25 : vector<1x128x256xbf16> to vector<128x256xbf16>
    %cst_23 = arith.constant dense<0.000000e+00> : vector<252x256xf32>
    %27 = tpu.matmul %24, %26, %cst_23 {dimension_numbers = #tpu.dot_dimension_numbers<[1], [0], [0], [1], [0, 0, 1, 1], [], []>} : vector<252x128xbf16>, vector<128x256xbf16>, vector<252x256xf32> -> vector<252x256xf32>
    %28 = arith.addf %22, %27 : vector<252x256xf32>
    %c0_24 = arith.constant 0 : index
    %c0_25 = arith.constant 0 : index
    %29 = vector.load %arg3[%c0_24, %c0_25] : memref<1x256xf32, #tpu.memory_space<vmem>>, vector<1x256xf32>
    %30 = vector.broadcast %29 : vector<1x256xf32> to vector<252x256xf32>
    %31 = arith.addf %28, %30 : vector<252x256xf32>
    %cst_26 = arith.constant 0.000000e+00 : f32
    %32 = vector.broadcast %cst_26 : f32 to vector<252x256xf32>
    %33 = arith.maximumf %31, %32 : vector<252x256xf32>
    %34 = vector.extract_strided_slice %33 {offsets = [0, 0], sizes = [252, 128], strides = [1, 1]} : vector<252x256xf32> to vector<252x128xf32>
    %35 = vector.extract_strided_slice %33 {offsets = [0, 128], sizes = [252, 128], strides = [1, 1]} : vector<252x256xf32> to vector<252x128xf32>
    %36 = arith.maximumf %34, %35 : vector<252x128xf32>
    %c0_27 = arith.constant 0 : index
    %c0_28 = arith.constant 0 : index
    %37 = vector.load %arg13[%c0_27, %c0_28] : memref<256x128xf32, #tpu.memory_space<vmem>>, vector<252x128xf32>
    tpu.vector_store %arg13[%c0_27, %c0_28], %36 {strides = array<i32>} : memref<256x128xf32, #tpu.memory_space<vmem>>, vector<252x128xf32>,
    %c0_29 = arith.constant 0 : index
    %c0_30 = arith.constant 0 : index
    %38 = tpu.strided_load %arg13[%c0_29, %c0_30] {strides = array<i32: 2, 1>} : memref<256x128xf32, #tpu.memory_space<vmem>>, vector<128x128xf32>
    %c1_31 = arith.constant 1 : index
    %c0_32 = arith.constant 0 : index
    %39 = tpu.strided_load %arg13[%c1_31, %c0_32] {strides = array<i32: 2, 1>} : memref<256x128xf32, #tpu.memory_space<vmem>>, vector<128x128xf32>
    %40 = arith.maximumf %38, %39 : vector<128x128xf32>
    %c0_33 = arith.constant 0 : index
    %c0_34 = arith.constant 0 : index
    %41 = vector.load %arg14[%c0_33, %c0_34] : memref<128x128xf32, #tpu.memory_space<vmem>>, vector<128x128xf32>
    tpu.vector_store %arg14[%c0_33, %c0_34], %40 {strides = array<i32>} : memref<128x128xf32, #tpu.memory_space<vmem>>, vector<128x128xf32>,
    %c0_35 = arith.constant 0 : index
    %c0_36 = arith.constant 0 : index
    %42 = vector.load %arg14[%c0_35, %c0_36] : memref<128x128xf32, #tpu.memory_space<vmem>>, vector<124x128xf32>
    %43 = arith.truncf %42 : vector<124x128xf32> to vector<124x128xbf16>
    %c0_37 = arith.constant 0 : index
    %c0_38 = arith.constant 0 : index
    %c0_39 = arith.constant 0 : index
    %44 = vector.load %arg4[%c0_37, %c0_38, %c0_39] : memref<5x128x256xbf16, #tpu.memory_space<vmem>>, vector<1x128x256xbf16>
    %45 = vector.shape_cast %44 : vector<1x128x256xbf16> to vector<128x256xbf16>
    %cst_40 = arith.constant dense<0.000000e+00> : vector<124x256xf32>
    %46 = tpu.matmul %43, %45, %cst_40 {dimension_numbers = #tpu.dot_dimension_numbers<[1], [0], [0], [1], [0, 0, 1, 1], [], []>} : vector<124x128xbf16>, vector<128x256xbf16>, vector<124x256xf32> -> vector<124x256xf32>
    %c1_41 = arith.constant 1 : index
    %c0_42 = arith.constant 0 : index
    %47 = vector.load %arg14[%c1_41, %c0_42] : memref<128x128xf32, #tpu.memory_space<vmem>>, vector<124x128xf32>
    %48 = arith.truncf %47 : vector<124x128xf32> to vector<124x128xbf16>
    %c1_43 = arith.constant 1 : index
    %c0_44 = arith.constant 0 : index
    %c0_45 = arith.constant 0 : index
    %49 = vector.load %arg4[%c1_43, %c0_44, %c0_45] : memref<5x128x256xbf16, #tpu.memory_space<vmem>>, vector<1x128x256xbf16>
    %50 = vector.shape_cast %49 : vector<1x128x256xbf16> to vector<128x256xbf16>
    %cst_46 = arith.constant dense<0.000000e+00> : vector<124x256xf32>
    %51 = tpu.matmul %48, %50, %cst_46 {dimension_numbers = #tpu.dot_dimension_numbers<[1], [0], [0], [1], [0, 0, 1, 1], [], []>} : vector<124x128xbf16>, vector<128x256xbf16>, vector<124x256xf32> -> vector<124x256xf32>
    %52 = arith.addf %46, %51 : vector<124x256xf32>
    %c2_47 = arith.constant 2 : index
    %c0_48 = arith.constant 0 : index
    %53 = vector.load %arg14[%c2_47, %c0_48] : memref<128x128xf32, #tpu.memory_space<vmem>>, vector<124x128xf32>
    %54 = arith.truncf %53 : vector<124x128xf32> to vector<124x128xbf16>
    %c2_49 = arith.constant 2 : index
    %c0_50 = arith.constant 0 : index
    %c0_51 = arith.constant 0 : index
    %55 = vector.load %arg4[%c2_49, %c0_50, %c0_51] : memref<5x128x256xbf16, #tpu.memory_space<vmem>>, vector<1x128x256xbf16>
    %56 = vector.shape_cast %55 : vector<1x128x256xbf16> to vector<128x256xbf16>
    %cst_52 = arith.constant dense<0.000000e+00> : vector<124x256xf32>
    %57 = tpu.matmul %54, %56, %cst_52 {dimension_numbers = #tpu.dot_dimension_numbers<[1], [0], [0], [1], [0, 0, 1, 1], [], []>} : vector<124x128xbf16>, vector<128x256xbf16>, vector<124x256xf32> -> vector<124x256xf32>
    %58 = arith.addf %52, %57 : vector<124x256xf32>
    %c3_53 = arith.constant 3 : index
    %c0_54 = arith.constant 0 : index
    %59 = vector.load %arg14[%c3_53, %c0_54] : memref<128x128xf32, #tpu.memory_space<vmem>>, vector<124x128xf32>
    %60 = arith.truncf %59 : vector<124x128xf32> to vector<124x128xbf16>
    %c3_55 = arith.constant 3 : index
    %c0_56 = arith.constant 0 : index
    %c0_57 = arith.constant 0 : index
    %61 = vector.load %arg4[%c3_55, %c0_56, %c0_57] : memref<5x128x256xbf16, #tpu.memory_space<vmem>>, vector<1x128x256xbf16>
    %62 = vector.shape_cast %61 : vector<1x128x256xbf16> to vector<128x256xbf16>
    %cst_58 = arith.constant dense<0.000000e+00> : vector<124x256xf32>
    %63 = tpu.matmul %60, %62, %cst_58 {dimension_numbers = #tpu.dot_dimension_numbers<[1], [0], [0], [1], [0, 0, 1, 1], [], []>} : vector<124x128xbf16>, vector<128x256xbf16>, vector<124x256xf32> -> vector<124x256xf32>
    %64 = arith.addf %58, %63 : vector<124x256xf32>
    %c4_59 = arith.constant 4 : index
    %c0_60 = arith.constant 0 : index
    %65 = vector.load %arg14[%c4_59, %c0_60] : memref<128x128xf32, #tpu.memory_space<vmem>>, vector<124x128xf32>
    %66 = arith.truncf %65 : vector<124x128xf32> to vector<124x128xbf16>
    %c4_61 = arith.constant 4 : index
    %c0_62 = arith.constant 0 : index
    %c0_63 = arith.constant 0 : index
    %67 = vector.load %arg4[%c4_61, %c0_62, %c0_63] : memref<5x128x256xbf16, #tpu.memory_space<vmem>>, vector<1x128x256xbf16>
    %68 = vector.shape_cast %67 : vector<1x128x256xbf16> to vector<128x256xbf16>
    %cst_64 = arith.constant dense<0.000000e+00> : vector<124x256xf32>
    %69 = tpu.matmul %66, %68, %cst_64 {dimension_numbers = #tpu.dot_dimension_numbers<[1], [0], [0], [1], [0, 0, 1, 1], [], []>} : vector<124x128xbf16>, vector<128x256xbf16>, vector<124x256xf32> -> vector<124x256xf32>
    %70 = arith.addf %64, %69 : vector<124x256xf32>
    %c0_65 = arith.constant 0 : index
    %c0_66 = arith.constant 0 : index
    %71 = vector.load %arg5[%c0_65, %c0_66] : memref<1x256xf32, #tpu.memory_space<vmem>>, vector<1x256xf32>
    %72 = vector.broadcast %71 : vector<1x256xf32> to vector<124x256xf32>
    %73 = arith.addf %70, %72 : vector<124x256xf32>
    %cst_67 = arith.constant 0.000000e+00 : f32
    %74 = vector.broadcast %cst_67 : f32 to vector<124x256xf32>
    %75 = arith.maximumf %73, %74 : vector<124x256xf32>
    %76 = vector.extract_strided_slice %75 {offsets = [0, 0], sizes = [124, 128], strides = [1, 1]} : vector<124x256xf32> to vector<124x128xf32>
    %77 = vector.extract_strided_slice %75 {offsets = [0, 128], sizes = [124, 128], strides = [1, 1]} : vector<124x256xf32> to vector<124x128xf32>
    %78 = arith.maximumf %76, %77 : vector<124x128xf32>
    %c0_68 = arith.constant 0 : index
    %c0_69 = arith.constant 0 : index
    %79 = vector.load %arg15[%c0_68, %c0_69] : memref<128x128xf32, #tpu.memory_space<vmem>>, vector<124x128xf32>
    tpu.vector_store %arg15[%c0_68, %c0_69], %78 {strides = array<i32>} : memref<128x128xf32, #tpu.memory_space<vmem>>, vector<124x128xf32>,
    %c0_70 = arith.constant 0 : index
    %c0_71 = arith.constant 0 : index
    %80 = tpu.strided_load %arg15[%c0_70, %c0_71] {strides = array<i32: 16, 1>} : memref<128x128xf32, #tpu.memory_space<vmem>>, vector<8x128xf32>
    %c1_72 = arith.constant 1 : index
    %c0_73 = arith.constant 0 : index
    %81 = tpu.strided_load %arg15[%c1_72, %c0_73] {strides = array<i32: 16, 1>} : memref<128x128xf32, #tpu.memory_space<vmem>>, vector<8x128xf32>
    %82 = arith.maximumf %80, %81 : vector<8x128xf32>
    %c2_74 = arith.constant 2 : index
    %c0_75 = arith.constant 0 : index
    %83 = tpu.strided_load %arg15[%c2_74, %c0_75] {strides = array<i32: 16, 1>} : memref<128x128xf32, #tpu.memory_space<vmem>>, vector<8x128xf32>
    %c3_76 = arith.constant 3 : index
    %c0_77 = arith.constant 0 : index
    %84 = tpu.strided_load %arg15[%c3_76, %c0_77] {strides = array<i32: 16, 1>} : memref<128x128xf32, #tpu.memory_space<vmem>>, vector<8x128xf32>
    %85 = arith.maximumf %83, %84 : vector<8x128xf32>
    %c4_78 = arith.constant 4 : index
    %c0_79 = arith.constant 0 : index
    %86 = tpu.strided_load %arg15[%c4_78, %c0_79] {strides = array<i32: 16, 1>} : memref<128x128xf32, #tpu.memory_space<vmem>>, vector<8x128xf32>
    %c5 = arith.constant 5 : index
    %c0_80 = arith.constant 0 : index
    %87 = tpu.strided_load %arg15[%c5, %c0_80] {strides = array<i32: 16, 1>} : memref<128x128xf32, #tpu.memory_space<vmem>>, vector<8x128xf32>
    %88 = arith.maximumf %86, %87 : vector<8x128xf32>
    %c6 = arith.constant 6 : index
    %c0_81 = arith.constant 0 : index
    %89 = tpu.strided_load %arg15[%c6, %c0_81] {strides = array<i32: 16, 1>} : memref<128x128xf32, #tpu.memory_space<vmem>>, vector<8x128xf32>
    %c7 = arith.constant 7 : index
    %c0_82 = arith.constant 0 : index
    %90 = tpu.strided_load %arg15[%c7, %c0_82] {strides = array<i32: 16, 1>} : memref<128x128xf32, #tpu.memory_space<vmem>>, vector<8x128xf32>
    %91 = arith.maximumf %89, %90 : vector<8x128xf32>
    %c8 = arith.constant 8 : index
    %c0_83 = arith.constant 0 : index
    %92 = tpu.strided_load %arg15[%c8, %c0_83] {strides = array<i32: 16, 1>} : memref<128x128xf32, #tpu.memory_space<vmem>>, vector<8x128xf32>
    %c9 = arith.constant 9 : index
    %c0_84 = arith.constant 0 : index
    %93 = tpu.strided_load %arg15[%c9, %c0_84] {strides = array<i32: 16, 1>} : memref<128x128xf32, #tpu.memory_space<vmem>>, vector<8x128xf32>
    %94 = arith.maximumf %92, %93 : vector<8x128xf32>
    %95 = tpu.concatenate %82, %85, %88, %91, %94 in 1 : vector<8x128xf32>, vector<8x128xf32>, vector<8x128xf32>, vector<8x128xf32>, vector<8x128xf32> -> vector<8x640xf32>
    %96 = arith.truncf %95 : vector<8x640xf32> to vector<8x640xbf16>
    %c0_85 = arith.constant 0 : index
    %c0_86 = arith.constant 0 : index
    %97 = vector.load %arg6[%c0_85, %c0_86] : memref<640x128xbf16, #tpu.memory_space<vmem>>, vector<640x128xbf16>
    %cst_87 = arith.constant dense<0.000000e+00> : vector<8x128xf32>
    %98 = tpu.matmul %96, %97, %cst_87 {dimension_numbers = #tpu.dot_dimension_numbers<[1], [0], [0], [1], [0, 0, 1, 1], [], []>} : vector<8x640xbf16>, vector<640x128xbf16>, vector<8x128xf32> -> vector<8x128xf32>
    %c0_88 = arith.constant 0 : index
    %c0_89 = arith.constant 0 : index
    %99 = vector.load %arg7[%c0_88, %c0_89] : memref<1x128xf32, #tpu.memory_space<vmem>>, vector<1x128xf32>
    %100 = vector.broadcast %99 : vector<1x128xf32> to vector<8x128xf32>
    %101 = arith.addf %98, %100 : vector<8x128xf32>
    %cst_90 = arith.constant 0.000000e+00 : f32
    %102 = vector.broadcast %cst_90 : f32 to vector<8x128xf32>
    %103 = arith.maximumf %101, %102 : vector<8x128xf32>
    %104 = arith.truncf %103 : vector<8x128xf32> to vector<8x128xbf16>
    %c0_91 = arith.constant 0 : index
    %c0_92 = arith.constant 0 : index
    %105 = vector.load %arg8[%c0_91, %c0_92] : memref<128x128xbf16, #tpu.memory_space<vmem>>, vector<128x128xbf16>
    %cst_93 = arith.constant dense<0.000000e+00> : vector<8x128xf32>
    %106 = tpu.matmul %104, %105, %cst_93 {dimension_numbers = #tpu.dot_dimension_numbers<[1], [0], [0], [1], [0, 0, 1, 1], [], []>} : vector<8x128xbf16>, vector<128x128xbf16>, vector<8x128xf32> -> vector<8x128xf32>
    %c0_94 = arith.constant 0 : index
    %c0_95 = arith.constant 0 : index
    %107 = vector.load %arg9[%c0_94, %c0_95] : memref<1x128xf32, #tpu.memory_space<vmem>>, vector<1x128xf32>
    %108 = vector.broadcast %107 : vector<1x128xf32> to vector<8x128xf32>
    %109 = arith.addf %106, %108 : vector<8x128xf32>
    %cst_96 = arith.constant 0.000000e+00 : f32
    %110 = vector.broadcast %cst_96 : f32 to vector<8x128xf32>
    %111 = arith.maximumf %109, %110 : vector<8x128xf32>
    %112 = arith.truncf %111 : vector<8x128xf32> to vector<8x128xbf16>
    %c0_97 = arith.constant 0 : index
    %c0_98 = arith.constant 0 : index
    %113 = vector.load %arg10[%c0_97, %c0_98] : memref<128x128xbf16, #tpu.memory_space<vmem>>, vector<128x128xbf16>
    %cst_99 = arith.constant dense<0.000000e+00> : vector<8x128xf32>
    %114 = tpu.matmul %112, %113, %cst_99 {dimension_numbers = #tpu.dot_dimension_numbers<[1], [0], [0], [1], [0, 0, 1, 1], [], []>} : vector<8x128xbf16>, vector<128x128xbf16>, vector<8x128xf32> -> vector<8x128xf32>
    %c0_100 = arith.constant 0 : index
    %c0_101 = arith.constant 0 : index
    %115 = vector.load %arg11[%c0_100, %c0_101] : memref<1x128xf32, #tpu.memory_space<vmem>>, vector<1x128xf32>
    %116 = vector.broadcast %115 : vector<1x128xf32> to vector<8x128xf32>
    %117 = arith.addf %114, %116 : vector<8x128xf32>
    %c0_102 = arith.constant 0 : index
    %c0_103 = arith.constant 0 : index
    %118 = vector.load %arg12[%c0_102, %c0_103] : memref<8x128xf32, #tpu.memory_space<vmem>>, vector<8x128xf32>
    tpu.vector_store %arg12[%c0_102, %c0_103], %117 {strides = array<i32>} : memref<8x128xf32, #tpu.memory_space<vmem>>, vector<8x128xf32>,
    return
  }
  func.func @transform_0(%arg0: i32) -> (i32, i32) {
    %c0_i32 = arith.constant 0 : i32
    %c0_i32_0 = arith.constant 0 : i32
    return %arg0, %c0_i32 : i32, i32
  }
  func.func @transform_1(%arg0: i32) -> (i32, i32, i32) {
    %c0_i32 = arith.constant 0 : i32
    %c0_i32_0 = arith.constant 0 : i32
    %c0_i32_1 = arith.constant 0 : i32
    %c0_i32_2 = arith.constant 0 : i32
    return %c0_i32, %c0_i32_0, %c0_i32_1 : i32, i32, i32
  }
  func.func @transform_2(%arg0: i32) -> (i32, i32) {
    %c0_i32 = arith.constant 0 : i32
    %c0_i32_0 = arith.constant 0 : i32
    %c0_i32_1 = arith.constant 0 : i32
    return %c0_i32, %c0_i32_0 : i32, i32
  }
  func.func @transform_3(%arg0: i32) -> (i32, i32, i32) {
    %c0_i32 = arith.constant 0 : i32
    %c0_i32_0 = arith.constant 0 : i32
    %c0_i32_1 = arith.constant 0 : i32
    %c0_i32_2 = arith.constant 0 : i32
    return %c0_i32, %c0_i32_0, %c0_i32_1 : i32, i32, i32
  }
  func.func @transform_4(%arg0: i32) -> (i32, i32) {
    %c0_i32 = arith.constant 0 : i32
    %c0_i32_0 = arith.constant 0 : i32
    %c0_i32_1 = arith.constant 0 : i32
    return %c0_i32, %c0_i32_0 : i32, i32
  }
  func.func @transform_5(%arg0: i32) -> (i32, i32) {
    %c0_i32 = arith.constant 0 : i32
    %c0_i32_0 = arith.constant 0 : i32
    %c0_i32_1 = arith.constant 0 : i32
    return %c0_i32, %c0_i32_0 : i32, i32
  }
  func.func @transform_6(%arg0: i32) -> (i32, i32) {
    %c0_i32 = arith.constant 0 : i32
    %c0_i32_0 = arith.constant 0 : i32
    %c0_i32_1 = arith.constant 0 : i32
    return %c0_i32, %c0_i32_0 : i32, i32
  }
  func.func @transform_7(%arg0: i32) -> (i32, i32) {
    %c0_i32 = arith.constant 0 : i32
    %c0_i32_0 = arith.constant 0 : i32
    %c0_i32_1 = arith.constant 0 : i32
    return %c0_i32, %c0_i32_0 : i32, i32
  }
  func.func @transform_8(%arg0: i32) -> (i32, i32) {
    %c0_i32 = arith.constant 0 : i32
    %c0_i32_0 = arith.constant 0 : i32
    %c0_i32_1 = arith.constant 0 : i32
    return %c0_i32, %c0_i32_0 : i32, i32
  }
  func.func @transform_9(%arg0: i32) -> (i32, i32) {
    %c0_i32 = arith.constant 0 : i32
    %c0_i32_0 = arith.constant 0 : i32
    %c0_i32_1 = arith.constant 0 : i32
    return %c0_i32, %c0_i32_0 : i32, i32
  }
  func.func @transform_10(%arg0: i32) -> (i32, i32) {
    %c0_i32 = arith.constant 0 : i32
    %c0_i32_0 = arith.constant 0 : i32
    %c0_i32_1 = arith.constant 0 : i32
    return %c0_i32, %c0_i32_0 : i32, i32
  }
  func.func @transform_11(%arg0: i32) -> (i32, i32) {
    %c0_i32 = arith.constant 0 : i32
    %c0_i32_0 = arith.constant 0 : i32
    return %arg0, %c0_i32 : i32, i32
  }
}

</mosaic_0001>

<bundles_post_ra>
// kernel: cnn_cifar_forward.1
= control target key start
LH: loop header
LB: loop body
LE: loop exit
PB: predicated region body
PF: predicated region fallthrough
CT: control target
= control target key end

     0   :  { %16 = vsyncpa [#allocation6], 0  ;;  %s7540_s0 = inlined_call_operand.vmem [shape: f32[512,128], index: 0, kind: input, shape index: {}]   ;;  %s7541_s1 = inlined_call_operand.vmem [shape: bf16[5,128,256], index: 1, kind: input, shape index: {}]   ;;  %s7542_s2 = inlined_call_operand.vmem [shape: f32[1,256], index: 2, kind: input, shape index: {}]   ;;  %s7543_s3 = inlined_call_operand.vmem [shape: bf16[5,128,256], index: 3, kind: input, shape index: {}]   ;;  %s7544_s4 = inlined_call_operand.vmem [shape: f32[1,256], index: 4, kind: input, shape index: {}]   ;;  %s7545_s5 = inlined_call_operand.vmem [shape: bf16[640,128], index: 5, kind: input, shape index: {}]   ;;  %s7546_s6 = inlined_call_operand.vmem [shape: f32[1,128], index: 6, kind: input, shape index: {}]   ;;  %s7547_s7 = inlined_call_operand.vmem [shape: bf16[128,128], index: 7, kind: input, shape index: {}]   ;;  %s7548_s8 = inlined_call_operand.vmem [shape: f32[1,128], index: 8, kind: input, shape index: {}]   ;;  %s7549_s9 = inlined_call_operand.vmem [shape: bf16[128,128], index: 9, kind: input, shape index: {}]   ;;  %s7550_s10 = inlined_call_operand.vmem [shape: f32[1,128], index: 10, kind: input, shape index: {}]   ;;  %s7551_s11 = inlined_call_operand.hbm [shape: f32[16,128], index: 11, kind: output, shape index: {}]  }
   0x1   :  { %18 = vsyncpa [#allocation6 + $0x1], 0  ;;  %s6132_s17 = smov 0   ;;  %s6134_s18 = smov 0  }
   0x2   :  { %s6136_s19 = smov 0   ;;  %s6138_s20 = smov 0  }
   0x3 LB: > { %s6153_s21 = sadd.s32 4294967295, %s6066_s20   ;;  %s4777_s22 = sadd.s32 4294967294, %s6066_s20   ;;  %s6066_s20 = sphi %s6138_s20, %s7580_s20   ;;  %s6062_s19 = sphi %s6136_s19, %s7579_s19   ;;  %s6058_s18 = sphi %s6134_s18, %s7578_s18   ;;  %s6054_s17 = sphi %s6132_s17, %s7577_s17  }
   0x4   : > { %s6157_s23 = sadd.s32 1, %s6066_s20   ;;  %s267_s24 = sadd.s32 1, %s6062_s19 }
   0x5   : > { %s264_s25 = ssub.s32 %s6066_s20, %s6157_s23  ;;  %p277_p0 = scmp.ne.s32.totalorder %s6062_s19, %s6058_s18 }
   0x6   : > { %p265_p1 = scmp.eq.s32.totalorder %s264_s25, 0  ;;  %p278_p2 = scmp.eq.s32.totalorder %s6153_s21, 1 }
   0x7   : > { %p283_p3 = scmp.ne.s32.totalorder %s6058_s18, %s6054_s17  ;;  %p284_p4 = scmp.eq.s32.totalorder %s4777_s22, 1 }
   0x8   : > { %s6168_s26 = scalar_select %p265_p1, %s6062_s19, %s267_s24  }
   0x9   : > { %p6170_p5 = por %p278_p2, %p277_p0  ;;  %p6174_p6 = por %p284_p4, %p283_p3 }
   0xa   : > { %7558 = sst [smem:[#allocation8_spill]] %s6168_s26  ;;  %p4780_p7 = scmp.ge.s32.totalorder %s6066_s20, 1 }
   0xb   : > { %p341_p8 = scmp.lt.s32.totalorder %s6066_s20, 3 }
   0xd   : > { %p342_p9 = pnand %p4780_p7, %p341_p8 }
   0xf   : > { %345 = sbr.rel (%p342_p9) target bundleno = 2053 (0x805), region = 64 }
  0x16   : > { %v5708_v0 = vld [vmem:[%s7541_s1 + $0x84] ss:$8 sps:$4 sm:$0xff]   ;;  %v5710_v1 = vld [vmem:[%s7541_s1 + $0x80] ss:$8 sps:$4 sm:$0xff]   ;;  %v7552_v2 = vmov 0   ;;  %s4782_s14 = sshll.u32 %s6153_s21, 5 }
  0x17   : > { %629 = vmatprep.mubr.bf16.mxu0 %v7552_v2  ;;  %669 = vmatprep.mubr.bf16.mxu1 %v7552_v2  ;;  %v5711_v3 = vld [vmem:[%s7541_s1 + $0x94] ss:$8 sps:$4 sm:$0xff]   ;;  %v5713_v4 = vld [vmem:[%s7541_s1 + $0x90] ss:$8 sps:$4 sm:$0xff]   ;;  %v5714_v5 = vld [vmem:[%s7541_s1 + $0xa4] ss:$8 sps:$4 sm:$0xff]  }
  0x18   : > { %597 = vmatprep.subr.bf16.mxu0 %v5708_v0  ;;  %5266 = vmatprep.subr.bf16.mxu1 %v5708_v0  ;;  %v5716_v6 = vld [vmem:[%s7541_s1 + $0xa0] ss:$8 sps:$4 sm:$0xff]   ;;  %v5717_v7 = vld [vmem:[%s7541_s1 + $0xb4] ss:$8 sps:$4 sm:$0xff]   ;;  %v5719_v8 = vld [vmem:[%s7541_s1 + $0xb0] ss:$8 sps:$4 sm:$0xff]  }
  0x19   : > { %598 = vmatpush1.bf16.msra.mxu0 %v5710_v1  ;;  %5274 = vmatpush1.bf16.msra.mxu1 %v5710_v1  ;;  %v5720_v9 = vld [vmem:[%s7541_s1 + $0xc4] ss:$8 sps:$4 sm:$0xff]   ;;  %p382_p10 = scmp.lt.s32.totalorder %s4782_s14, 63  ;;  %v5722_v10 = vld [vmem:[%s7541_s1 + $0xc0] ss:$8 sps:$4 sm:$0xff]   ;;  %vm6070_vm0 = vmmov 0  }
  0x1a   : > { %599 = vmatprep.subr.bf16.mxu0 %v5711_v3  ;;  %5267 = vmatprep.subr.bf16.mxu1 %v5711_v3  ;;  %v5723_v11 = vld [vmem:[%s7541_s1 + $0xd4] ss:$8 sps:$4 sm:$0xff]   ;;  %v5725_v12 = vld [vmem:[%s7541_s1 + $0xd0] ss:$8 sps:$4 sm:$0xff]   ;;  %v5726_v13 = vld [vmem:[%s7541_s1 + $0xe4] ss:$8 sps:$4 sm:$0xff]  }
  0x1b   : > { %s7582_s14 = smov (!%p382_p10, %s4782_s14), 63  ;;  %v5728_v14 = vld [vmem:[%s7541_s1 + $0xe0] ss:$8 sps:$4 sm:$0xff]   ;;  %v5729_v15 = vld [vmem:[%s7541_s1 + $0xf4] ss:$8 sps:$4 sm:$0xff]   ;;  %s378_s30 = sand.u32 1, %s6058_s18  }
  0x1c   : > { %s4783_s24 = sshll.u32 %s7582_s14, 3  ;;  %v5731_v16 = vld [vmem:[%s7541_s1 + $0xf0] ss:$8 sps:$4 sm:$0xff]   ;;  %v5734_v19 = vld [vmem:[%s7541_s1 + $0x4] ss:$8 sps:$4 sm:$0xff]   ;;  %s4781_s12 = sshll.u32 %s378_s30, 3 }
  0x1d   : > { %600 = vmatpush1.bf16.msra.mxu0 %v5713_v4  ;;  %5275 = vmatpush1.bf16.msra.mxu1 %v5713_v4  ;;  %s6228_s26 = scalar_lea.vmem %s7540_s0, %s4783_s24  ;;  %v5732_v21 = vld [vmem:[%s7541_s1] ss:$8 sps:$4 sm:$0xff]   ;;  %v5737_v22 = vld [vmem:[%s7541_s1 + $0x14] ss:$8 sps:$4 sm:$0xff]   ;;  %v5735_v23 = vld [vmem:[%s7541_s1 + $0x10] ss:$8 sps:$4 sm:$0xff]  }
  0x1e   : > { %601 = vmatprep.subr.bf16.mxu0 %v5714_v5  ;;  %5268 = vmatprep.subr.bf16.mxu1 %v5714_v5  ;;  %v452_v17 = vld [vmem:[%s6228_s26 + $0x1] sm:$0xff]  ;;  %v453_v18 = vld [vmem:[%s6228_s26 + $0x9] sm:$0xff]  ;;  %v454_v24 = vld [vmem:[%s6228_s26 + $0x11] sm:$0xff]  ;;  %s5132_s14 = sshll.u32 %s6153_s21, 7  ;;  %s380_s16 = scalar_lea.vmem [#allocation5], %s4781_s12 }
  0x1f   : > { %v484_v20 = vpack.c.bf16 %v453_v18, %v452_v17  ;;  %v455_v25 = vld [vmem:[%s6228_s26 + $0x19] sm:$0xff]  ;;  %v5740_v26 = vld [vmem:[%s7541_s1 + $0x24] ss:$8 sps:$4 sm:$0xff]   ;;  %v458_v38 = vld [vmem:[%s6228_s26 + $0x31] sm:$0xff]  ;;  %s4718_s22 = sshll.u32 %s380_s16, 4  ;;  %s7498_s25 = scalar_lea.hbm %s7551_s11, %s5132_s14  ;;  %s7500_s22 = int_to_ptr.vmem [resolvable:$true] %s4718_s22 }
  0x20   : > { %v485_v27 = vpack.c.bf16 %v455_v25, %v454_v24  ;;  %v5738_v28 = vld [vmem:[%s7541_s1 + $0x20] ss:$8 sps:$4 sm:$0xff]   ;;  %v5743_v29 = vld [vmem:[%s7541_s1 + $0x34] ss:$8 sps:$4 sm:$0xff]   ;;  %v5741_v30 = vld [vmem:[%s7541_s1 + $0x30] ss:$8 sps:$4 sm:$0xff]  }
  0x21   : > { %602 = vmatpush1.bf16.msra.mxu0 %v5716_v6  ;;  %5276 = vmatpush1.bf16.msra.mxu1 %v5716_v6  ;;  %v456_v31 = vld [vmem:[%s6228_s26 + $0x21] sm:$0xff]  ;;  %v457_v32 = vld [vmem:[%s6228_s26 + $0x29] sm:$0xff]  ;;  %v5749_v36 = vld [vmem:[%s7541_s1 + $0x54] ss:$8 sps:$4 sm:$0xff]   ;;  %s4705_s29 = scalar_lea.sflag [#allocation6], %s378_s30  ;;  %s6004_s21 = scalar_lea.vmem %s7500_s22, 128 }
  0x22   : > { %603 = vmatprep.subr.bf16.mxu0 %v5717_v7  ;;  %5269 = vmatprep.subr.bf16.mxu1 %v5717_v7  ;;  %v5746_v33 = vld [vmem:[%s7541_s1 + $0x44] ss:$8 sps:$4 sm:$0xff]   ;;  %v5744_v34 = vld [vmem:[%s7541_s1 + $0x40] ss:$8 sps:$4 sm:$0xff]   ;;  %v486_v35 = vpack.c.bf16 %v457_v32, %v456_v31  ;;  %v5747_v37 = vld [vmem:[%s7541_s1 + $0x50] ss:$8 sps:$4 sm:$0xff]   ;;  %p6005_p11 = scmp.ne.s32.totalorder %s7500_s22, %s6004_s21 }
  0x23   : > { %v459_v39 = vld [vmem:[%s6228_s26 + $0x39] sm:$0xff]  ;;  %v5752_v40 = vld [vmem:[%s7541_s1 + $0x64] ss:$8 sps:$4 sm:$0xff]   ;;  %v390_v51 = vld [vmem:[%s6228_s26 + $0x10] sm:$0xff]  ;;  %s6071_s12 = smov [#allocation5]  }
  0x24   : > { %v5750_v41 = vld [vmem:[%s7541_s1 + $0x60] ss:$8 sps:$4 sm:$0xff]   ;;  %v487_v42 = vpack.c.bf16 %v459_v39, %v458_v38  ;;  %v5755_v43 = vld [vmem:[%s7541_s1 + $0x74] ss:$8 sps:$4 sm:$0xff]   ;;  %v5753_v44 = vld [vmem:[%s7541_s1 + $0x70] ss:$8 sps:$4 sm:$0xff]   ;;  %p6006_p12 = pnand %p6005_p11, %p6170_p5 }
  0x25   : > { %604 = vmatpush1.bf16.msra.mxu0 %v5719_v8  ;;  %5277 = vmatpush1.bf16.msra.mxu1 %v5719_v8  ;;  %v388_v45 = vld [vmem:[%s6228_s26] sm:$0xff]  ;;  %v389_v46 = vld [vmem:[%s6228_s26 + $0x8] sm:$0xff]  ;;  %v5761_v50 = vld [vmem:[%s7541_s1 + $0x114] ss:$8 sps:$4 sm:$0xff]   ;;  %s6008_s13 = sshll.u32 %s6071_s12, 4  ;;  %s6009_s13 = int_to_ptr.vmem [resolvable:$false] %s6008_s13 }
  0x26   : > { %605 = vmatprep.subr.bf16.mxu0 %v5720_v9  ;;  %5270 = vmatprep.subr.bf16.mxu1 %v5720_v9  ;;  %v5758_v47 = vld [vmem:[%s7541_s1 + $0x104] ss:$8 sps:$4 sm:$0xff]   ;;  %v5756_v48 = vld [vmem:[%s7541_s1 + $0x100] ss:$8 sps:$4 sm:$0xff]   ;;  %v420_v49 = vpack.c.bf16 %v389_v46, %v388_v45  ;;  %v391_v52 = vld [vmem:[%s6228_s26 + $0x18] sm:$0xff]  ;;  %p6007_p13 = pneg %p6006_p12  ;;  %s6010_s15 = scalar_lea.vmem %s6009_s13, 256 }
  0x27   : > { %v5759_v53 = vld [vmem:[%s7541_s1 + $0x110] ss:$8 sps:$4 sm:$0xff]   ;;  %v5764_v54 = vld [vmem:[%s7541_s1 + $0x124] ss:$8 sps:$4 sm:$0xff]   ;;  %v5762_v55 = vld [vmem:[%s7541_s1 + $0x120] ss:$8 sps:$4 sm:$0xff]   ;;  %v421_v56 = vpack.c.bf16 %v391_v52, %v390_v51  ;;  %p6011_p0 = scmp.lt.s32.totalorder %s7500_s22, %s6009_s13  ;;  %p6012_p1 = scmp.lt.s32.totalorder %s6010_s15, %s6004_s21 }
  0x28   : > { %v5767_v57 = vld [vmem:[%s7541_s1 + $0x134] ss:$8 sps:$4 sm:$0xff]   ;;  %v392_v58 = vld [vmem:[%s6228_s26 + $0x20] sm:$0xff]  ;;  %v393_v59 = vld [vmem:[%s6228_s26 + $0x28] sm:$0xff] }
  0x29   : > { %606 = vmatpush1.bf16.msra.mxu0 %v5722_v10  ;;  %5278 = vmatpush1.bf16.msra.mxu1 %v5722_v10  ;;  %v5765_v60 = vld [vmem:[%s7541_s1 + $0x130] ss:$8 sps:$4 sm:$0xff]   ;;  %v5770_v61 = vld [vmem:[%s7541_s1 + $0x144] ss:$8 sps:$4 sm:$0xff]   ;;  %v5768_v62 = vld [vmem:[%s7541_s1 + $0x140] ss:$8 sps:$4 sm:$0xff]   ;;  %v422_v63 = vpack.c.bf16 %v393_v59, %v392_v58  ;;  %p6013_p2 = por %p6012_p1, %p6011_p0 }
  0x2a   : > { %607 = vmatprep.subr.bf16.mxu0 %v5723_v11  ;;  %5271 = vmatprep.subr.bf16.mxu1 %v5723_v11  ;;  %v5773_v0 = vld [vmem:[%s7541_s1 + $0x154] ss:$8 sps:$4 sm:$0xff]   ;;  %v5771_v4 = vld [vmem:[%s7541_s1 + $0x150] ss:$8 sps:$4 sm:$0xff]   ;;  %v5776_v5 = vld [vmem:[%s7541_s1 + $0x164] ss:$8 sps:$4 sm:$0xff]  }
  0x2b   : > { %v394_v1 = vld [vmem:[%s6228_s26 + $0x30] sm:$0xff]  ;;  %v395_v3 = vld [vmem:[%s6228_s26 + $0x38] sm:$0xff]  ;;  %v5774_v6 = vld [vmem:[%s7541_s1 + $0x160] ss:$8 sps:$4 sm:$0xff]   ;;  %p6014_p3 = pnand %p6013_p2, %p6007_p13 }
  0x2c   : > { %v423_v7 = vpack.c.bf16 %v395_v3, %v394_v1  ;;  %v5779_v8 = vld [vmem:[%s7541_s1 + $0x174] ss:$8 sps:$4 sm:$0xff]   ;;  %v396_v9 = vld [vmem:[%s6228_s26 + $0x40] sm:$0xff]  ;;  %v397_v10 = vld [vmem:[%s6228_s26 + $0x48] sm:$0xff] }
  0x2d   : > { %608 = vmatpush1.bf16.msra.mxu0 %v5725_v12  ;;  %5279 = vmatpush1.bf16.msra.mxu1 %v5725_v12  ;;  %v5777_v11 = vld [vmem:[%s7541_s1 + $0x170] ss:$8 sps:$4 sm:$0xff]   ;;  %v5782_v12 = vld [vmem:[%s7541_s1 + $0x184] ss:$8 sps:$4 sm:$0xff]   ;;  %v5785_v51 = vld [vmem:[%s7541_s1 + $0x194] ss:$8 sps:$4 sm:$0xff]  }
  0x2e   : > { %609 = vmatprep.subr.bf16.mxu0 %v5726_v13  ;;  %5272 = vmatprep.subr.bf16.mxu1 %v5726_v13  ;;  %v424_v13 = vpack.c.bf16 %v397_v10, %v396_v9  ;;  %v400_v17 = vld [vmem:[%s6228_s26 + $0x60] sm:$0xff]  ;;  %v401_v18 = vld [vmem:[%s6228_s26 + $0x68] sm:$0xff]  ;;  %v410_v32 = vld [vmem:[%s6228_s26 + $0xb0] sm:$0xff] }
  0x2f   : > { %v405_v24 = vld [vmem:[%s6228_s26 + $0x88] sm:$0xff]  ;;  %v414_v38 = vld [vmem:[%s6228_s26 + $0xd0] sm:$0xff]  ;;  %v415_v39 = vld [vmem:[%s6228_s26 + $0xd8] sm:$0xff] }
  0x30   : > { %v419_v45 = vld [vmem:[%s6228_s26 + $0xf8] sm:$0xf]  ;;  %v5791_v58 = vld [vmem:[%s7541_s1 + $0x1b4] ss:$8 sps:$4 sm:$0xff]   ;;  %v1067_v59 = vld [vmem:[%s6228_s26 + $0x22] sm:$0xff] }
  0x31   : > { %610 = vmatpush1.bf16.msra.mxu0 %v5728_v14  ;;  %5280 = vmatpush1.bf16.msra.mxu1 %v5728_v14  ;;  %v398_v14 = vld [vmem:[%s6228_s26 + $0x50] sm:$0xff]  ;;  %v1071_v10 = vld [vmem:[%s6228_s26 + $0x42] sm:$0xff] }
  0x32   : > { %611 = vmatprep.subr.bf16.mxu0 %v5729_v15  ;;  %5273 = vmatprep.subr.bf16.mxu1 %v5729_v15  ;;  %v399_v15 = vld [vmem:[%s6228_s26 + $0x58] sm:$0xff] }
  0x33   : > { %v1065_v52 = vld [vmem:[%s6228_s26 + $0x12] sm:$0xff] }
  0x34   : > { %v5797_v1 = vld [vmem:[%s7541_s1 + $0x1d4] ss:$8 sps:$4 sm:$0xff]  }
  0x35   : > { %612 = vmatpush1.bf16.msra.mxu0 %v5731_v16  ;;  %5281 = vmatpush1.bf16.msra.mxu1 %v5731_v16  ;;  %v425_v16 = vpack.c.bf16 %v399_v15, %v398_v14  ;;  %v1069_v3 = vld [vmem:[%s6228_s26 + $0x32] sm:$0xff] }
  0x36   : > { %870 = vmatprep.subr.bf16.mxu0 %v5734_v19  ;;  %v426_v19 = vpack.c.bf16 %v401_v18, %v400_v17  ;;  %v5803_v9 = vld [vmem:[%s7541_s1 + $0x1f4] ss:$8 sps:$4 sm:$0xff]   ;;  %v1075_v18 = vld [vmem:[%s6228_s26 + $0x62] sm:$0xff] }
  0x37   : > { %v1073_v15 = vld [vmem:[%s6228_s26 + $0x52] sm:$0xff] }
  0x38   : > { %630 = vmatmul.mubr.bf16.vlgmr.msra.gmra.mrb[0].mxu0 %v484_v20  ;;  %v402_v20 = vld [vmem:[%s6228_s26 + $0x70] sm:$0xff] }
  0x39   : > { %871 = vmatpush1.bf16.msra.mxu0 %v5732_v21  ;;  %639 = vmatprep.mubr.bf16.mxu0 %v7552_v2  ;;  %v403_v21 = vld [vmem:[%s6228_s26 + $0x78] sm:$0xff] }
  0x3a   : > { %872 = vmatprep.subr.bf16.mxu0 %v5737_v22  ;;  %v427_v22 = vpack.c.bf16 %v403_v21, %v402_v20  ;;  %v1077_v21 = vld [vmem:[%s6228_s26 + $0x72] sm:$0xff] }
  0x3d   : > { %873 = vmatpush1.bf16.msra.mxu0 %v5735_v23  ;;  %v404_v23 = vld [vmem:[%s6228_s26 + $0x80] sm:$0xff] }
  0x3e   : > { %874 = vmatprep.subr.bf16.mxu0 %v5740_v26  ;;  %v428_v25 = vpack.c.bf16 %v405_v24, %v404_v23  ;;  %v406_v26 = vld [vmem:[%s6228_s26 + $0x90] sm:$0xff]  ;;  %v1079_v24 = vld [vmem:[%s6228_s26 + $0x82] sm:$0xff] }
  0x40   : > { %640 = vmatmul.mubr.bf16.gmra.mrb[4].mxu0 %v485_v27  ;;  %v407_v27 = vld [vmem:[%s6228_s26 + $0x98] sm:$0xff] }
  0x41   : > { %875 = vmatpush1.bf16.msra.mxu0 %v5738_v28  ;;  %649 = vmatprep.mubr.bf16.mxu0 %v7552_v2  ;;  %v429_v28 = vpack.c.bf16 %v407_v27, %v406_v26  ;;  %v1081_v27 = vld [vmem:[%s6228_s26 + $0x92] sm:$0xff] }
  0x42   : > { %876 = vmatprep.subr.bf16.mxu0 %v5743_v29  ;;  %v408_v29 = vld [vmem:[%s6228_s26 + $0xa0] sm:$0xff] }
  0x45   : > { %877 = vmatpush1.bf16.msra.mxu0 %v5741_v30  ;;  %v409_v30 = vld [vmem:[%s6228_s26 + $0xa8] sm:$0xff] }
  0x46   : > { %878 = vmatprep.subr.bf16.mxu0 %v5746_v33  ;;  %v430_v31 = vpack.c.bf16 %v409_v30, %v408_v29  ;;  %v411_v33 = vld [vmem:[%s6228_s26 + $0xb8] sm:$0xff]  ;;  %v1083_v30 = vld [vmem:[%s6228_s26 + $0xa2] sm:$0xff] }
  0x48   : > { %650 = vmatmul.mubr.bf16.gmra.mrb[8].mxu0 %v486_v35  ;;  %v412_v35 = vld [vmem:[%s6228_s26 + $0xc0] sm:$0xff] }
  0x49   : > { %879 = vmatpush1.bf16.msra.mxu0 %v5744_v34  ;;  %659 = vmatprep.mubr.bf16.mxu0 %v7552_v2  ;;  %v431_v34 = vpack.c.bf16 %v411_v33, %v410_v32  ;;  %v1085_v33 = vld [vmem:[%s6228_s26 + $0xb2] sm:$0xff] }
  0x4a   : > { %880 = vmatprep.subr.bf16.mxu0 %v5749_v36  ;;  %v413_v36 = vld [vmem:[%s6228_s26 + $0xc8] sm:$0xff] }
  0x4d   : > { %881 = vmatpush1.bf16.msra.mxu0 %v5747_v37  ;;  %v432_v37 = vpack.c.bf16 %v413_v36, %v412_v35  ;;  %v1087_v36 = vld [vmem:[%s6228_s26 + $0xc2] sm:$0xff] }
  0x4e   : > { %882 = vmatprep.subr.bf16.mxu0 %v5752_v40  ;;  %v433_v40 = vpack.c.bf16 %v415_v39, %v414_v38  ;;  %v1089_v39 = vld [vmem:[%s6228_s26 + $0xd2] sm:$0xff] }
  0x50   : > { %660 = vmatmul.mubr.bf16.gmra.mrb[12].mxu0 %v487_v42  ;;  %v417_v42 = vld [vmem:[%s6228_s26 + $0xe8] sm:$0xff] }
  0x51   : > { %883 = vmatpush1.bf16.msra.mxu0 %v5750_v41  ;;  %902 = vmatprep.mubr.bf16.mxu0 %v7552_v2  ;;  %v416_v41 = vld [vmem:[%s6228_s26 + $0xe0] sm:$0xff] }
  0x52   : > { %884 = vmatprep.subr.bf16.mxu0 %v5755_v43  ;;  %v434_v43 = vpack.c.bf16 %v417_v42, %v416_v41  ;;  %v1091_v42 = vld [vmem:[%s6228_s26 + $0xe2] sm:$0xff] }
  0x55   : > { %885 = vmatpush1.bf16.msra.mxu0 %v5753_v44  ;;  %v418_v44 = vld [vmem:[%s6228_s26 + $0xf0] sm:$0xff] }
  0x56   : > { %1208 = vmatprep.subr.bf16.mxu0 %v5758_v47  ;;  %v435_v46 = vpack.c.bf16 %v419_v45, %v418_v44  ;;  %v1063_v47 = vld [vmem:[%s6228_s26 + $0x2] sm:$0xff]  ;;  %v1093_v45 = vld [vmem:[%s6228_s26 + $0xf2] sm:$0xff] }
  0x58   : > { %903 = vmatmul.mubr.bf16.vlgmr.msra.gmra.mrb[0].mxu0 %v420_v49 }
  0x59   : > { %1209 = vmatpush1.bf16.msra.mxu0 %v5756_v48  ;;  %912 = vmatprep.mubr.bf16.mxu0 %v7552_v2  ;;  %v1064_v48 = vld [vmem:[%s6228_s26 + $0xa] sm:$0xff] }
  0x5a   : > { %1210 = vmatprep.subr.bf16.mxu0 %v5761_v50  ;;  %v1095_v49 = vpack.c.bf16 %v1064_v48, %v1063_v47  ;;  %v5780_v50 = vld [vmem:[%s7541_s1 + $0x180] ss:$8 sps:$4 sm:$0xff]  }
  0x5b   : > { %v1465_v48 = vld [vmem:[%s6228_s26 + $0x3] sm:$0xff] }
  0x5d   : > { %1211 = vmatpush1.bf16.msra.mxu0 %v5759_v53  ;;  %v1066_v53 = vld [vmem:[%s6228_s26 + $0x1a] sm:$0xff] }
  0x5e   : > { %1212 = vmatprep.subr.bf16.mxu0 %v5764_v54  ;;  %v5783_v54 = vld [vmem:[%s7541_s1 + $0x190] ss:$8 sps:$4 sm:$0xff]  }
  0x60   : > { %913 = vmatmul.mubr.bf16.gmra.mrb[4].mxu0 %v421_v56  ;;  %v1096_v56 = vpack.c.bf16 %v1066_v53, %v1065_v52  ;;  %v5809_v52 = vld [vmem:[%s7541_s1 + $0x214] ss:$8 sps:$4 sm:$0xff]  }
  0x61   : > { %922 = vmatprep.mubr.bf16.mxu0 %v7552_v2  ;;  %1213 = vmatpush1.bf16.msra.mxu0 %v5762_v55  ;;  %v5788_v55 = vld [vmem:[%s7541_s1 + $0x1a4] ss:$8 sps:$4 sm:$0xff]   ;;  %v1467_v53 = vld [vmem:[%s6228_s26 + $0x13] sm:$0xff] }
  0x62   : > { %1214 = vmatprep.subr.bf16.mxu0 %v5767_v57  ;;  %v5786_v57 = vld [vmem:[%s7541_s1 + $0x1a0] ss:$8 sps:$4 sm:$0xff]  }
  0x65   : > { %1215 = vmatpush1.bf16.msra.mxu0 %v5765_v60  ;;  %v1068_v60 = vld [vmem:[%s6228_s26 + $0x2a] sm:$0xff] }
  0x66   : > { %1216 = vmatprep.subr.bf16.mxu0 %v5770_v61  ;;  %v5789_v61 = vld [vmem:[%s7541_s1 + $0x1b0] ss:$8 sps:$4 sm:$0xff]  }
  0x68   : > { %923 = vmatmul.mubr.bf16.gmra.mrb[8].mxu0 %v422_v63  ;;  %v1097_v63 = vpack.c.bf16 %v1068_v60, %v1067_v59  ;;  %v5815_v59 = vld [vmem:[%s7541_s1 + $0x234] ss:$8 sps:$4 sm:$0xff]   ;;  %v1469_v60 = vld [vmem:[%s6228_s26 + $0x23] sm:$0xff] }
  0x69   : > { %932 = vmatprep.mubr.bf16.mxu0 %v7552_v2  ;;  %1217 = vmatpush1.bf16.msra.mxu0 %v5768_v62  ;;  %v5794_v62 = vld [vmem:[%s7541_s1 + $0x1c4] ss:$8 sps:$4 sm:$0xff]  }
  0x6a   : > { %1218 = vmatprep.subr.bf16.mxu0 %v5773_v0  ;;  %v5792_v0 = vld [vmem:[%s7541_s1 + $0x1c0] ss:$8 sps:$4 sm:$0xff]  }
  0x6d   : > { %1219 = vmatpush1.bf16.msra.mxu0 %v5771_v4  ;;  %v1070_v4 = vld [vmem:[%s6228_s26 + $0x3a] sm:$0xff] }
  0x6e   : > { %1220 = vmatprep.subr.bf16.mxu0 %v5776_v5  ;;  %v5795_v5 = vld [vmem:[%s7541_s1 + $0x1d0] ss:$8 sps:$4 sm:$0xff]  }
  0x70   : > { %933 = vmatmul.mubr.bf16.gmra.mrb[12].mxu0 %v423_v7  ;;  %v1098_v7 = vpack.c.bf16 %v1070_v4, %v1069_v3  ;;  %v5821_v3 = vld [vmem:[%s7541_s1 + $0x254] ss:$8 sps:$4 sm:$0xff]  }
  0x71   : > { %942 = vmatprep.mubr.bf16.mxu0 %v7552_v2  ;;  %1221 = vmatpush1.bf16.msra.mxu0 %v5774_v6  ;;  %v5800_v6 = vld [vmem:[%s7541_s1 + $0x1e4] ss:$8 sps:$4 sm:$0xff]   ;;  %v1471_v4 = vld [vmem:[%s6228_s26 + $0x33] sm:$0xff] }
  0x72   : > { %1222 = vmatprep.subr.bf16.mxu0 %v5779_v8  ;;  %v5798_v8 = vld [vmem:[%s7541_s1 + $0x1e0] ss:$8 sps:$4 sm:$0xff]  }
  0x75   : > { %1223 = vmatpush1.bf16.msra.mxu0 %v5777_v11  ;;  %v1072_v11 = vld [vmem:[%s6228_s26 + $0x4a] sm:$0xff] }
  0x76   : > { %1610 = vmatprep.subr.bf16.mxu0 %v5782_v12  ;;  %v5801_v12 = vld [vmem:[%s7541_s1 + $0x1f0] ss:$8 sps:$4 sm:$0xff]   ;;  %v1099_v14 = vpack.c.bf16 %v1072_v11, %v1071_v10  ;;  %v5827_v10 = vld [vmem:[%s7541_s1 + $0x274] ss:$8 sps:$4 sm:$0xff]   ;;  %v460_v11 = vld [vmem:[%s6228_s26 + $0x41] sm:$0xff] }
  0x78   : > { %943 = vmatmul.mubr.bf16.gmra.mrb[16].mxu0 %v424_v13  ;;  %v5806_v13 = vld [vmem:[%s7541_s1 + $0x204] ss:$8 sps:$4 sm:$0xff]  }
  0x79   : > { %952 = vmatprep.mubr.bf16.mxu0 %v7552_v2 }
  0x80   : > { %953 = vmatmul.mubr.bf16.gmra.mrb[20].mxu0 %v425_v16  ;;  %v1074_v16 = vld [vmem:[%s6228_s26 + $0x5a] sm:$0xff] }
  0x81   : > { %962 = vmatprep.mubr.bf16.mxu0 %v7552_v2  ;;  %v1100_v17 = vpack.c.bf16 %v1074_v16, %v1073_v15  ;;  %v5825_v15 = vld [vmem:[%s7541_s1 + $0x270] ss:$8 sps:$4 sm:$0xff]  }
  0x88   : > { %963 = vmatmul.mubr.bf16.gmra.mrb[24].mxu0 %v426_v19  ;;  %v1076_v19 = vld [vmem:[%s6228_s26 + $0x6a] sm:$0xff] }
  0x89   : > { %972 = vmatprep.mubr.bf16.mxu0 %v7552_v2  ;;  %v1101_v20 = vpack.c.bf16 %v1076_v19, %v1075_v18  ;;  %v462_v18 = vld [vmem:[%s6228_s26 + $0x51] sm:$0xff]  ;;  %v463_v19 = vld [vmem:[%s6228_s26 + $0x59] sm:$0xff] }
  0x90   : > { %973 = vmatmul.mubr.bf16.gmra.mrb[28].mxu0 %v427_v22  ;;  %v1078_v22 = vld [vmem:[%s6228_s26 + $0x7a] sm:$0xff] }
  0x91   : > { %982 = vmatprep.mubr.bf16.mxu0 %v7552_v2  ;;  %v1102_v23 = vpack.c.bf16 %v1078_v22, %v1077_v21  ;;  %v1476_v21 = vld [vmem:[%s6228_s26 + $0x5b] sm:$0xff]  ;;  %v489_v22 = vpack.c.bf16 %v463_v19, %v462_v18 }
  0x92   : > { %v1496_v18 = vld [vmem:[%s6228_s26 + $0xfb] sm:$0xf] }
  0x98   : > { %983 = vmatmul.mubr.bf16.gmra.mrb[32].mxu0 %v428_v25  ;;  %v1080_v25 = vld [vmem:[%s6228_s26 + $0x8a] sm:$0xff] }
  0x99   : > { %992 = vmatprep.mubr.bf16.mxu0 %v7552_v2  ;;  %v1103_v26 = vpack.c.bf16 %v1080_v25, %v1079_v24  ;;  %v464_v24 = vld [vmem:[%s6228_s26 + $0x61] sm:$0xff]  ;;  %v465_v25 = vld [vmem:[%s6228_s26 + $0x69] sm:$0xff] }
  0xa0   : > { %993 = vmatmul.mubr.bf16.gmra.mrb[36].mxu0 %v429_v28  ;;  %v1082_v28 = vld [vmem:[%s6228_s26 + $0x9a] sm:$0xff] }
  0xa1   : > { %1002 = vmatprep.mubr.bf16.mxu0 %v7552_v2  ;;  %v1104_v29 = vpack.c.bf16 %v1082_v28, %v1081_v27  ;;  %v1478_v27 = vld [vmem:[%s6228_s26 + $0x6b] sm:$0xff]  ;;  %v490_v28 = vpack.c.bf16 %v465_v25, %v464_v24  ;;  %v1869_v24 = vld [vmem:[%s6228_s26 + $0x14] sm:$0xff]  ;;  %v1870_v25 = vld [vmem:[%s6228_s26 + $0x1c] sm:$0xff] }
  0xa8   : > { %1003 = vmatmul.mubr.bf16.gmra.mrb[40].mxu0 %v430_v31  ;;  %v1084_v31 = vld [vmem:[%s6228_s26 + $0xaa] sm:$0xff] }
  0xa9   : > { %1012 = vmatprep.mubr.bf16.mxu0 %v7552_v2  ;;  %v1105_v32 = vpack.c.bf16 %v1084_v31, %v1083_v30  ;;  %v466_v30 = vld [vmem:[%s6228_s26 + $0x71] sm:$0xff]  ;;  %v467_v31 = vld [vmem:[%s6228_s26 + $0x79] sm:$0xff] }
  0xb0   : > { %1013 = vmatmul.mubr.bf16.gmra.mrb[44].mxu0 %v431_v34  ;;  %v1086_v34 = vld [vmem:[%s6228_s26 + $0xba] sm:$0xff] }
  0xb1   : > { %1022 = vmatprep.mubr.bf16.mxu0 %v7552_v2  ;;  %v1106_v35 = vpack.c.bf16 %v1086_v34, %v1085_v33  ;;  %v1480_v33 = vld [vmem:[%s6228_s26 + $0x7b] sm:$0xff]  ;;  %v491_v34 = vpack.c.bf16 %v467_v31, %v466_v30 }
  0xb2   : > { %v1873_v30 = vld [vmem:[%s6228_s26 + $0x34] sm:$0xff]  ;;  %v1874_v31 = vld [vmem:[%s6228_s26 + $0x3c] sm:$0xff] }
  0xb8   : > { %1023 = vmatmul.mubr.bf16.gmra.mrb[48].mxu0 %v432_v37  ;;  %v1088_v37 = vld [vmem:[%s6228_s26 + $0xca] sm:$0xff] }
  0xb9   : > { %1032 = vmatprep.mubr.bf16.mxu0 %v7552_v2  ;;  %v1107_v38 = vpack.c.bf16 %v1088_v37, %v1087_v36  ;;  %v468_v36 = vld [vmem:[%s6228_s26 + $0x81] sm:$0xff]  ;;  %v469_v37 = vld [vmem:[%s6228_s26 + $0x89] sm:$0xff] }
  0xc0   : > { %1033 = vmatmul.mubr.bf16.gmra.mrb[52].mxu0 %v433_v40  ;;  %v1090_v40 = vld [vmem:[%s6228_s26 + $0xda] sm:$0xff] }
  0xc1   : > { %1042 = vmatprep.mubr.bf16.mxu0 %v7552_v2  ;;  %v1108_v41 = vpack.c.bf16 %v1090_v40, %v1089_v39  ;;  %v1482_v39 = vld [vmem:[%s6228_s26 + $0x8b] sm:$0xff]  ;;  %v492_v40 = vpack.c.bf16 %v469_v37, %v468_v36  ;;  %v1877_v36 = vld [vmem:[%s6228_s26 + $0x54] sm:$0xff]  ;;  %v1878_v37 = vld [vmem:[%s6228_s26 + $0x5c] sm:$0xff] }
  0xc8   : > { %1043 = vmatmul.mubr.bf16.gmra.mrb[56].mxu0 %v434_v43  ;;  %v1092_v43 = vld [vmem:[%s6228_s26 + $0xea] sm:$0xff] }
  0xc9   : > { %1052 = vmatprep.mubr.bf16.mxu0 %v7552_v2  ;;  %v1109_v44 = vpack.c.bf16 %v1092_v43, %v1091_v42  ;;  %v470_v42 = vld [vmem:[%s6228_s26 + $0x91] sm:$0xff]  ;;  %v471_v43 = vld [vmem:[%s6228_s26 + $0x99] sm:$0xff] }
  0xd0   : > { %1053 = vmatmul.mubr.bf16.gmra.mrb[60].mxu0 %v435_v46  ;;  %v1094_v46 = vld [vmem:[%s6228_s26 + $0xfa] sm:$0xf] }
  0xd1   : > { %1240 = vmatprep.mubr.bf16.mxu0 %v7552_v2  ;;  %v1110_v47 = vpack.c.bf16 %v1094_v46, %v1093_v45  ;;  %v1484_v45 = vld [vmem:[%s6228_s26 + $0x9b] sm:$0xff]  ;;  %v493_v46 = vpack.c.bf16 %v471_v43, %v470_v42 }
  0xd2   : > { %v1881_v42 = vld [vmem:[%s6228_s26 + $0x74] sm:$0xff]  ;;  %v1882_v43 = vld [vmem:[%s6228_s26 + $0x7c] sm:$0xff] }
  0xd8   : > { %1241 = vmatmul.mubr.bf16.vlgmr.msra.gmra.mrb[0].mxu0 %v1095_v49  ;;  %v1466_v49 = vld [vmem:[%s6228_s26 + $0xb] sm:$0xff] }
  0xd9   : > { %1611 = vmatpush1.bf16.msra.mxu0 %v5780_v50  ;;  %1250 = vmatprep.mubr.bf16.mxu0 %v7552_v2  ;;  %v1497_v50 = vpack.c.bf16 %v1466_v49, %v1465_v48  ;;  %v472_v48 = vld [vmem:[%s6228_s26 + $0xa1] sm:$0xff]  ;;  %v473_v49 = vld [vmem:[%s6228_s26 + $0xa9] sm:$0xff] }
  0xda   : > { %1612 = vmatprep.subr.bf16.mxu0 %v5785_v51  ;;  %v5804_v51 = vld [vmem:[%s7541_s1 + $0x200] ss:$8 sps:$4 sm:$0xff]  }
  0xdd   : > { %1613 = vmatpush1.bf16.msra.mxu0 %v5783_v54  ;;  %v1468_v54 = vld [vmem:[%s6228_s26 + $0x1b] sm:$0xff] }
  0xde   : > { %1614 = vmatprep.subr.bf16.mxu0 %v5788_v55  ;;  %v5807_v55 = vld [vmem:[%s7541_s1 + $0x210] ss:$8 sps:$4 sm:$0xff]  }
  0xe0   : > { %1251 = vmatmul.mubr.bf16.gmra.mrb[4].mxu0 %v1096_v56  ;;  %v5812_v56 = vld [vmem:[%s7541_s1 + $0x224] ss:$8 sps:$4 sm:$0xff]  }
  0xe1   : > { %1260 = vmatprep.mubr.bf16.mxu0 %v7552_v2  ;;  %1615 = vmatpush1.bf16.msra.mxu0 %v5786_v57  ;;  %v1498_v57 = vpack.c.bf16 %v1468_v54, %v1467_v53  ;;  %v474_v54 = vld [vmem:[%s6228_s26 + $0xb1] sm:$0xff] }
  0xe2   : > { %1616 = vmatprep.subr.bf16.mxu0 %v5791_v58  ;;  %v5810_v58 = vld [vmem:[%s7541_s1 + $0x220] ss:$8 sps:$4 sm:$0xff]  }
  0xe5   : > { %1617 = vmatpush1.bf16.msra.mxu0 %v5789_v61  ;;  %v1470_v61 = vld [vmem:[%s6228_s26 + $0x2b] sm:$0xff] }
  0xe6   : > { %1618 = vmatprep.subr.bf16.mxu0 %v5794_v62  ;;  %v5813_v62 = vld [vmem:[%s7541_s1 + $0x230] ss:$8 sps:$4 sm:$0xff]  }
  0xe8   : > { %1261 = vmatmul.mubr.bf16.gmra.mrb[8].mxu0 %v1097_v63  ;;  %v5818_v63 = vld [vmem:[%s7541_s1 + $0x244] ss:$8 sps:$4 sm:$0xff]  }
  0xe9   : > { %1270 = vmatprep.mubr.bf16.mxu0 %v7552_v2  ;;  %1619 = vmatpush1.bf16.msra.mxu0 %v5792_v0  ;;  %v1499_v0 = vpack.c.bf16 %v1470_v61, %v1469_v60  ;;  %v476_v60 = vld [vmem:[%s6228_s26 + $0xc1] sm:$0xff]  ;;  %v477_v61 = vld [vmem:[%s6228_s26 + $0xc9] sm:$0xff] }
  0xea   : > { %1620 = vmatprep.subr.bf16.mxu0 %v5797_v1  ;;  %v5816_v1 = vld [vmem:[%s7541_s1 + $0x240] ss:$8 sps:$4 sm:$0xff]  }
  0xed   : > { %1621 = vmatpush1.bf16.msra.mxu0 %v5795_v5  ;;  %v1472_v5 = vld [vmem:[%s6228_s26 + $0x3b] sm:$0xff] }
  0xee   : > { %1622 = vmatprep.subr.bf16.mxu0 %v5800_v6  ;;  %v5819_v6 = vld [vmem:[%s7541_s1 + $0x250] ss:$8 sps:$4 sm:$0xff]  }
  0xf0   : > { %1271 = vmatmul.mubr.bf16.gmra.mrb[12].mxu0 %v1098_v7  ;;  %v5824_v7 = vld [vmem:[%s7541_s1 + $0x264] ss:$8 sps:$4 sm:$0xff]  }
  0xf1   : > { %1280 = vmatprep.mubr.bf16.mxu0 %v7552_v2  ;;  %1623 = vmatpush1.bf16.msra.mxu0 %v5798_v8  ;;  %v1500_v8 = vpack.c.bf16 %v1472_v5, %v1471_v4  ;;  %v479_v4 = vld [vmem:[%s6228_s26 + $0xd9] sm:$0xff] }
  0xf2   : > { %1624 = vmatprep.subr.bf16.mxu0 %v5803_v9  ;;  %v5822_v9 = vld [vmem:[%s7541_s1 + $0x260] ss:$8 sps:$4 sm:$0xff]   ;;  %v1491_v5 = vld [vmem:[%s6228_s26 + $0xd3] sm:$0xff] }
  0xf5   : > { %1625 = vmatpush1.bf16.msra.mxu0 %v5801_v12  ;;  %v461_v12 = vld [vmem:[%s6228_s26 + $0x49] sm:$0xff] }
  0xf6   : > { %2012 = vmatprep.subr.bf16.mxu0 %v5806_v13  ;;  %v1473_v13 = vld [vmem:[%s6228_s26 + $0x43] sm:$0xff]  ;;  %v488_v16 = vpack.c.bf16 %v461_v12, %v460_v11  ;;  %v1494_v12 = vld [vmem:[%s6228_s26 + $0xeb] sm:$0xff] }
  0xf7   : > { %v1493_v11 = vld [vmem:[%s6228_s26 + $0xe3] sm:$0xff] }
  0xf8   : > { %1281 = vmatmul.mubr.bf16.gmra.mrb[16].mxu0 %v1099_v14  ;;  %v1474_v14 = vld [vmem:[%s6228_s26 + $0x4b] sm:$0xff]  ;;  %670 = vmatmul.mubr.bf16.vlgmr.msra.gmra.mrb[0].mxu1 %v488_v16  ;;  %v483_v16 = vld [vmem:[%s6228_s26 + $0xf9] sm:$0xf] }
  0xf9   : > { %1290 = vmatprep.mubr.bf16.mxu0 %v7552_v2  ;;  %679 = vmatprep.mubr.bf16.mxu1 %v7552_v2 }
 0x100   : > { %1291 = vmatmul.mubr.bf16.gmra.mrb[20].mxu0 %v1100_v17  ;;  %v1501_v17 = vpack.c.bf16 %v1474_v14, %v1473_v13  ;;  %680 = vmatmul.mubr.bf16.gmra.mrb[4].mxu1 %v489_v22  ;;  %v1511_v14 = vpack.c.bf16 %v1494_v12, %v1493_v11  ;;  %v1868_v22 = vld [vmem:[%s6228_s26 + $0xc] sm:$0xff] }
 0x101   : > { %1300 = vmatprep.mubr.bf16.mxu0 %v7552_v2  ;;  %689 = vmatprep.mubr.bf16.mxu1 %v7552_v2  ;;  %v5842_v11 = vld [vmem:[%s7543_s3 + $0xc4] ss:$8 sps:$4 sm:$0xff]  }
 0x108   : > { %1301 = vmatmul.mubr.bf16.gmra.mrb[24].mxu0 %v1101_v20  ;;  %v1475_v20 = vld [vmem:[%s6228_s26 + $0x53] sm:$0xff]  ;;  %690 = vmatmul.mubr.bf16.gmra.mrb[8].mxu1 %v490_v28 }
 0x109   : > { %1310 = vmatprep.mubr.bf16.mxu0 %v7552_v2  ;;  %699 = vmatprep.mubr.bf16.mxu1 %v7552_v2  ;;  %v1872_v28 = vld [vmem:[%s6228_s26 + $0x2c] sm:$0xff] }
 0x110   : > { %1311 = vmatmul.mubr.bf16.gmra.mrb[28].mxu0 %v1102_v23  ;;  %v1502_v23 = vpack.c.bf16 %v1476_v21, %v1475_v20  ;;  %700 = vmatmul.mubr.bf16.gmra.mrb[12].mxu1 %v491_v34  ;;  %v1867_v21 = vld [vmem:[%s6228_s26 + $0x4] sm:$0xff]  ;;  %v1876_v34 = vld [vmem:[%s6228_s26 + $0x4c] sm:$0xff] }
 0x111   : > { %1320 = vmatprep.mubr.bf16.mxu0 %v7552_v2  ;;  %709 = vmatprep.mubr.bf16.mxu1 %v7552_v2 }
 0x118   : > { %1321 = vmatmul.mubr.bf16.gmra.mrb[32].mxu0 %v1103_v26  ;;  %v1477_v26 = vld [vmem:[%s6228_s26 + $0x63] sm:$0xff]  ;;  %710 = vmatmul.mubr.bf16.gmra.mrb[16].mxu1 %v492_v40  ;;  %v1880_v40 = vld [vmem:[%s6228_s26 + $0x6c] sm:$0xff] }
 0x119   : > { %1330 = vmatprep.mubr.bf16.mxu0 %v7552_v2  ;;  %719 = vmatprep.mubr.bf16.mxu1 %v7552_v2 }
 0x120   : > { %1331 = vmatmul.mubr.bf16.gmra.mrb[36].mxu0 %v1104_v29  ;;  %v1503_v29 = vpack.c.bf16 %v1478_v27, %v1477_v26  ;;  %720 = vmatmul.mubr.bf16.gmra.mrb[20].mxu1 %v493_v46  ;;  %v1900_v26 = vpack.c.bf16 %v1870_v25, %v1869_v24  ;;  %v1871_v27 = vld [vmem:[%s6228_s26 + $0x24] sm:$0xff]  ;;  %v1884_v46 = vld [vmem:[%s6228_s26 + $0x8c] sm:$0xff] }
 0x121   : > { %1340 = vmatprep.mubr.bf16.mxu0 %v7552_v2  ;;  %729 = vmatprep.mubr.bf16.mxu1 %v7552_v2  ;;  %v5846_v24 = vld [vmem:[%s7543_s3 + $0xe0] ss:$8 sps:$4 sm:$0xff]  }
 0x128   : > { %1341 = vmatmul.mubr.bf16.gmra.mrb[40].mxu0 %v1105_v32  ;;  %v1479_v32 = vld [vmem:[%s6228_s26 + $0x73] sm:$0xff] }
 0x129   : > { %1350 = vmatprep.mubr.bf16.mxu0 %v7552_v2 }
 0x130   : > { %1351 = vmatmul.mubr.bf16.gmra.mrb[44].mxu0 %v1106_v35  ;;  %v1504_v35 = vpack.c.bf16 %v1480_v33, %v1479_v32  ;;  %v1902_v32 = vpack.c.bf16 %v1874_v31, %v1873_v30  ;;  %v1875_v33 = vld [vmem:[%s6228_s26 + $0x44] sm:$0xff] }
 0x131   : > { %1360 = vmatprep.mubr.bf16.mxu0 %v7552_v2 }
 0x138   : > { %1361 = vmatmul.mubr.bf16.gmra.mrb[48].mxu0 %v1107_v38  ;;  %v1481_v38 = vld [vmem:[%s6228_s26 + $0x83] sm:$0xff] }
 0x139   : > { %1370 = vmatprep.mubr.bf16.mxu0 %v7552_v2 }
 0x140   : > { %1371 = vmatmul.mubr.bf16.gmra.mrb[52].mxu0 %v1108_v41  ;;  %v1505_v41 = vpack.c.bf16 %v1482_v39, %v1481_v38  ;;  %v1904_v38 = vpack.c.bf16 %v1878_v37, %v1877_v36  ;;  %v1879_v39 = vld [vmem:[%s6228_s26 + $0x64] sm:$0xff] }
 0x141   : > { %1380 = vmatprep.mubr.bf16.mxu0 %v7552_v2 }
 0x148   : > { %1381 = vmatmul.mubr.bf16.gmra.mrb[56].mxu0 %v1109_v44  ;;  %v1483_v44 = vld [vmem:[%s6228_s26 + $0x93] sm:$0xff] }
 0x149   : > { %1390 = vmatprep.mubr.bf16.mxu0 %v7552_v2 }
 0x150   : > { %1391 = vmatmul.mubr.bf16.gmra.mrb[60].mxu0 %v1110_v47  ;;  %v1506_v47 = vpack.c.bf16 %v1484_v45, %v1483_v44  ;;  %v1906_v44 = vpack.c.bf16 %v1882_v43, %v1881_v42  ;;  %v1883_v45 = vld [vmem:[%s6228_s26 + $0x84] sm:$0xff] }
 0x151   : > { %1642 = vmatprep.mubr.bf16.mxu0 %v7552_v2 }
 0x158   : > { %1643 = vmatmul.mubr.bf16.vlgmr.msra.gmra.mrb[0].mxu0 %v1497_v50  ;;  %v1485_v50 = vld [vmem:[%s6228_s26 + $0xa3] sm:$0xff] }
 0x159   : > { %2013 = vmatpush1.bf16.msra.mxu0 %v5804_v51  ;;  %1652 = vmatprep.mubr.bf16.mxu0 %v7552_v2  ;;  %v1486_v51 = vld [vmem:[%s6228_s26 + $0xab] sm:$0xff] }
 0x15a   : > { %2014 = vmatprep.subr.bf16.mxu0 %v5809_v52  ;;  %v494_v52 = vpack.c.bf16 %v473_v49, %v472_v48  ;;  %v1507_v53 = vpack.c.bf16 %v1486_v51, %v1485_v50  ;;  %v1885_v48 = vld [vmem:[%s6228_s26 + $0x94] sm:$0xff]  ;;  %v1886_v49 = vld [vmem:[%s6228_s26 + $0x9c] sm:$0xff]  ;;  %v1887_v51 = vld [vmem:[%s6228_s26 + $0xa4] sm:$0xff] }
 0x15b   : > { %v1908_v50 = vpack.c.bf16 %v1886_v49, %v1885_v48 }
 0x15c   : > { %730 = vmatmul.mubr.bf16.gmra.mrb[24].mxu1 %v494_v52  ;;  %v1888_v52 = vld [vmem:[%s6228_s26 + $0xac] sm:$0xff] }
 0x15d   : > { %2015 = vmatpush1.bf16.msra.mxu0 %v5807_v55  ;;  %739 = vmatprep.mubr.bf16.mxu1 %v7552_v2  ;;  %v475_v55 = vld [vmem:[%s6228_s26 + $0xb9] sm:$0xff] }
 0x15e   : > { %2016 = vmatprep.subr.bf16.mxu0 %v5812_v56  ;;  %v1487_v56 = vld [vmem:[%s6228_s26 + $0xb3] sm:$0xff] }
 0x160   : > { %1653 = vmatmul.mubr.bf16.gmra.mrb[4].mxu0 %v1498_v57  ;;  %v1488_v57 = vld [vmem:[%s6228_s26 + $0xbb] sm:$0xff] }
 0x161   : > { %1662 = vmatprep.mubr.bf16.mxu0 %v7552_v2  ;;  %2017 = vmatpush1.bf16.msra.mxu0 %v5810_v58  ;;  %v495_v58 = vpack.c.bf16 %v475_v55, %v474_v54  ;;  %v1889_v54 = vld [vmem:[%s6228_s26 + $0xb4] sm:$0xff]  ;;  %v1890_v55 = vld [vmem:[%s6228_s26 + $0xbc] sm:$0xff] }
 0x162   : > { %2018 = vmatprep.subr.bf16.mxu0 %v5815_v59  ;;  %v1508_v59 = vpack.c.bf16 %v1488_v57, %v1487_v56  ;;  %v1910_v56 = vpack.c.bf16 %v1890_v55, %v1889_v54  ;;  %v5828_v57 = vld [vmem:[%s7543_s3 + $0x80] ss:$8 sps:$4 sm:$0xff]  }
 0x164   : > { %740 = vmatmul.mubr.bf16.gmra.mrb[28].mxu1 %v495_v58  ;;  %v5830_v58 = vld [vmem:[%s7543_s3 + $0x84] ss:$8 sps:$4 sm:$0xff]  }
 0x165   : > { %2019 = vmatpush1.bf16.msra.mxu0 %v5813_v62  ;;  %749 = vmatprep.mubr.bf16.mxu1 %v7552_v2  ;;  %v1489_v62 = vld [vmem:[%s6228_s26 + $0xc3] sm:$0xff] }
 0x166   : > { %2020 = vmatprep.subr.bf16.mxu0 %v5818_v63  ;;  %v1490_v63 = vld [vmem:[%s6228_s26 + $0xcb] sm:$0xff]  ;;  %2729 = vmatprep.subr.bf16.mxu1 %v5830_v58 }
 0x167   : > { %2730 = vmatpush1.bf16.msra.mxu1 %v5828_v57 }
 0x168   : > { %1663 = vmatmul.mubr.bf16.gmra.mrb[8].mxu0 %v1499_v0  ;;  %v496_v0 = vpack.c.bf16 %v477_v61, %v476_v60  ;;  %v1892_v60 = vld [vmem:[%s6228_s26 + $0xcc] sm:$0xff] }
 0x169   : > { %1672 = vmatprep.mubr.bf16.mxu0 %v7552_v2  ;;  %2021 = vmatpush1.bf16.msra.mxu0 %v5816_v1  ;;  %v1509_v1 = vpack.c.bf16 %v1490_v63, %v1489_v62  ;;  %v1893_v62 = vld [vmem:[%s6228_s26 + $0xd4] sm:$0xff]  ;;  %v1894_v63 = vld [vmem:[%s6228_s26 + $0xdc] sm:$0xff] }
 0x16a   : > { %2022 = vmatprep.subr.bf16.mxu0 %v5821_v3  ;;  %v478_v3 = vld [vmem:[%s6228_s26 + $0xd1] sm:$0xff] }
 0x16c   : > { %750 = vmatmul.mubr.bf16.gmra.mrb[32].mxu1 %v496_v0  ;;  %v5833_v0 = vld [vmem:[%s7543_s3 + $0x94] ss:$8 sps:$4 sm:$0xff]  }
 0x16d   : > { %2023 = vmatpush1.bf16.msra.mxu0 %v5819_v6  ;;  %759 = vmatprep.mubr.bf16.mxu1 %v7552_v2  ;;  %v1492_v6 = vld [vmem:[%s6228_s26 + $0xdb] sm:$0xff] }
 0x16e   : > { %2024 = vmatprep.subr.bf16.mxu0 %v5824_v7  ;;  %v497_v7 = vpack.c.bf16 %v479_v4, %v478_v3  ;;  %v5831_v3 = vld [vmem:[%s7543_s3 + $0x90] ss:$8 sps:$4 sm:$0xff]   ;;  %2731 = vmatprep.subr.bf16.mxu1 %v5833_v0  ;;  %v5836_v4 = vld [vmem:[%s7543_s3 + $0xa4] ss:$8 sps:$4 sm:$0xff]  }
 0x16f   : > { %2732 = vmatpush1.bf16.msra.mxu1 %v5831_v3 }
 0x170   : > { %1673 = vmatmul.mubr.bf16.gmra.mrb[12].mxu0 %v1500_v8  ;;  %v1510_v8 = vpack.c.bf16 %v1492_v6, %v1491_v5  ;;  %v5834_v5 = vld [vmem:[%s7543_s3 + $0xa0] ss:$8 sps:$4 sm:$0xff]   ;;  %2733 = vmatprep.subr.bf16.mxu1 %v5836_v4  ;;  %v2271_v4 = vlaneseq }
 0x171   : > { %1682 = vmatprep.mubr.bf16.mxu0 %v7552_v2  ;;  %2025 = vmatpush1.bf16.msra.mxu0 %v5822_v9  ;;  %v480_v9 = vld [vmem:[%s6228_s26 + $0xe1] sm:$0xff] }
 0x172   : > { %2026 = vmatprep.subr.bf16.mxu0 %v5827_v10  ;;  %v481_v10 = vld [vmem:[%s6228_s26 + $0xe9] sm:$0xff] }
 0x173   : > { %v498_v13 = vpack.c.bf16 %v481_v10, %v480_v9  ;;  %v1895_v6 = vld [vmem:[%s6228_s26 + $0xe4] sm:$0xff]  ;;  %2734 = vmatpush1.bf16.msra.mxu1 %v5834_v5  ;;  %v5837_v10 = vld [vmem:[%s7543_s3 + $0xb0] ss:$8 sps:$4 sm:$0xff]   ;;  %v6806_v5 = vshrl.u32 %v2271_v4, 7 }
 0x174   : > { %760 = vmatmul.mubr.bf16.gmra.mrb[36].mxu1 %v497_v7  ;;  %v1896_v7 = vld [vmem:[%s6228_s26 + $0xec] sm:$0xff] }
 0x175   : > { %2027 = vmatpush1.bf16.msra.mxu0 %v5825_v15  ;;  %769 = vmatprep.mubr.bf16.mxu1 %v7552_v2  ;;  %v482_v15 = vld [vmem:[%s6228_s26 + $0xf1] sm:$0xff]  ;;  %v1913_v9 = vpack.c.bf16 %v1896_v7, %v1895_v6  ;;  %7562 = vst [vmem:[#allocation10_spill] sm:$0xff] %v6806_v5 }
 0x176   : > { %v499_v19 = vpack.c.bf16 %v483_v16, %v482_v15  ;;  %v1898_v15 = vld [vmem:[%s6228_s26 + $0xfc] sm:$0xf] }
 0x178   : > { %1683 = vmatmul.mubr.bf16.gmra.mrb[16].mxu0 %v1501_v17  ;;  %v1495_v17 = vld [vmem:[%s6228_s26 + $0xf3] sm:$0xff] }
 0x179   : > { %1692 = vmatprep.mubr.bf16.mxu0 %v7552_v2  ;;  %v1512_v20 = vpack.c.bf16 %v1496_v18, %v1495_v17 }
 0x17c   : > { %770 = vmatmul.mubr.bf16.gmra.mrb[40].mxu1 %v498_v13  ;;  %v5840_v13 = vld [vmem:[%s7543_s3 + $0xc0] ss:$8 sps:$4 sm:$0xff]  }
 0x17d   : > { %779 = vmatprep.mubr.bf16.mxu1 %v7552_v2 }
 0x180   : > { %1693 = vmatmul.mubr.bf16.gmra.mrb[20].mxu0 %v1502_v23  ;;  %v1899_v23 = vpack.c.bf16 %v1868_v22, %v1867_v21  ;;  %v5843_v21 = vld [vmem:[%s7543_s3 + $0xd0] ss:$8 sps:$4 sm:$0xff]   ;;  %v5848_v22 = vld [vmem:[%s7543_s3 + $0xe4] ss:$8 sps:$4 sm:$0xff]  }
 0x181   : > { %1702 = vmatprep.mubr.bf16.mxu0 %v7552_v2 }
 0x184   : > { %780 = vmatmul.mubr.bf16.gmra.mrb[44].mxu1 %v499_v19  ;;  %v5845_v19 = vld [vmem:[%s7543_s3 + $0xd4] ss:$8 sps:$4 sm:$0xff]  }
 0x185   : > { %2761 = vmatprep.mubr.bf16.mxu1 %v7552_v2 }
 0x188   : > { %1703 = vmatmul.mubr.bf16.gmra.mrb[24].mxu0 %v1503_v29  ;;  %v1901_v29 = vpack.c.bf16 %v1872_v28, %v1871_v27  ;;  %v5851_v28 = vld [vmem:[%s7543_s3 + $0xf4] ss:$8 sps:$4 sm:$0xff]  }
 0x189   : > { %1712 = vmatprep.mubr.bf16.mxu0 %v7552_v2 }
 0x190   : > { %1713 = vmatmul.mubr.bf16.gmra.mrb[28].mxu0 %v1504_v35  ;;  %v1903_v35 = vpack.c.bf16 %v1876_v34, %v1875_v33 }
 0x191   : > { %1722 = vmatprep.mubr.bf16.mxu0 %v7552_v2 }
 0x198   : > { %1723 = vmatmul.mubr.bf16.gmra.mrb[32].mxu0 %v1505_v41  ;;  %v1905_v41 = vpack.c.bf16 %v1880_v40, %v1879_v39 }
 0x199   : > { %1732 = vmatprep.mubr.bf16.mxu0 %v7552_v2 }
 0x1a0   : > { %1733 = vmatmul.mubr.bf16.gmra.mrb[36].mxu0 %v1506_v47  ;;  %v1907_v47 = vpack.c.bf16 %v1884_v46, %v1883_v45 }
 0x1a1   : > { %1742 = vmatprep.mubr.bf16.mxu0 %v7552_v2 }
 0x1a8   : > { %1743 = vmatmul.mubr.bf16.gmra.mrb[40].mxu0 %v1507_v53  ;;  %v1909_v53 = vpack.c.bf16 %v1888_v52, %v1887_v51 }
 0x1a9   : > { %1752 = vmatprep.mubr.bf16.mxu0 %v7552_v2 }
 0x1b0   : > { %1753 = vmatmul.mubr.bf16.gmra.mrb[44].mxu0 %v1508_v59  ;;  %v1891_v59 = vld [vmem:[%s6228_s26 + $0xc4] sm:$0xff] }
 0x1b1   : > { %1762 = vmatprep.mubr.bf16.mxu0 %v7552_v2  ;;  %v1911_v61 = vpack.c.bf16 %v1892_v60, %v1891_v59 }
 0x1b8   : > { %1763 = vmatmul.mubr.bf16.gmra.mrb[48].mxu0 %v1509_v1  ;;  %v1912_v1 = vpack.c.bf16 %v1894_v63, %v1893_v62  ;;  %v5854_v62 = vld [vmem:[%s7543_s3 + $0x4] ss:$8 sps:$4 sm:$0xff]  }
 0x1b9   : > { %1772 = vmatprep.mubr.bf16.mxu0 %v7552_v2 }
 0x1c0   : > { %1773 = vmatmul.mubr.bf16.gmra.mrb[52].mxu0 %v1510_v8  ;;  %v5839_v8 = vld [vmem:[%s7543_s3 + $0xb4] ss:$8 sps:$4 sm:$0xff]  }
 0x1c1   : > { %1782 = vmatprep.mubr.bf16.mxu0 %v7552_v2  ;;  %2735 = vmatprep.subr.bf16.mxu1 %v5839_v8 }
 0x1c2   : > { %2736 = vmatpush1.bf16.msra.mxu1 %v5837_v10  ;;  %v7554_v10 = vsub.s32 0, %v6806_v5 }
 0x1c3   : > { %2737 = vmatprep.subr.bf16.mxu1 %v5842_v11  ;;  %v2269_v11 = vld [vmem:[%s7542_s2] sm:$0x3] }
 0x1c6   : > { %2738 = vmatpush1.bf16.msra.mxu1 %v5840_v13  ;;  %v7555_v13 = vsub.s32 1, %v6806_v5 }
 0x1c7   : > { %2739 = vmatprep.subr.bf16.mxu1 %v5845_v19 }
 0x1c8   : > { %1783 = vmatmul.mubr.bf16.gmra.mrb[56].mxu0 %v1511_v14  ;;  %v1897_v14 = vld [vmem:[%s6228_s26 + $0xf4] sm:$0xff] }
 0x1c9   : > { %1792 = vmatprep.mubr.bf16.mxu0 %v7552_v2 }
 0x1ca   : > { %2740 = vmatpush1.bf16.msra.mxu1 %v5843_v21 }
 0x1cb   : > { %v6691_v12 = vpop.f32.mrb[0].mxu1  ;;  %2741 = vmatprep.subr.bf16.mxu1 %v5848_v22 }
 0x1cc   : > { %v6699_v16 = vpop.f32.mrb[1].mxu1 }
 0x1cd   : > { %v6701_v17 = vpop.f32.mrb[2].mxu1 }
 0x1ce   : > { %v6703_v18 = vpop.f32.mrb[3].mxu1  ;;  %2742 = vmatpush1.bf16.msra.mxu1 %v5846_v24 }
 0x1cf   : > { %2743 = vmatprep.subr.bf16.mxu1 %v5851_v28 }
 0x1d0   : > { %1793 = vmatmul.mubr.bf16.gmra.mrb[60].mxu0 %v1512_v20  ;;  %v1914_v20 = vpack.c.bf16 %v1898_v15, %v1897_v14  ;;  %v6823_v14 = vrot.slane %v2269_v11, %v7554_v10  ;;  %v6827_v15 = vrot.slane %v2269_v11, %v7555_v13 }
 0x1d1   : > { %2044 = vmatprep.mubr.bf16.mxu0 %v7552_v2 }
 0x1d8   : > { %2045 = vmatmul.mubr.bf16.vlgmr.msra.gmra.mrb[0].mxu0 %v1899_v23  ;;  %v6714_v23 = vpop.f32.mrb[4].mxu1 }
 0x1d9   : > { %2054 = vmatprep.mubr.bf16.mxu0 %v7552_v2  ;;  %v6719_v25 = vpop.f32.mrb[5].mxu1 }
 0x1e0   : > { %2055 = vmatmul.mubr.bf16.gmra.mrb[4].mxu0 %v1900_v26  ;;  %v6721_v26 = vpop.f32.mrb[6].mxu1 }
 0x1e1   : > { %2064 = vmatprep.mubr.bf16.mxu0 %v7552_v2  ;;  %v6723_v27 = vpop.f32.mrb[7].mxu1 }
 0x1e2   : > { %v6731_v30 = vpop.f32.mrb[8].mxu1 }
 0x1e3   : > { %v6733_v31 = vpop.f32.mrb[9].mxu1 }
 0x1e8   : > { %2065 = vmatmul.mubr.bf16.gmra.mrb[8].mxu0 %v1901_v29  ;;  %v5849_v29 = vld [vmem:[%s7543_s3 + $0xf0] ss:$8 sps:$4 sm:$0xff]  }
 0x1e9   : > { %2074 = vmatprep.mubr.bf16.mxu0 %v7552_v2  ;;  %2744 = vmatpush1.bf16.msra.mxu1 %v5849_v29 }
 0x1ea   : > { %2922 = vmatprep.subr.bf16.mxu1 %v5854_v62 }
 0x1f0   : > { %2075 = vmatmul.mubr.bf16.gmra.mrb[12].mxu0 %v1902_v32  ;;  %v6735_v32 = vpop.f32.mrb[10].mxu1 }
 0x1f1   : > { %2084 = vmatprep.mubr.bf16.mxu0 %v7552_v2  ;;  %v6737_v33 = vpop.f32.mrb[11].mxu1 }
 0x1f2   : > { %v6739_v34 = vpop.f32.mrb[12].mxu1 }
 0x1f8   : > { %2085 = vmatmul.mubr.bf16.gmra.mrb[16].mxu0 %v1903_v35  ;;  %v6741_v35 = vpop.f32.mrb[13].mxu1 }
 0x1f9   : > { %2094 = vmatprep.mubr.bf16.mxu0 %v7552_v2  ;;  %v6743_v36 = vpop.f32.mrb[14].mxu1 }
 0x1fa   : > { %v6745_v37 = vpop.f32.mrb[15].mxu1 }
 0x200   : > { %2095 = vmatmul.mubr.bf16.gmra.mrb[20].mxu0 %v1904_v38  ;;  %v6747_v38 = vpop.f32.mrb[16].mxu1 }
 0x201   : > { %2104 = vmatprep.mubr.bf16.mxu0 %v7552_v2  ;;  %v6749_v39 = vpop.f32.mrb[17].mxu1 }
 0x202   : > { %v6751_v40 = vpop.f32.mrb[18].mxu1 }
 0x208   : > { %2105 = vmatmul.mubr.bf16.gmra.mrb[24].mxu0 %v1905_v41  ;;  %v6753_v41 = vpop.f32.mrb[19].mxu1 }
 0x209   : > { %2114 = vmatprep.mubr.bf16.mxu0 %v7552_v2  ;;  %v6755_v42 = vpop.f32.mrb[20].mxu1 }
 0x20a   : > { %v6757_v43 = vpop.f32.mrb[21].mxu1 }
 0x210   : > { %2115 = vmatmul.mubr.bf16.gmra.mrb[28].mxu0 %v1906_v44  ;;  %v6759_v44 = vpop.f32.mrb[22].mxu1 }
 0x211   : > { %2124 = vmatprep.mubr.bf16.mxu0 %v7552_v2  ;;  %v6761_v45 = vpop.f32.mrb[23].mxu1 }
 0x218   : > { %2125 = vmatmul.mubr.bf16.gmra.mrb[32].mxu0 %v1907_v47 }
 0x219   : > { %2134 = vmatprep.mubr.bf16.mxu0 %v7552_v2 }
 0x220   : > { %2135 = vmatmul.mubr.bf16.gmra.mrb[36].mxu0 %v1908_v50 }
 0x221   : > { %2144 = vmatprep.mubr.bf16.mxu0 %v7552_v2 }
 0x228   : > { %2145 = vmatmul.mubr.bf16.gmra.mrb[40].mxu0 %v1909_v53 }
 0x229   : > { %2154 = vmatprep.mubr.bf16.mxu0 %v7552_v2 }
 0x22f   : > { %v6763_v46 = vpop.f32.mrb[24].mxu1 }
 0x230   : > { %2155 = vmatmul.mubr.bf16.gmra.mrb[44].mxu0 %v1910_v56  ;;  %v6765_v47 = vpop.f32.mrb[25].mxu1 }
 0x231   : > { %2164 = vmatprep.mubr.bf16.mxu0 %v7552_v2  ;;  %v6767_v48 = vpop.f32.mrb[26].mxu1 }
 0x232   : > { %v6769_v49 = vpop.f32.mrb[27].mxu1 }
 0x237   : > { %v6771_v50 = vpop.f32.mrb[28].mxu1 }
 0x238   : > { %2165 = vmatmul.mubr.bf16.gmra.mrb[48].mxu0 %v1911_v61  ;;  %v6773_v51 = vpop.f32.mrb[29].mxu1 }
 0x239   : > { %2174 = vmatprep.mubr.bf16.mxu0 %v7552_v2  ;;  %v6775_v52 = vpop.f32.mrb[30].mxu1 }
 0x23a   : > { %v6777_v53 = vpop.f32.mrb[31].mxu1 }
 0x23f   : > { %v6779_v54 = vpop.f32.mrb[32].mxu1 }
 0x240   : > { %2175 = vmatmul.mubr.bf16.gmra.mrb[52].mxu0 %v1912_v1  ;;  %v6781_v55 = vpop.f32.mrb[33].mxu1 }
 0x241   : > { %2184 = vmatprep.mubr.bf16.mxu0 %v7552_v2  ;;  %v6783_v56 = vpop.f32.mrb[34].mxu1 }
 0x242   : > { %v6785_v57 = vpop.f32.mrb[35].mxu1 }
 0x247   : > { %v6787_v58 = vpop.f32.mrb[36].mxu1 }
 0x248   : > { %2185 = vmatmul.mubr.bf16.gmra.mrb[56].mxu0 %v1913_v9  ;;  %v6789_v59 = vpop.f32.mrb[37].mxu1 }
 0x249   : > { %2194 = vmatprep.mubr.bf16.mxu0 %v7552_v2  ;;  %v6791_v60 = vpop.f32.mrb[38].mxu1 }
 0x24a   : > { %v6793_v61 = vpop.f32.mrb[39].mxu1 }
 0x24f   : > { %v6798_v63 = vpop.f32.mrb[40].mxu1 }
 0x250   : > { %2195 = vmatmul.mubr.bf16.gmra.mrb[60].mxu0 %v1914_v20  ;;  %v6800_v0 = vpop.f32.mrb[41].mxu1 }
 0x251   : > { %v6802_v1 = vpop.f32.mrb[42].mxu1 }
 0x252   : > { %v6804_v3 = vpop.f32.mrb[43].mxu1 }
 0x253   : > { %7561 = vst [vmem:[#allocation9_spill] sm:$0xff] %v6804_v3 }
 0x257   : > { %v6808_v6 = vpop.f32.mrb[44].mxu1 }
 0x258   : > { %7563 = vst [vmem:[#allocation11_spill] sm:$0xff] %v6808_v6  ;;  %v6810_v7 = vpop.f32.mrb[45].mxu1 }
 0x259   : > { %7564 = vst [vmem:[#allocation12_spill] sm:$0xff] %v6810_v7  ;;  %v6812_v8 = vpop.f32.mrb[46].mxu1 }
 0x25a   : > { %7565 = vst [vmem:[#allocation13_spill] sm:$0xff] %v6812_v8  ;;  %v6814_v9 = vpop.f32.mrb[47].mxu1 }
 0x25b   : > { %7566 = vst [vmem:[#allocation14_spill] sm:$0xff] %v6814_v9 }
 0x2ab   : > { %v2046_v19 = vpop.f32.mrb[0].mxu0 }
 0x2ac   : > { %v2281_v20 = vadd.f32 %v6823_v14, %v2046_v19  ;;  %v2048_v21 = vpop.f32.mrb[1].mxu0 }
 0x2ad   : > { %v2282_v22 = vadd.f32 %v6827_v15, %v2048_v21  ;;  %v2050_v24 = vpop.f32.mrb[2].mxu0 }
 0x2ae   : > { %v2345_v28 = vmax.f32 %v2281_v20, 0.0  ;;  %v2283_v29 = vadd.f32 %v6823_v14, %v2050_v24  ;;  %v2052_v62 = vpop.f32.mrb[3].mxu0 }
 0x2af   : > { %v2346_v4 = vmax.f32 %v2282_v22, 0.0  ;;  %v2284_v2 = vadd.f32 %v6827_v15, %v2052_v62 }
 0x2b0   : > { %v2347_v10 = vmax.f32 %v2283_v29, 0.0 }
 0x2b1   : > { %v2409_v9 = vmax.f32 %v2345_v28, %v2346_v4  ;;  %v2348_v8 = vmax.f32 %v2284_v2, 0.0 }
 0x2b3   : > { %2441 = vst [vmem:[#allocation2] sm:$0xff] %v2409_v9  ;;  %v2410_v11 = vmax.f32 %v2347_v10, %v2348_v8  ;;  %v2056_v13 = vpop.f32.mrb[4].mxu0 }
 0x2b4   : > { %v2285_v5 = vadd.f32 %v6823_v14, %v2056_v13  ;;  %v2058_v19 = vpop.f32.mrb[5].mxu0 }
 0x2b5   : > { %2442 = vst [vmem:[#allocation2 + $0x8] sm:$0xff] %v2410_v11  ;;  %v2286_v21 = vadd.f32 %v6827_v15, %v2058_v19  ;;  %v2060_v7 = vpop.f32.mrb[6].mxu0 }
 0x2b6   : > { %v2349_v20 = vmax.f32 %v2285_v5, 0.0  ;;  %v2287_v24 = vadd.f32 %v6823_v14, %v2060_v7  ;;  %v2062_v6 = vpop.f32.mrb[7].mxu0 }
 0x2b7   : > { %v2350_v22 = vmax.f32 %v2286_v21, 0.0  ;;  %v2288_v62 = vadd.f32 %v6827_v15, %v2062_v6 }
 0x2b8   : > { %v2351_v29 = vmax.f32 %v2287_v24, 0.0 }
 0x2b9   : > { %v2411_v28 = vmax.f32 %v2349_v20, %v2350_v22  ;;  %v2352_v2 = vmax.f32 %v2288_v62, 0.0 }
 0x2bb   : > { %2443 = vst [vmem:[#allocation2 + $0x10] sm:$0xff] %v2411_v28  ;;  %v2412_v8 = vmax.f32 %v2351_v29, %v2352_v2  ;;  %v2066_v9 = vpop.f32.mrb[8].mxu0 }
 0x2bc   : > { %v2473_v10 = vld [vmem:[#allocation2] ss:$2 sm:$0xff]  ;;  %v2505_v13 = vld [vmem:[#allocation2 + $0x1] ss:$2 sm:$0xff]  ;;  %v2289_v4 = vadd.f32 %v6823_v14, %v2066_v9  ;;  %v2068_v11 = vpop.f32.mrb[9].mxu0 }
 0x2bd   : > { %v2536_v19 = vmax.f32 %v2473_v10, %v2505_v13  ;;  %2444 = vst [vmem:[#allocation2 + $0x18] sm:$0xff] %v2412_v8  ;;  %v2290_v5 = vadd.f32 %v6827_v15, %v2068_v11  ;;  %v2070_v7 = vpop.f32.mrb[10].mxu0 }
 0x2be   : > { %v2353_v3 = vmax.f32 %v2289_v4, 0.0  ;;  %v2291_v21 = vadd.f32 %v6823_v14, %v2070_v7  ;;  %v2072_v6 = vpop.f32.mrb[11].mxu0 }
 0x2bf   : > { %2552 = vst [vmem:[#allocation3] sm:$0xff] %v2536_v19  ;;  %v2354_v20 = vmax.f32 %v2290_v5, 0.0  ;;  %v2292_v24 = vadd.f32 %v6827_v15, %v2072_v6 }
 0x2c0   : > { %v2355_v22 = vmax.f32 %v2291_v21, 0.0 }
 0x2c1   : > { %v2413_v62 = vmax.f32 %v2353_v3, %v2354_v20  ;;  %v2356_v29 = vmax.f32 %v2292_v24, 0.0 }
 0x2c3   : > { %2445 = vst [vmem:[#allocation2 + $0x20] sm:$0xff] %v2413_v62  ;;  %v2414_v28 = vmax.f32 %v2355_v22, %v2356_v29  ;;  %v2076_v2 = vpop.f32.mrb[12].mxu0 }
 0x2c4   : > { %v2475_v9 = vld [vmem:[#allocation2 + $0x10] ss:$2 sm:$0xff]  ;;  %v2507_v10 = vld [vmem:[#allocation2 + $0x11] ss:$2 sm:$0xff]  ;;  %v2293_v8 = vadd.f32 %v6823_v14, %v2076_v2  ;;  %v2078_v13 = vpop.f32.mrb[13].mxu0 }
 0x2c5   : > { %v6842_v11 = vmax.f32 %v2475_v9, %v2507_v10  ;;  %2446 = vst [vmem:[#allocation2 + $0x28] sm:$0xff] %v2414_v28  ;;  %v2294_v4 = vadd.f32 %v6827_v15, %v2078_v13  ;;  %v2080_v19 = vpop.f32.mrb[14].mxu0 }
 0x2c6   : > { %v2357_v5 = vmax.f32 %v2293_v8, 0.0  ;;  %v2295_v7 = vadd.f32 %v6823_v14, %v2080_v19  ;;  %v2082_v21 = vpop.f32.mrb[15].mxu0 }
 0x2c7   : > { %2553 = vst [vmem:[#allocation3 + $0x8] sm:$0xff] %v6842_v11  ;;  %v2358_v3 = vmax.f32 %v2294_v4, 0.0  ;;  %v2296_v6 = vadd.f32 %v6827_v15, %v2082_v21 }
 0x2c8   : > { %v2359_v20 = vmax.f32 %v2295_v7, 0.0 }
 0x2c9   : > { %v2415_v24 = vmax.f32 %v2357_v5, %v2358_v3  ;;  %v2360_v22 = vmax.f32 %v2296_v6, 0.0 }
 0x2cb   : > { %2447 = vst [vmem:[#allocation2 + $0x30] sm:$0xff] %v2415_v24  ;;  %v2416_v62 = vmax.f32 %v2359_v20, %v2360_v22  ;;  %v2086_v29 = vpop.f32.mrb[16].mxu0 }
 0x2cc   : > { %v2477_v2 = vld [vmem:[#allocation2 + $0x20] ss:$2 sm:$0xff]  ;;  %v2509_v28 = vld [vmem:[#allocation2 + $0x21] ss:$2 sm:$0xff]  ;;  %v5282_v9 = vadd.f32 %v2086_v29, %v6691_v12  ;;  %v2088_v10 = vpop.f32.mrb[17].mxu0 }
 0x2cd   : > { %v6849_v8 = vmax.f32 %v2477_v2, %v2509_v28  ;;  %2448 = vst [vmem:[#allocation2 + $0x38] sm:$0xff] %v2416_v62  ;;  %v5283_v13 = vadd.f32 %v2088_v10, %v6699_v16  ;;  %v2090_v19 = vpop.f32.mrb[18].mxu0 }
 0x2ce   : > { %v2297_v4 = vadd.f32 %v5282_v9, %v6823_v14  ;;  %v5284_v7 = vadd.f32 %v2090_v19, %v6701_v17  ;;  %v2092_v5 = vpop.f32.mrb[19].mxu0 }
 0x2cf   : > { %2554 = vst [vmem:[#allocation3 + $0x10] sm:$0xff] %v6849_v8  ;;  %v2298_v21 = vadd.f32 %v5283_v13, %v6827_v15  ;;  %v5285_v3 = vadd.f32 %v2092_v5, %v6703_v18 }
 0x2d0   : > { %v2361_v6 = vmax.f32 %v2297_v4, 0.0  ;;  %v2299_v12 = vadd.f32 %v5284_v7, %v6823_v14 }
 0x2d1   : > { %v2362_v20 = vmax.f32 %v2298_v21, 0.0  ;;  %v2300_v24 = vadd.f32 %v5285_v3, %v6827_v15  ;;  %v2608_v21 = vld [vmem:[#allocation3 + $0x1] sm:$0xff] }
 0x2d2   : > { %v2363_v22 = vmax.f32 %v2299_v12, 0.0 }
 0x2d3   : > { %v2417_v16 = vmax.f32 %v2361_v6, %v2362_v20  ;;  %v2364_v62 = vmax.f32 %v2300_v24, 0.0  ;;  %v2096_v29 = vpop.f32.mrb[20].mxu0  ;;  %v5852_v6 = vld [vmem:[%s7543_s3] ss:$8 sps:$4 sm:$0xff]   ;;  %v5857_v20 = vld [vmem:[%s7543_s3 + $0x14] ss:$8 sps:$4 sm:$0xff]  }
 0x2d4   : > { %v2479_v2 = vld [vmem:[#allocation2 + $0x30] ss:$2 sm:$0xff]  ;;  %v2511_v28 = vld [vmem:[#allocation2 + $0x31] ss:$2 sm:$0xff]  ;;  %v5286_v17 = vadd.f32 %v2096_v29, %v6714_v23  ;;  %v2098_v9 = vpop.f32.mrb[21].mxu0 }
 0x2d5   : > { %v6860_v10 = vmax.f32 %v2479_v2, %v2511_v28  ;;  %2449 = vst [vmem:[#allocation2 + $0x40] sm:$0xff] %v2417_v16  ;;  %v2418_v13 = vmax.f32 %v2363_v22, %v2364_v62  ;;  %v5287_v18 = vadd.f32 %v2098_v9, %v6719_v25  ;;  %v2100_v19 = vpop.f32.mrb[22].mxu0  ;;  %v7567_v2 = vmov 0  }
 0x2d6   : > { %v2301_v4 = vadd.f32 %v5286_v17, %v6823_v14  ;;  %v5288_v7 = vadd.f32 %v2100_v19, %v6721_v26  ;;  %v2102_v5 = vpop.f32.mrb[23].mxu0  ;;  %v2609_v3 = vld [vmem:[#allocation3 + $0x9] sm:$0xff] }
 0x2d7   : > { %2555 = vst [vmem:[#allocation3 + $0x18] sm:$0xff] %v6860_v10  ;;  %2450 = vst [vmem:[#allocation2 + $0x48] sm:$0xff] %v2418_v13  ;;  %v2302_v23 = vadd.f32 %v5287_v18, %v6827_v15  ;;  %v5289_v12 = vadd.f32 %v2102_v5, %v6723_v27  ;;  %v2624_v25 = vpack.c.bf16 %v2609_v3, %v2608_v21  ;;  %v5855_v27 = vld [vmem:[%s7543_s3 + $0x10] ss:$8 sps:$4 sm:$0xff]   ;;  %v5860_v13 = vld [vmem:[%s7543_s3 + $0x24] ss:$8 sps:$4 sm:$0xff]  }
 0x2d8   : > { %v2585_v26 = vpack.c.bf16 %v6860_v10, %v6849_v8  ;;  %v2365_v24 = vmax.f32 %v2301_v4, 0.0  ;;  %v2303_v22 = vadd.f32 %v5288_v7, %v6823_v14  ;;  %v5858_v21 = vld [vmem:[%s7543_s3 + $0x20] ss:$8 sps:$4 sm:$0xff]   ;;  %v5893_v8 = vld [vmem:[%s7543_s3 + $0x154] ss:$8 sps:$4 sm:$0xff]  }
 0x2d9   : > { %v2366_v16 = vmax.f32 %v2302_v23, 0.0  ;;  %v2304_v62 = vadd.f32 %v5289_v12, %v6827_v15  ;;  %2762 = vmatmul.mubr.bf16.vlgmr.msra.gmra.mrb[48].mxu1 %v2624_v25  ;;  %v5891_v10 = vld [vmem:[%s7543_s3 + $0x150] ss:$8 sps:$4 sm:$0xff]  }
 0x2da   : > { %v2367_v29 = vmax.f32 %v2303_v22, 0.0  ;;  %2771 = vmatprep.mubr.bf16.mxu1 %v7567_v2  ;;  %2923 = vmatpush1.bf16.msra.mxu1 %v5852_v6 }
 0x2db   : > { %v2419_v28 = vmax.f32 %v2365_v24, %v2366_v16  ;;  %v2368_v17 = vmax.f32 %v2304_v62, 0.0  ;;  %v2106_v9 = vpop.f32.mrb[24].mxu0  ;;  %2924 = vmatprep.subr.bf16.mxu1 %v5857_v20 }
 0x2dc   : > { %v5290_v18 = vadd.f32 %v2106_v9, %v6731_v30  ;;  %v2108_v19 = vpop.f32.mrb[25].mxu0  ;;  %v5866_v9 = vld [vmem:[%s7543_s3 + $0x44] ss:$8 sps:$4 sm:$0xff]  }
 0x2dd   : > { %2451 = vst [vmem:[#allocation2 + $0x50] sm:$0xff] %v2419_v28  ;;  %v2420_v4 = vmax.f32 %v2367_v29, %v2368_v17  ;;  %v5291_v7 = vadd.f32 %v2108_v19, %v6733_v31  ;;  %v2110_v5 = vpop.f32.mrb[26].mxu0  ;;  %v5863_v31 = vld [vmem:[%s7543_s3 + $0x34] ss:$8 sps:$4 sm:$0xff]  }
 0x2de   : > { %v2481_v3 = vld [vmem:[#allocation2 + $0x40] ss:$2 sm:$0xff]  ;;  %v2513_v6 = vld [vmem:[#allocation2 + $0x41] ss:$2 sm:$0xff]  ;;  %v2305_v23 = vadd.f32 %v5290_v18, %v6823_v14  ;;  %v5292_v12 = vadd.f32 %v2110_v5, %v6735_v32  ;;  %v2112_v25 = vpop.f32.mrb[27].mxu0  ;;  %2925 = vmatpush1.bf16.msra.mxu1 %v5855_v27 }
 0x2df   : > { %2452 = vst [vmem:[#allocation2 + $0x58] sm:$0xff] %v2420_v4  ;;  %v2306_v30 = vadd.f32 %v5291_v7, %v6827_v15  ;;  %v5293_v20 = vadd.f32 %v2112_v25, %v6737_v33  ;;  %v6894_v24 = vmax.f32 %v2481_v3, %v2513_v6  ;;  %2926 = vmatprep.subr.bf16.mxu1 %v5860_v13  ;;  %v5861_v33 = vld [vmem:[%s7543_s3 + $0x30] ss:$8 sps:$4 sm:$0xff]   ;;  %v5864_v5 = vld [vmem:[%s7543_s3 + $0x40] ss:$8 sps:$4 sm:$0xff]  }
 0x2e0   : > { %v2369_v22 = vmax.f32 %v2305_v23, 0.0  ;;  %v2307_v16 = vadd.f32 %v5292_v12, %v6823_v14 }
 0x2e1   : > { %v2370_v62 = vmax.f32 %v2306_v30, 0.0  ;;  %v2308_v32 = vadd.f32 %v5293_v20, %v6827_v15  ;;  %2556 = vst [vmem:[#allocation3 + $0x20] sm:$0xff] %v6894_v24 }
 0x2e2   : > { %v2371_v29 = vmax.f32 %v2307_v16, 0.0  ;;  %2927 = vmatpush1.bf16.msra.mxu1 %v5858_v21 }
 0x2e3   : > { %v2421_v27 = vmax.f32 %v2369_v22, %v2370_v62  ;;  %v2372_v28 = vmax.f32 %v2308_v32, 0.0  ;;  %v2116_v17 = vpop.f32.mrb[28].mxu0  ;;  %2928 = vmatprep.subr.bf16.mxu1 %v5863_v31  ;;  %v2610_v22 = vld [vmem:[#allocation3 + $0x11] sm:$0xff] }
 0x2e4   : > { %v5294_v13 = vadd.f32 %v2116_v17, %v6739_v34  ;;  %v2118_v18 = vpop.f32.mrb[29].mxu0 }
 0x2e5   : > { %2453 = vst [vmem:[#allocation2 + $0x60] sm:$0xff] %v2421_v27  ;;  %v2422_v19 = vmax.f32 %v2371_v29, %v2372_v28  ;;  %v5295_v4 = vadd.f32 %v2118_v18, %v6741_v35  ;;  %v2120_v7 = vpop.f32.mrb[30].mxu0  ;;  %v5869_v35 = vld [vmem:[%s7543_s3 + $0x54] ss:$8 sps:$4 sm:$0xff]  }
 0x2e6   : > { %v2483_v21 = vld [vmem:[#allocation2 + $0x50] ss:$2 sm:$0xff]  ;;  %v2515_v3 = vld [vmem:[#allocation2 + $0x51] ss:$2 sm:$0xff]  ;;  %v2309_v6 = vadd.f32 %v5294_v13, %v6823_v14  ;;  %v5296_v23 = vadd.f32 %v2120_v7, %v6743_v36  ;;  %v2122_v12 = vpop.f32.mrb[31].mxu0  ;;  %2929 = vmatpush1.bf16.msra.mxu1 %v5861_v33 }
 0x2e7   : > { %2454 = vst [vmem:[#allocation2 + $0x68] sm:$0xff] %v2422_v19  ;;  %v2310_v34 = vadd.f32 %v5295_v4, %v6827_v15  ;;  %v5297_v25 = vadd.f32 %v2122_v12, %v6745_v37  ;;  %v6917_v30 = vmax.f32 %v2483_v21, %v2515_v3  ;;  %2930 = vmatprep.subr.bf16.mxu1 %v5866_v9  ;;  %v5867_v33 = vld [vmem:[%s7543_s3 + $0x50] ss:$8 sps:$4 sm:$0xff]   ;;  %v5872_v9 = vld [vmem:[%s7543_s3 + $0x64] ss:$8 sps:$4 sm:$0xff]  }
 0x2e8   : > { %v2373_v20 = vmax.f32 %v2309_v6, 0.0  ;;  %v2311_v31 = vadd.f32 %v5296_v23, %v6823_v14  ;;  %v2611_v16 = vld [vmem:[#allocation3 + $0x19] sm:$0xff] }
 0x2e9   : > { %v2374_v36 = vmax.f32 %v2310_v34, 0.0  ;;  %v2312_v62 = vadd.f32 %v5297_v25, %v6827_v15  ;;  %v2625_v32 = vpack.c.bf16 %v2611_v16, %v2610_v22  ;;  %2557 = vst [vmem:[#allocation3 + $0x28] sm:$0xff] %v6917_v30  ;;  %v2586_v37 = vpack.c.bf16 %v6917_v30, %v6894_v24  ;;  %v5899_v24 = vld [vmem:[%s7543_s3 + $0x174] ss:$8 sps:$4 sm:$0xff]   ;;  %v5897_v30 = vld [vmem:[%s7543_s3 + $0x170] ss:$8 sps:$4 sm:$0xff]  }
 0x2ea   : > { %v2375_v29 = vmax.f32 %v2311_v31, 0.0  ;;  %2931 = vmatpush1.bf16.msra.mxu1 %v5864_v5  ;;  %v5870_v5 = vld [vmem:[%s7543_s3 + $0x60] ss:$8 sps:$4 sm:$0xff]  }
 0x2eb   : > { %v2423_v27 = vmax.f32 %v2373_v20, %v2374_v36  ;;  %v2376_v28 = vmax.f32 %v2312_v62, 0.0  ;;  %v2126_v17 = vpop.f32.mrb[32].mxu0  ;;  %2772 = vmatmul.mubr.bf16.gmra.mrb[52].mxu1 %v2625_v32  ;;  %2932 = vmatprep.subr.bf16.mxu1 %v5869_v35  ;;  %v5878_v32 = vld [vmem:[%s7543_s3 + $0x104] ss:$8 sps:$4 sm:$0xff]  }
 0x2ec   : > { %v5298_v13 = vadd.f32 %v2126_v17, %v6747_v38  ;;  %v2128_v18 = vpop.f32.mrb[33].mxu0  ;;  %2781 = vmatprep.mubr.bf16.mxu1 %v7567_v2 }
 0x2ed   : > { %2455 = vst [vmem:[#allocation2 + $0x70] sm:$0xff] %v2423_v27  ;;  %v2424_v19 = vmax.f32 %v2375_v29, %v2376_v28  ;;  %v5299_v4 = vadd.f32 %v2128_v18, %v6749_v39  ;;  %v2130_v7 = vpop.f32.mrb[34].mxu0  ;;  %v5875_v39 = vld [vmem:[%s7543_s3 + $0x74] ss:$8 sps:$4 sm:$0xff]  }
 0x2ee   : > { %v2485_v21 = vld [vmem:[#allocation2 + $0x60] ss:$2 sm:$0xff]  ;;  %v2517_v3 = vld [vmem:[#allocation2 + $0x61] ss:$2 sm:$0xff]  ;;  %v2313_v6 = vadd.f32 %v5298_v13, %v6823_v14  ;;  %v5300_v23 = vadd.f32 %v2130_v7, %v6751_v40  ;;  %v2132_v12 = vpop.f32.mrb[35].mxu0  ;;  %2933 = vmatpush1.bf16.msra.mxu1 %v5867_v33 }
 0x2ef   : > { %2456 = vst [vmem:[#allocation2 + $0x78] sm:$0xff] %v2424_v19  ;;  %v2314_v38 = vadd.f32 %v5299_v4, %v6827_v15  ;;  %v5301_v34 = vadd.f32 %v2132_v12, %v6753_v41  ;;  %v6943_v25 = vmax.f32 %v2485_v21, %v2517_v3  ;;  %2934 = vmatprep.subr.bf16.mxu1 %v5872_v9  ;;  %v5873_v41 = vld [vmem:[%s7543_s3 + $0x70] ss:$8 sps:$4 sm:$0xff]  }
 0x2f0   : > { %v2377_v35 = vmax.f32 %v2313_v6, 0.0  ;;  %v2315_v20 = vadd.f32 %v5300_v23, %v6823_v14  ;;  %v2612_v3 = vld [vmem:[#allocation3 + $0x21] sm:$0xff] }
 0x2f1   : > { %v2378_v31 = vmax.f32 %v2314_v38, 0.0  ;;  %v2316_v40 = vadd.f32 %v5301_v34, %v6827_v15  ;;  %2558 = vst [vmem:[#allocation3 + $0x30] sm:$0xff] %v6943_v25 }
 0x2f2   : > { %v2379_v22 = vmax.f32 %v2315_v20, 0.0  ;;  %2935 = vmatpush1.bf16.msra.mxu1 %v5870_v5 }
 0x2f3   : > { %v2425_v16 = vmax.f32 %v2377_v35, %v2378_v31  ;;  %v2380_v36 = vmax.f32 %v2316_v40, 0.0  ;;  %v2136_v62 = vpop.f32.mrb[36].mxu0  ;;  %2936 = vmatprep.subr.bf16.mxu1 %v5875_v39 }
 0x2f4   : > { %v5302_v29 = vadd.f32 %v2136_v62, %v6755_v42  ;;  %v2138_v33 = vpop.f32.mrb[37].mxu0 }
 0x2f5   : > { %2457 = vst [vmem:[#allocation2 + $0x80] sm:$0xff] %v2425_v16  ;;  %v2426_v27 = vmax.f32 %v2379_v22, %v2380_v36  ;;  %v5303_v28 = vadd.f32 %v2138_v33, %v6757_v43  ;;  %v2140_v17 = vpop.f32.mrb[38].mxu0 }
 0x2f6   : > { %v2487_v9 = vld [vmem:[#allocation2 + $0x70] ss:$2 sm:$0xff]  ;;  %v2519_v13 = vld [vmem:[#allocation2 + $0x71] ss:$2 sm:$0xff]  ;;  %v2317_v18 = vadd.f32 %v5302_v29, %v6823_v14  ;;  %v5304_v19 = vadd.f32 %v2140_v17, %v6759_v44  ;;  %v2142_v4 = vpop.f32.mrb[39].mxu0  ;;  %2937 = vmatpush1.bf16.msra.mxu1 %v5873_v41 }
 0x2f7   : > { %2458 = vst [vmem:[#allocation2 + $0x88] sm:$0xff] %v2426_v27  ;;  %v2318_v7 = vadd.f32 %v5303_v28, %v6827_v15  ;;  %v5305_v5 = vadd.f32 %v2142_v4, %v6761_v45  ;;  %v6963_v42 = vmax.f32 %v2487_v9, %v2519_v13  ;;  %3156 = vmatprep.subr.bf16.mxu1 %v5878_v32 }
 0x2f8   : > { %v2381_v21 = vmax.f32 %v2317_v18, 0.0  ;;  %v2319_v43 = vadd.f32 %v5304_v19, %v6823_v14  ;;  %v2613_v6 = vld [vmem:[#allocation3 + $0x29] sm:$0xff] }
 0x2f9   : > { %v2382_v23 = vmax.f32 %v2318_v7, 0.0  ;;  %v2320_v12 = vadd.f32 %v5305_v5, %v6827_v15  ;;  %v2626_v38 = vpack.c.bf16 %v2613_v6, %v2612_v3  ;;  %2559 = vst [vmem:[#allocation3 + $0x38] sm:$0xff] %v6963_v42  ;;  %v2587_v44 = vpack.c.bf16 %v6963_v42, %v6943_v25 }
 0x2fa   : > { %v2383_v34 = vmax.f32 %v2319_v43, 0.0 }
 0x2fb   : > { %v2427_v39 = vmax.f32 %v2381_v21, %v2382_v23  ;;  %v2384_v45 = vmax.f32 %v2320_v12, 0.0  ;;  %v2146_v35 = vpop.f32.mrb[40].mxu0  ;;  %2782 = vmatmul.mubr.bf16.gmra.mrb[56].mxu1 %v2626_v38 }
 0x2fc   : > { %v5306_v20 = vadd.f32 %v2146_v35, %v6763_v46  ;;  %v2148_v31 = vpop.f32.mrb[41].mxu0  ;;  %2791 = vmatprep.mubr.bf16.mxu1 %v7567_v2 }
 0x2fd   : > { %2459 = vst [vmem:[#allocation2 + $0x90] sm:$0xff] %v2427_v39  ;;  %v2428_v40 = vmax.f32 %v2383_v34, %v2384_v45  ;;  %v5307_v22 = vadd.f32 %v2148_v31, %v6765_v47  ;;  %v2150_v41 = vpop.f32.mrb[42].mxu0 }
 0x2fe   : > { %v2489_v16 = vld [vmem:[#allocation2 + $0x80] ss:$2 sm:$0xff]  ;;  %v2521_v36 = vld [vmem:[#allocation2 + $0x81] ss:$2 sm:$0xff]  ;;  %v2321_v62 = vadd.f32 %v5306_v20, %v6823_v14  ;;  %v5308_v32 = vadd.f32 %v2150_v41, %v6767_v48  ;;  %v2152_v29 = vpop.f32.mrb[43].mxu0 }
 0x2ff   : > { %2460 = vst [vmem:[#allocation2 + $0x98] sm:$0xff] %v2428_v40  ;;  %v2322_v33 = vadd.f32 %v5307_v22, %v6827_v15  ;;  %v5309_v46 = vadd.f32 %v2152_v29, %v6769_v49  ;;  %v6977_v27 = vmax.f32 %v2489_v16, %v2521_v36 }
 0x300   : > { %v2385_v28 = vmax.f32 %v2321_v62, 0.0  ;;  %v2323_v17 = vadd.f32 %v5308_v32, %v6823_v14  ;;  %v2614_v35 = vld [vmem:[#allocation3 + $0x31] sm:$0xff] }
 0x301   : > { %v2386_v9 = vmax.f32 %v2322_v33, 0.0  ;;  %v2324_v47 = vadd.f32 %v5309_v46, %v6827_v15  ;;  %2560 = vst [vmem:[#allocation3 + $0x40] sm:$0xff] %v6977_v27 }
 0x302   : > { %v2387_v13 = vmax.f32 %v2323_v17, 0.0 }
 0x303   : > { %v2429_v18 = vmax.f32 %v2385_v28, %v2386_v9  ;;  %v2388_v19 = vmax.f32 %v2324_v47, 0.0  ;;  %v2156_v48 = vpop.f32.mrb[44].mxu0 }
 0x304   : > { %v5310_v4 = vadd.f32 %v2156_v48, %v6771_v50  ;;  %v2158_v7 = vpop.f32.mrb[45].mxu0 }
 0x305   : > { %2461 = vst [vmem:[#allocation2 + $0xa0] sm:$0xff] %v2429_v18  ;;  %v2430_v5 = vmax.f32 %v2387_v13, %v2388_v19  ;;  %v5311_v49 = vadd.f32 %v2158_v7, %v6773_v51  ;;  %v2160_v21 = vpop.f32.mrb[46].mxu0 }
 0x306   : > { %v2491_v43 = vld [vmem:[#allocation2 + $0x90] ss:$2 sm:$0xff]  ;;  %v2523_v3 = vld [vmem:[#allocation2 + $0x91] ss:$2 sm:$0xff]  ;;  %v2325_v6 = vadd.f32 %v5310_v4, %v6823_v14  ;;  %v5312_v23 = vadd.f32 %v2160_v21, %v6775_v52  ;;  %v2162_v12 = vpop.f32.mrb[47].mxu0 }
 0x307   : > { %2462 = vst [vmem:[#allocation2 + $0xa8] sm:$0xff] %v2430_v5  ;;  %v2326_v38 = vadd.f32 %v5311_v49, %v6827_v15  ;;  %v5313_v34 = vadd.f32 %v2162_v12, %v6777_v53  ;;  %v6988_v39 = vmax.f32 %v2491_v43, %v2523_v3 }
 0x308   : > { %v2389_v50 = vmax.f32 %v2325_v6, 0.0  ;;  %v2327_v45 = vadd.f32 %v5312_v23, %v6823_v14  ;;  %v2615_v51 = vld [vmem:[#allocation3 + $0x39] sm:$0xff] }
 0x309   : > { %v2390_v20 = vmax.f32 %v2326_v38, 0.0  ;;  %v2328_v31 = vadd.f32 %v5313_v34, %v6827_v15  ;;  %v2627_v40 = vpack.c.bf16 %v2615_v51, %v2614_v35  ;;  %2561 = vst [vmem:[#allocation3 + $0x48] sm:$0xff] %v6988_v39  ;;  %v2588_v52 = vpack.c.bf16 %v6988_v39, %v6977_v27  ;;  %v3035_v27 = vld [vmem:[#allocation3 + $0x2] sm:$0xff] }
 0x30a   : > { %v2391_v22 = vmax.f32 %v2327_v45, 0.0  ;;  %v5900_v39 = vld [vmem:[%s7543_s3 + $0x180] ss:$8 sps:$4 sm:$0xff]  }
 0x30b   : > { %v2431_v41 = vmax.f32 %v2389_v50, %v2390_v20  ;;  %v2392_v16 = vmax.f32 %v2328_v31, 0.0  ;;  %v2166_v53 = vpop.f32.mrb[48].mxu0  ;;  %2792 = vmatmul.mubr.bf16.gmra.mrb[60].mxu1 %v2627_v40 }
 0x30c   : > { %v5314_v36 = vadd.f32 %v2166_v53, %v6779_v54  ;;  %v2168_v62 = vpop.f32.mrb[49].mxu0  ;;  %2801 = vmatprep.mubr.bf16.mxu1 %v7567_v2 }
 0x30d   : > { %2463 = vst [vmem:[#allocation2 + $0xb0] sm:$0xff] %v2431_v41  ;;  %v2432_v32 = vmax.f32 %v2391_v22, %v2392_v16  ;;  %v5315_v29 = vadd.f32 %v2168_v62, %v6781_v55  ;;  %v2170_v33 = vpop.f32.mrb[50].mxu0 }
 0x30e   : > { %v2493_v46 = vld [vmem:[#allocation2 + $0xa0] ss:$2 sm:$0xff]  ;;  %v2525_v28 = vld [vmem:[#allocation2 + $0xa1] ss:$2 sm:$0xff]  ;;  %v2329_v17 = vadd.f32 %v5314_v36, %v6823_v14  ;;  %v5316_v9 = vadd.f32 %v2170_v33, %v6783_v56  ;;  %v2172_v47 = vpop.f32.mrb[51].mxu0 }
 0x30f   : > { %2464 = vst [vmem:[#allocation2 + $0xb8] sm:$0xff] %v2432_v32  ;;  %v2330_v13 = vadd.f32 %v5315_v29, %v6827_v15  ;;  %v5317_v54 = vadd.f32 %v2172_v47, %v6785_v57  ;;  %v7002_v18 = vmax.f32 %v2493_v46, %v2525_v28 }
 0x310   : > { %v2393_v19 = vmax.f32 %v2329_v17, 0.0  ;;  %v2331_v48 = vadd.f32 %v5316_v9, %v6823_v14  ;;  %v2616_v31 = vld [vmem:[#allocation3 + $0x41] sm:$0xff] }
 0x311   : > { %v2394_v4 = vmax.f32 %v2330_v13, 0.0  ;;  %v2332_v55 = vadd.f32 %v5317_v54, %v6827_v15  ;;  %2562 = vst [vmem:[#allocation3 + $0x50] sm:$0xff] %v7002_v18 }
 0x312   : > { %v2395_v7 = vmax.f32 %v2331_v48, 0.0 }
 0x313   : > { %v2433_v5 = vmax.f32 %v2393_v19, %v2394_v4  ;;  %v2396_v49 = vmax.f32 %v2332_v55, 0.0  ;;  %v2176_v56 = vpop.f32.mrb[52].mxu0  ;;  %v7568_v19 = vld [vmem:[#allocation9_spill] sm:$0xff] }
 0x314   : > { %v5318_v21 = vadd.f32 %v2176_v56, %v6787_v58  ;;  %v2178_v43 = vpop.f32.mrb[53].mxu0 }
 0x315   : > { %2465 = vst [vmem:[#allocation2 + $0xc0] sm:$0xff] %v2433_v5  ;;  %v2434_v3 = vmax.f32 %v2395_v7, %v2396_v49  ;;  %v5319_v57 = vadd.f32 %v2178_v43, %v6789_v59  ;;  %v2180_v6 = vpop.f32.mrb[54].mxu0 }
 0x316   : > { %v2495_v23 = vld [vmem:[#allocation2 + $0xb0] ss:$2 sm:$0xff]  ;;  %v2527_v12 = vld [vmem:[#allocation2 + $0xb1] ss:$2 sm:$0xff]  ;;  %v2333_v38 = vadd.f32 %v5318_v21, %v6823_v14  ;;  %v5320_v34 = vadd.f32 %v2180_v6, %v6791_v60  ;;  %v2182_v50 = vpop.f32.mrb[55].mxu0  ;;  %v7569_v21 = vld [vmem:[#allocation11_spill] sm:$0xff] }
 0x317   : > { %2466 = vst [vmem:[#allocation2 + $0xc8] sm:$0xff] %v2434_v3  ;;  %v2334_v45 = vadd.f32 %v5319_v57, %v6827_v15  ;;  %v5321_v35 = vadd.f32 %v2182_v50, %v6793_v61  ;;  %v7013_v51 = vmax.f32 %v2495_v23, %v2527_v12  ;;  %v7570_v6 = vld [vmem:[#allocation12_spill] sm:$0xff] }
 0x318   : > { %v2397_v58 = vmax.f32 %v2333_v38, 0.0  ;;  %v2335_v20 = vadd.f32 %v5320_v34, %v6823_v14  ;;  %v2617_v59 = vld [vmem:[#allocation3 + $0x49] sm:$0xff] }
 0x319   : > { %v2398_v40 = vmax.f32 %v2334_v45, 0.0  ;;  %v2336_v22 = vadd.f32 %v5321_v35, %v6827_v15  ;;  %v2628_v41 = vpack.c.bf16 %v2617_v59, %v2616_v31  ;;  %2563 = vst [vmem:[#allocation3 + $0x58] sm:$0xff] %v7013_v51  ;;  %v2589_v60 = vpack.c.bf16 %v7013_v51, %v7002_v18  ;;  %v7571_v45 = vld [vmem:[#allocation13_spill] sm:$0xff]  ;;  %v7572_v31 = vld [vmem:[#allocation14_spill] sm:$0xff] }
 0x31a   : > { %v2399_v16 = vmax.f32 %v2335_v20, 0.0  ;;  %v5905_v18 = vld [vmem:[%s7543_s3 + $0x194] ss:$8 sps:$4 sm:$0xff]   ;;  %v5903_v51 = vld [vmem:[%s7543_s3 + $0x190] ss:$8 sps:$4 sm:$0xff]  }
 0x31b   : > { %v2435_v53 = vmax.f32 %v2397_v58, %v2398_v40  ;;  %v2400_v36 = vmax.f32 %v2336_v22, 0.0  ;;  %v2186_v61 = vpop.f32.mrb[56].mxu0  ;;  %2802 = vmatmul.mubr.bf16.gmra.mrb[64].mxu1 %v2628_v41 }
 0x31c   : > { %v5322_v62 = vadd.f32 %v2186_v61, %v6798_v63  ;;  %v2188_v32 = vpop.f32.mrb[57].mxu0  ;;  %2811 = vmatprep.mubr.bf16.mxu1 %v7567_v2 }
 0x31d   : > { %2467 = vst [vmem:[#allocation2 + $0xd0] sm:$0xff] %v2435_v53  ;;  %v2436_v29 = vmax.f32 %v2399_v16, %v2400_v36  ;;  %v5323_v33 = vadd.f32 %v2188_v32, %v6800_v0  ;;  %v2190_v46 = vpop.f32.mrb[58].mxu0 }
 0x31e   : > { %v2497_v28 = vld [vmem:[#allocation2 + $0xc0] ss:$2 sm:$0xff]  ;;  %v2529_v17 = vld [vmem:[#allocation2 + $0xc1] ss:$2 sm:$0xff]  ;;  %v2337_v9 = vadd.f32 %v5322_v62, %v6823_v14  ;;  %v5324_v47 = vadd.f32 %v2190_v46, %v6802_v1  ;;  %v2192_v13 = vpop.f32.mrb[59].mxu0 }
 0x31f   : > { %2468 = vst [vmem:[#allocation2 + $0xd8] sm:$0xff] %v2436_v29  ;;  %v2338_v54 = vadd.f32 %v5323_v33, %v6827_v15  ;;  %v5325_v63 = vadd.f32 %v2192_v13, %v7568_v19  ;;  %v7027_v48 = vmax.f32 %v2497_v28, %v2529_v17 }
 0x320   : > { %v2401_v4 = vmax.f32 %v2337_v9, 0.0  ;;  %v2339_v55 = vadd.f32 %v5324_v47, %v6823_v14  ;;  %v2618_v16 = vld [vmem:[#allocation3 + $0x51] sm:$0xff] }
 0x321   : > { %v2402_v7 = vmax.f32 %v2338_v54, 0.0  ;;  %v2340_v0 = vadd.f32 %v5325_v63, %v6827_v15  ;;  %2564 = vst [vmem:[#allocation3 + $0x60] sm:$0xff] %v7027_v48 }
 0x322   : > { %v2403_v5 = vmax.f32 %v2339_v55, 0.0 }
 0x323   : > { %v2437_v49 = vmax.f32 %v2401_v4, %v2402_v7  ;;  %v2404_v56 = vmax.f32 %v2340_v0, 0.0  ;;  %v2196_v1 = vpop.f32.mrb[60].mxu0  ;;  %v2568_v0 = vld [vmem:[#allocation3] sm:$0xff] }
 0x324   : > { %v5326_v43 = vadd.f32 %v2196_v1, %v7569_v21  ;;  %v2198_v3 = vpop.f32.mrb[61].mxu0  ;;  %v5879_v1 = vld [vmem:[%s7543_s3 + $0x110] ss:$8 sps:$4 sm:$0xff]   ;;  %v5884_v21 = vld [vmem:[%s7543_s3 + $0x124] ss:$8 sps:$4 sm:$0xff]  }
 0x325   : > { %2469 = vst [vmem:[#allocation2 + $0xe0] sm:$0xff] %v2437_v49  ;;  %v2438_v57 = vmax.f32 %v2403_v5, %v2404_v56  ;;  %v5327_v23 = vadd.f32 %v2198_v3, %v7570_v6  ;;  %v2200_v12 = vpop.f32.mrb[62].mxu0  ;;  %v5876_v5 = vld [vmem:[%s7543_s3 + $0x100] ss:$8 sps:$4 sm:$0xff]   ;;  %v2584_v49 = vpack.c.bf16 %v6842_v11, %v2568_v0  ;;  %v5881_v56 = vld [vmem:[%s7543_s3 + $0x114] ss:$8 sps:$4 sm:$0xff]  }
 0x326   : > { %v2499_v38 = vld [vmem:[#allocation2 + $0xd0] ss:$2 sm:$0xff]  ;;  %v2531_v34 = vld [vmem:[#allocation2 + $0xd1] ss:$2 sm:$0xff]  ;;  %v2341_v50 = vadd.f32 %v5326_v43, %v6823_v14  ;;  %v5328_v35 = vadd.f32 %v2200_v12, %v7571_v45  ;;  %v2202_v58 = vpop.f32.mrb[63].mxu0 }
 0x327   : > { %2470 = vst [vmem:[#allocation2 + $0xe8] sm:$0xff] %v2438_v57  ;;  %v2342_v20 = vadd.f32 %v5327_v23, %v6827_v15  ;;  %v5329_v59 = vadd.f32 %v2202_v58, %v7572_v31  ;;  %v7038_v40 = vmax.f32 %v2499_v38, %v2531_v34  ;;  %v5882_v11 = vld [vmem:[%s7543_s3 + $0x120] ss:$8 sps:$4 sm:$0xff]   ;;  %v5887_v43 = vld [vmem:[%s7543_s3 + $0x134] ss:$8 sps:$4 sm:$0xff]  }
 0x328   : > { %v2405_v22 = vmax.f32 %v2341_v50, 0.0  ;;  %v2343_v41 = vadd.f32 %v5328_v35, %v6823_v14  ;;  %v2619_v53 = vld [vmem:[#allocation3 + $0x59] sm:$0xff]  ;;  %v5890_v57 = vld [vmem:[%s7543_s3 + $0x144] ss:$8 sps:$4 sm:$0xff]  }
 0x329   : > { %v2406_v36 = vmax.f32 %v2342_v20, 0.0  ;;  %v2344_v61 = vadd.f32 %v5329_v59, %v6827_v15  ;;  %v2629_v62 = vpack.c.bf16 %v2619_v53, %v2618_v16  ;;  %2565 = vst [vmem:[#allocation3 + $0x68] sm:$0xff] %v7038_v40  ;;  %v2590_v32 = vpack.c.bf16 %v7038_v40, %v7027_v48  ;;  %v5885_v3 = vld [vmem:[%s7543_s3 + $0x130] ss:$8 sps:$4 sm:$0xff]   ;;  %v5888_v6 = vld [vmem:[%s7543_s3 + $0x140] ss:$8 sps:$4 sm:$0xff]  }
 0x32a   : > { %v2407_v29 = vmax.f32 %v2343_v41, 0.0  ;;  %v5894_v23 = vld [vmem:[%s7543_s3 + $0x160] ss:$8 sps:$4 sm:$0xff]   ;;  %v3037_v12 = vld [vmem:[#allocation3 + $0x12] sm:$0xff]  ;;  %v5914_v35 = vld [vmem:[%s7543_s3 + $0x1c4] ss:$8 sps:$4 sm:$0xff]  }
 0x32b   : > { %v2439_v33 = vmax.f32 %v2405_v22, %v2406_v36  ;;  %v2408_v46 = vmax.f32 %v2344_v61, 0.0  ;;  %2812 = vmatmul.mubr.bf16.gmra.mrb[68].mxu1 %v2629_v62  ;;  %v3038_v48 = vld [vmem:[#allocation3 + $0x1a] sm:$0xff]  ;;  %v3040_v58 = vld [vmem:[#allocation3 + $0x2a] sm:$0xff]  ;;  %v3039_v20 = vld [vmem:[#allocation3 + $0x22] sm:$0xff] }
 0x32c   : > { %2821 = vmatprep.mubr.bf16.mxu1 %v7567_v2  ;;  %v5906_v38 = vld [vmem:[%s7543_s3 + $0x1a0] ss:$8 sps:$4 sm:$0xff]   ;;  %v3052_v34 = vpack.c.bf16 %v3038_v48, %v3037_v12  ;;  %v5911_v50 = vld [vmem:[%s7543_s3 + $0x1b4] ss:$8 sps:$4 sm:$0xff]   ;;  %v5909_v45 = vld [vmem:[%s7543_s3 + $0x1b0] ss:$8 sps:$4 sm:$0xff]   ;;  %v3053_v59 = vpack.c.bf16 %v3040_v58, %v3039_v20 }
 0x32d   : > { %2471 = vst [vmem:[#allocation2 + $0xf0] sm:$0xff] %v2439_v33  ;;  %v2440_v28 = vmax.f32 %v2407_v29, %v2408_v46  ;;  %v5912_v31 = vld [vmem:[%s7543_s3 + $0x1c0] ss:$8 sps:$4 sm:$0xff]   ;;  %v5917_v40 = vld [vmem:[%s7543_s3 + $0x1d4] ss:$8 sps:$4 sm:$0xff]  }
 0x32e   : > { %v2501_v14 = vld [vmem:[#allocation2 + $0xe0] ss:$2 sm:$0xff]  ;;  %v2533_v17 = vld [vmem:[#allocation2 + $0xe1] ss:$2 sm:$0xff]  ;;  %v5915_v22 = vld [vmem:[%s7543_s3 + $0x1d0] ss:$8 sps:$4 sm:$0xff]  }
 0x32f   : > { %2472 = vst [vmem:[#allocation2 + $0xf8] sm:$0xf] %v2440_v28  ;;  %v7046_v9 = vmax.f32 %v2501_v14, %v2533_v17  ;;  %v5920_v41 = vld [vmem:[%s7543_s3 + $0x1e4] ss:$8 sps:$4 sm:$0xff]   ;;  %v3042_v16 = vld [vmem:[#allocation3 + $0x3a] sm:$0xff]  ;;  %v3041_v53 = vld [vmem:[#allocation3 + $0x32] sm:$0xff] }
 0x330   : > { %v2620_v54 = vld [vmem:[#allocation3 + $0x61] sm:$0xff]  ;;  %v3054_v61 = vpack.c.bf16 %v3042_v16, %v3041_v53  ;;  %v5923_v62 = vld [vmem:[%s7543_s3 + $0x1f4] ss:$8 sps:$4 sm:$0xff]   ;;  %v3044_v33 = vld [vmem:[#allocation3 + $0x4a] sm:$0xff] }
 0x331   : > { %2566 = vst [vmem:[#allocation3 + $0x70] sm:$0xff] %v7046_v9  ;;  %v5918_v36 = vld [vmem:[%s7543_s3 + $0x1e0] ss:$8 sps:$4 sm:$0xff]   ;;  %v5926_v29 = vld [vmem:[%s7543_s3 + $0x204] ss:$8 sps:$4 sm:$0xff]   ;;  %v3045_v17 = vld [vmem:[#allocation3 + $0x52] sm:$0xff] }
 0x332   : > { %v3043_v46 = vld [vmem:[#allocation3 + $0x42] sm:$0xff]  ;;  %v3046_v14 = vld [vmem:[#allocation3 + $0x5a] sm:$0xff]  ;;  %v3572_v53 = vld [vmem:[#allocation3 + $0x2c] sm:$0xff] }
 0x333   : > { %v3055_v28 = vpack.c.bf16 %v3044_v33, %v3043_v46  ;;  %v3312_v48 = vld [vmem:[#allocation3 + $0x5b] sm:$0xff]  ;;  %v3311_v12 = vld [vmem:[#allocation3 + $0x53] sm:$0xff]  ;;  %v3575_v46 = vld [vmem:[#allocation3 + $0x44] sm:$0xff] }
 0x334   : > { %v3576_v33 = vld [vmem:[#allocation3 + $0x4c] sm:$0xff] }
 0x336   : > { %v2503_v15 = vld [vmem:[#allocation2 + $0xf0] ss:$2 sm:$0xff]  ;;  %v2535_v47 = vld [vmem:[#allocation2 + $0xf1] ss:$2 sm:$0xff] }
 0x337   : > { %v2551_v13 = vmax.f32 %v2503_v15, %v2535_v47  ;;  %v3047_v47 = vld [vmem:[#allocation3 + $0x62] sm:$0xff] }
 0x338   : > { %v2621_v19 = vld [vmem:[#allocation3 + $0x69] sm:$0xff] }
 0x339   : > { %v2630_v63 = vpack.c.bf16 %v2621_v19, %v2620_v54  ;;  %2567 = vst [vmem:[#allocation3 + $0x78] sm:$0xff] %v2551_v13  ;;  %v3048_v15 = vld [vmem:[#allocation3 + $0x6a] sm:$0xff] }
 0x33a   : > { %v3057_v13 = vpack.c.bf16 %v3048_v15, %v3047_v47  ;;  %v3580_v15 = vld [vmem:[#allocation3 + $0x6c] sm:$0xff]  ;;  %v3579_v47 = vld [vmem:[#allocation3 + $0x64] sm:$0xff] }
 0x33b   : > { %2822 = vmatmul.mubr.bf16.gmra.mrb[72].mxu1 %v2630_v63 }
 0x33c   : > { %2831 = vmatprep.mubr.bf16.mxu1 %v7567_v2 }
 0x340   : > { %v2622_v4 = vld [vmem:[#allocation3 + $0x71] sm:$0xff]  ;;  %v2623_v55 = vld [vmem:[#allocation3 + $0x79] sm:$0xf] }
 0x341   : > { %v2631_v7 = vpack.c.bf16 %v2623_v55, %v2622_v4  ;;  %v2583_v25 = vld [vmem:[#allocation3 + $0x78] sm:$0xf]  ;;  %v3302_v4 = vld [vmem:[#allocation3 + $0xb] sm:$0xff]  ;;  %v3301_v55 = vld [vmem:[#allocation3 + $0x3] sm:$0xff] }
 0x342   : > { %v2591_v42 = vpack.c.bf16 %v2583_v25, %v7046_v9  ;;  %v3056_v9 = vpack.c.bf16 %v3046_v14, %v3045_v17  ;;  %v3049_v54 = vld [vmem:[#allocation3 + $0x72] sm:$0xff]  ;;  %v3050_v19 = vld [vmem:[#allocation3 + $0x7a] sm:$0xf]  ;;  %v3317_v0 = vpack.c.bf16 %v3302_v4, %v3301_v55  ;;  %v5948_v4 = vld [vmem:[%s7545_s5 + $0x40] sm:$0xff]  }
 0x343   : > { %2832 = vmatmul.mubr.bf16.gmra.mrb[76].mxu1 %v2631_v7  ;;  %v3058_v63 = vpack.c.bf16 %v3050_v19, %v3049_v54  ;;  %v5924_v7 = vld [vmem:[%s7543_s3 + $0x200] ss:$8 sps:$4 sm:$0xff]   ;;  %v3316_v58 = vld [vmem:[#allocation3 + $0x7b] sm:$0xf] }
 0x344   : > { %2954 = vmatprep.mubr.bf16.mxu1 %v7567_v2  ;;  %v3308_v25 = vld [vmem:[#allocation3 + $0x3b] sm:$0xff] }
 0x345   : > { %v3578_v14 = vld [vmem:[#allocation3 + $0x5c] sm:$0xff]  ;;  %v3577_v17 = vld [vmem:[#allocation3 + $0x54] sm:$0xff] }
 0x346   : > { %v3581_v54 = vld [vmem:[#allocation3 + $0x74] sm:$0xff]  ;;  %v3582_v19 = vld [vmem:[#allocation3 + $0x7c] sm:$0xf]  ;;  %v5949_v55 = vld [vmem:[%s7545_s5] sm:$0xff]  }
 0x34b   : > { %2955 = vmatmul.mubr.bf16.vlgmr.msra.gmra.mrb[48].mxu1 %v2584_v49  ;;  %v5927_v49 = vld [vmem:[%s7543_s3 + $0x210] ss:$8 sps:$4 sm:$0xff]  }
 0x34c   : > { %3157 = vmatpush1.bf16.msra.mxu1 %v5876_v5  ;;  %2964 = vmatprep.mubr.bf16.mxu1 %v7567_v2  ;;  %v5929_v5 = vld [vmem:[%s7543_s3 + $0x214] ss:$8 sps:$4 sm:$0xff]  }
 0x34d   : > { %3158 = vmatprep.subr.bf16.mxu1 %v5881_v56  ;;  %v5932_v56 = vld [vmem:[%s7543_s3 + $0x224] ss:$8 sps:$4 sm:$0xff]  }
 0x350   : > { %3159 = vmatpush1.bf16.msra.mxu1 %v5879_v1  ;;  %v3304_v1 = vld [vmem:[#allocation3 + $0x1b] sm:$0xff] }
 0x351   : > { %3160 = vmatprep.subr.bf16.mxu1 %v5884_v21  ;;  %v3303_v21 = vld [vmem:[#allocation3 + $0x13] sm:$0xff] }
 0x353   : > { %2965 = vmatmul.mubr.bf16.gmra.mrb[52].mxu1 %v2585_v26  ;;  %v5896_v26 = vld [vmem:[%s7543_s3 + $0x164] ss:$8 sps:$4 sm:$0xff]  }
 0x354   : > { %2974 = vmatprep.mubr.bf16.mxu1 %v7567_v2  ;;  %3161 = vmatpush1.bf16.msra.mxu1 %v5882_v11  ;;  %v5930_v11 = vld [vmem:[%s7543_s3 + $0x220] ss:$8 sps:$4 sm:$0xff]  }
 0x355   : > { %3162 = vmatprep.subr.bf16.mxu1 %v5887_v43  ;;  %v3318_v43 = vpack.c.bf16 %v3304_v1, %v3303_v21  ;;  %v5956_v1 = vld [vmem:[%s7545_s5 + $0x60] sm:$0xff]  }
 0x356   : > { %v5957_v21 = vld [vmem:[%s7545_s5 + $0x20] sm:$0xff]  }
 0x358   : > { %3163 = vmatpush1.bf16.msra.mxu1 %v5885_v3  ;;  %v5935_v3 = vld [vmem:[%s7543_s3 + $0x234] ss:$8 sps:$4 sm:$0xff]  }
 0x359   : > { %3164 = vmatprep.subr.bf16.mxu1 %v5890_v57  ;;  %v5933_v57 = vld [vmem:[%s7543_s3 + $0x230] ss:$8 sps:$4 sm:$0xff]  }
 0x35b   : > { %2975 = vmatmul.mubr.bf16.gmra.mrb[56].mxu1 %v2586_v37  ;;  %v5902_v37 = vld [vmem:[%s7543_s3 + $0x184] ss:$8 sps:$4 sm:$0xff]  }
 0x35c   : > { %2984 = vmatprep.mubr.bf16.mxu1 %v7567_v2  ;;  %3165 = vmatpush1.bf16.msra.mxu1 %v5888_v6  ;;  %v5938_v6 = vld [vmem:[%s7543_s3 + $0x244] ss:$8 sps:$4 sm:$0xff]  }
 0x35d   : > { %3166 = vmatprep.subr.bf16.mxu1 %v5893_v8  ;;  %v3306_v8 = vld [vmem:[#allocation3 + $0x2b] sm:$0xff] }
 0x360   : > { %3167 = vmatpush1.bf16.msra.mxu1 %v5891_v10  ;;  %v3305_v10 = vld [vmem:[#allocation3 + $0x23] sm:$0xff] }
 0x361   : > { %3168 = vmatprep.subr.bf16.mxu1 %v5896_v26  ;;  %v5936_v26 = vld [vmem:[%s7543_s3 + $0x240] ss:$8 sps:$4 sm:$0xff]  }
 0x363   : > { %2985 = vmatmul.mubr.bf16.gmra.mrb[60].mxu1 %v2587_v44  ;;  %v3036_v44 = vld [vmem:[#allocation3 + $0xa] sm:$0xff] }
 0x364   : > { %2994 = vmatprep.mubr.bf16.mxu1 %v7567_v2  ;;  %3169 = vmatpush1.bf16.msra.mxu1 %v5894_v23  ;;  %v3319_v23 = vpack.c.bf16 %v3306_v8, %v3305_v10  ;;  %v5963_v8 = vld [vmem:[%s7545_s5 + $0x38] sm:$0xff]   ;;  %v5964_v10 = vld [vmem:[%s7545_s5 + $0xc0] sm:$0xff]  }
 0x365   : > { %3170 = vmatprep.subr.bf16.mxu1 %v5899_v24  ;;  %v5941_v24 = vld [vmem:[%s7543_s3 + $0x254] ss:$8 sps:$4 sm:$0xff]  }
 0x368   : > { %3171 = vmatpush1.bf16.msra.mxu1 %v5897_v30  ;;  %v5939_v30 = vld [vmem:[%s7543_s3 + $0x250] ss:$8 sps:$4 sm:$0xff]  }
 0x369   : > { %3422 = vmatprep.subr.bf16.mxu1 %v5902_v37  ;;  %v5944_v37 = vld [vmem:[%s7543_s3 + $0x264] ss:$8 sps:$4 sm:$0xff]  }
 0x36b   : > { %2995 = vmatmul.mubr.bf16.gmra.mrb[64].mxu1 %v2588_v52  ;;  %v3051_v52 = vpack.c.bf16 %v3036_v44, %v3035_v27  ;;  %v5942_v44 = vld [vmem:[%s7543_s3 + $0x260] ss:$8 sps:$4 sm:$0xff]  }
 0x36c   : > { %3004 = vmatprep.mubr.bf16.mxu1 %v7567_v2 }
 0x373   : > { %3005 = vmatmul.mubr.bf16.gmra.mrb[68].mxu1 %v2589_v60  ;;  %v5908_v60 = vld [vmem:[%s7543_s3 + $0x1a4] ss:$8 sps:$4 sm:$0xff]  }
 0x374   : > { %3014 = vmatprep.mubr.bf16.mxu1 %v7567_v2 }
 0x37b   : > { %3015 = vmatmul.mubr.bf16.gmra.mrb[72].mxu1 %v2590_v32  ;;  %v5921_v32 = vld [vmem:[%s7543_s3 + $0x1f0] ss:$8 sps:$4 sm:$0xff]  }
 0x37c   : > { %3024 = vmatprep.mubr.bf16.mxu1 %v7567_v2 }
 0x383   : > { %3025 = vmatmul.mubr.bf16.gmra.mrb[76].mxu1 %v2591_v42  ;;  %v3307_v42 = vld [vmem:[#allocation3 + $0x33] sm:$0xff] }
 0x384   : > { %3188 = vmatprep.mubr.bf16.mxu1 %v7567_v2  ;;  %v3320_v27 = vpack.c.bf16 %v3308_v25, %v3307_v42 }
 0x38b   : > { %3189 = vmatmul.mubr.bf16.vlgmr.msra.gmra.mrb[48].mxu1 %v3051_v52  ;;  %v5945_v52 = vld [vmem:[%s7543_s3 + $0x270] ss:$8 sps:$4 sm:$0xff]  }
 0x38c   : > { %3423 = vmatpush1.bf16.msra.mxu1 %v5900_v39  ;;  %3198 = vmatprep.mubr.bf16.mxu1 %v7567_v2  ;;  %v5947_v39 = vld [vmem:[%s7543_s3 + $0x274] ss:$8 sps:$4 sm:$0xff]  }
 0x38d   : > { %3424 = vmatprep.subr.bf16.mxu1 %v5905_v18  ;;  %v3310_v18 = vld [vmem:[#allocation3 + $0x4b] sm:$0xff] }
 0x390   : > { %3425 = vmatpush1.bf16.msra.mxu1 %v5903_v51  ;;  %v3309_v51 = vld [vmem:[#allocation3 + $0x43] sm:$0xff] }
 0x391   : > { %3426 = vmatprep.subr.bf16.mxu1 %v5908_v60  ;;  %v3321_v60 = vpack.c.bf16 %v3310_v18, %v3309_v51 }
 0x393   : > { %3199 = vmatmul.mubr.bf16.gmra.mrb[52].mxu1 %v3052_v34  ;;  %v3314_v34 = vld [vmem:[#allocation3 + $0x6b] sm:$0xff] }
 0x394   : > { %3208 = vmatprep.mubr.bf16.mxu1 %v7567_v2  ;;  %3427 = vmatpush1.bf16.msra.mxu1 %v5906_v38  ;;  %v3322_v38 = vpack.c.bf16 %v3312_v48, %v3311_v12 }
 0x395   : > { %3428 = vmatprep.subr.bf16.mxu1 %v5911_v50  ;;  %v3313_v50 = vld [vmem:[#allocation3 + $0x63] sm:$0xff] }
 0x398   : > { %3429 = vmatpush1.bf16.msra.mxu1 %v5909_v45  ;;  %v3323_v45 = vpack.c.bf16 %v3314_v34, %v3313_v50 }
 0x399   : > { %3430 = vmatprep.subr.bf16.mxu1 %v5914_v35  ;;  %v3315_v35 = vld [vmem:[#allocation3 + $0x73] sm:$0xff] }
 0x39a   : > { %v3324_v20 = vpack.c.bf16 %v3316_v58, %v3315_v35 }
 0x39b   : > { %3209 = vmatmul.mubr.bf16.gmra.mrb[56].mxu1 %v3053_v59  ;;  %v3567_v59 = vld [vmem:[#allocation3 + $0x4] sm:$0xff] }
 0x39c   : > { %3218 = vmatprep.mubr.bf16.mxu1 %v7567_v2  ;;  %3431 = vmatpush1.bf16.msra.mxu1 %v5912_v31  ;;  %v3568_v31 = vld [vmem:[#allocation3 + $0xc] sm:$0xff] }
 0x39d   : > { %3432 = vmatprep.subr.bf16.mxu1 %v5917_v40  ;;  %v3583_v40 = vpack.c.bf16 %v3568_v31, %v3567_v59 }
 0x3a0   : > { %3433 = vmatpush1.bf16.msra.mxu1 %v5915_v22  ;;  %v3570_v22 = vld [vmem:[#allocation3 + $0x1c] sm:$0xff] }
 0x3a1   : > { %3434 = vmatprep.subr.bf16.mxu1 %v5920_v41  ;;  %v3569_v41 = vld [vmem:[#allocation3 + $0x14] sm:$0xff] }
 0x3a2   : > { %v3584_v16 = vpack.c.bf16 %v3570_v22, %v3569_v41 }
 0x3a3   : > { %3219 = vmatmul.mubr.bf16.gmra.mrb[60].mxu1 %v3054_v61 }
 0x3a4   : > { %3228 = vmatprep.mubr.bf16.mxu1 %v7567_v2  ;;  %3435 = vmatpush1.bf16.msra.mxu1 %v5918_v36  ;;  %v3571_v36 = vld [vmem:[#allocation3 + $0x24] sm:$0xff] }
 0x3a5   : > { %3436 = vmatprep.subr.bf16.mxu1 %v5923_v62  ;;  %v3585_v61 = vpack.c.bf16 %v3572_v53, %v3571_v36  ;;  %v3574_v62 = vld [vmem:[#allocation3 + $0x3c] sm:$0xff] }
 0x3a8   : > { %3437 = vmatpush1.bf16.msra.mxu1 %v5921_v32  ;;  %v3573_v32 = vld [vmem:[#allocation3 + $0x34] sm:$0xff] }
 0x3a9   : > { %3688 = vmatprep.subr.bf16.mxu1 %v5926_v29  ;;  %v3586_v29 = vpack.c.bf16 %v3574_v62, %v3573_v32 }
 0x3ab   : > { %3229 = vmatmul.mubr.bf16.gmra.mrb[64].mxu1 %v3055_v28  ;;  %v3587_v28 = vpack.c.bf16 %v3576_v33, %v3575_v46 }
 0x3ac   : > { %3238 = vmatprep.mubr.bf16.mxu1 %v7567_v2 }
 0x3b3   : > { %3239 = vmatmul.mubr.bf16.gmra.mrb[68].mxu1 %v3056_v9  ;;  %v3588_v9 = vpack.c.bf16 %v3578_v14, %v3577_v17 }
 0x3b4   : > { %3248 = vmatprep.mubr.bf16.mxu1 %v7567_v2 }
 0x3bb   : > { %3249 = vmatmul.mubr.bf16.gmra.mrb[72].mxu1 %v3057_v13  ;;  %v3589_v13 = vpack.c.bf16 %v3580_v15, %v3579_v47 }
 0x3bc   : > { %3258 = vmatprep.mubr.bf16.mxu1 %v7567_v2 }
 0x3c3   : > { %3259 = vmatmul.mubr.bf16.gmra.mrb[76].mxu1 %v3058_v63  ;;  %v3590_v63 = vpack.c.bf16 %v3582_v19, %v3581_v54 }
 0x3c4   : > { %3454 = vmatprep.mubr.bf16.mxu1 %v7567_v2 }
 0x3cb   : > { %3455 = vmatmul.mubr.bf16.vlgmr.msra.gmra.mrb[48].mxu1 %v3317_v0  ;;  %v5952_v0 = vld [vmem:[%s7545_s5 + $0x50] sm:$0xff]  }
 0x3cc   : > { %3689 = vmatpush1.bf16.msra.mxu1 %v5924_v7  ;;  %3464 = vmatprep.mubr.bf16.mxu1 %v7567_v2  ;;  %v5950_v7 = vld [vmem:[%s7545_s5 + $0x48] sm:$0xff]  }
 0x3cd   : > { %3690 = vmatprep.subr.bf16.mxu1 %v5929_v5  ;;  %v5953_v5 = vld [vmem:[%s7545_s5 + $0x10] sm:$0xff]  }
 0x3d0   : > { %3691 = vmatpush1.bf16.msra.mxu1 %v5927_v49  ;;  %v5954_v49 = vld [vmem:[%s7545_s5 + $0x58] sm:$0xff]  }
 0x3d1   : > { %3692 = vmatprep.subr.bf16.mxu1 %v5932_v56  ;;  %v5955_v56 = vld [vmem:[%s7545_s5 + $0x18] sm:$0xff]  }
 0x3d3   : > { %3465 = vmatmul.mubr.bf16.gmra.mrb[52].mxu1 %v3318_v43  ;;  %v5959_v43 = vld [vmem:[%s7545_s5 + $0x28] sm:$0xff]  }
 0x3d4   : > { %3474 = vmatprep.mubr.bf16.mxu1 %v7567_v2  ;;  %3693 = vmatpush1.bf16.msra.mxu1 %v5930_v11  ;;  %v5958_v11 = vld [vmem:[%s7545_s5 + $0x68] sm:$0xff]  }
 0x3d5   : > { %3694 = vmatprep.subr.bf16.mxu1 %v5935_v3  ;;  %v5960_v3 = vld [vmem:[%s7545_s5 + $0x70] sm:$0xff]  }
 0x3d8   : > { %3695 = vmatpush1.bf16.msra.mxu1 %v5933_v57  ;;  %v5961_v57 = vld [vmem:[%s7545_s5 + $0x30] sm:$0xff]  }
 0x3d9   : > { %3696 = vmatprep.subr.bf16.mxu1 %v5938_v6  ;;  %v5962_v6 = vld [vmem:[%s7545_s5 + $0x78] sm:$0xff]  }
 0x3db   : > { %3475 = vmatmul.mubr.bf16.gmra.mrb[56].mxu1 %v3319_v23  ;;  %v7573_v23 = vld [vmem:[#allocation10_spill] sm:$0xff] }
 0x3dc   : > { %3484 = vmatprep.mubr.bf16.mxu1 %v7567_v2  ;;  %3697 = vmatpush1.bf16.msra.mxu1 %v5936_v26  ;;  %v3833_v26 = vld [vmem:[%s7544_s4] sm:$0x3] }
 0x3dd   : > { %3698 = vmatprep.subr.bf16.mxu1 %v5941_v24  ;;  %v7574_v24 = vsub.s32 0, %v7573_v23 }
 0x3e0   : > { %3699 = vmatpush1.bf16.msra.mxu1 %v5939_v30  ;;  %v7299_v30 = vrot.slane %v3833_v26, %v7574_v24 }
 0x3e1   : > { %3700 = vmatprep.subr.bf16.mxu1 %v5944_v37  ;;  %v7575_v37 = vsub.s32 1, %v7573_v23 }
 0x3e3   : > { %3485 = vmatmul.mubr.bf16.gmra.mrb[60].mxu1 %v3320_v27  ;;  %v7303_v25 = vrot.slane %v3833_v26, %v7575_v37 }
 0x3e4   : > { %3494 = vmatprep.mubr.bf16.mxu1 %v7567_v2  ;;  %3701 = vmatpush1.bf16.msra.mxu1 %v5942_v44 }
 0x3e5   : > { %3702 = vmatprep.subr.bf16.mxu1 %v5947_v39 }
 0x3e8   : > { %3703 = vmatpush1.bf16.msra.mxu1 %v5945_v52 }
 0x3e9   : > { %5135 = vmatprep.subr.bf16.mxu1 %v5948_v4 }
 0x3eb   : > { %3495 = vmatmul.mubr.bf16.gmra.mrb[64].mxu1 %v3321_v60 }
 0x3ec   : > { %3504 = vmatprep.mubr.bf16.mxu1 %v7567_v2 }
 0x3f3   : > { %3505 = vmatmul.mubr.bf16.gmra.mrb[68].mxu1 %v3322_v38 }
 0x3f4   : > { %3514 = vmatprep.mubr.bf16.mxu1 %v7567_v2 }
 0x3fb   : > { %3515 = vmatmul.mubr.bf16.gmra.mrb[72].mxu1 %v3323_v45 }
 0x3fc   : > { %3524 = vmatprep.mubr.bf16.mxu1 %v7567_v2 }
 0x403   : > { %3525 = vmatmul.mubr.bf16.gmra.mrb[76].mxu1 %v3324_v20 }
 0x404   : > { %3720 = vmatprep.mubr.bf16.mxu1 %v7567_v2 }
 0x40b   : > { %3721 = vmatmul.mubr.bf16.vlgmr.msra.gmra.mrb[48].mxu1 %v3583_v40 }
 0x40c   : > { %3730 = vmatprep.mubr.bf16.mxu1 %v7567_v2  ;;  %5136 = vmatpush3.bf16.msra.mxu1 %v5949_v55 }
 0x40d   : > { %5137 = vmatprep.subr.bf16.mxu1 %v5950_v7 }
 0x413   : > { %3731 = vmatmul.mubr.bf16.gmra.mrb[52].mxu1 %v3584_v16 }
 0x414   : > { %3740 = vmatprep.mubr.bf16.mxu1 %v7567_v2 }
 0x41b   : > { %3741 = vmatmul.mubr.bf16.gmra.mrb[56].mxu1 %v3585_v61 }
 0x41c   : > { %3750 = vmatprep.mubr.bf16.mxu1 %v7567_v2 }
 0x423   : > { %3751 = vmatmul.mubr.bf16.gmra.mrb[60].mxu1 %v3586_v29 }
 0x424   : > { %3760 = vmatprep.mubr.bf16.mxu1 %v7567_v2 }
 0x42b   : > { %3761 = vmatmul.mubr.bf16.gmra.mrb[64].mxu1 %v3587_v28 }
 0x42c   : > { %3770 = vmatprep.mubr.bf16.mxu1 %v7567_v2 }
 0x433   : > { %3771 = vmatmul.mubr.bf16.gmra.mrb[68].mxu1 %v3588_v9 }
 0x434   : > { %3780 = vmatprep.mubr.bf16.mxu1 %v7567_v2 }
 0x43b   : > { %3781 = vmatmul.mubr.bf16.gmra.mrb[72].mxu1 %v3589_v13 }
 0x43c   : > { %3790 = vmatprep.mubr.bf16.mxu1 %v7567_v2  ;;  %v5951_v2 = vld [vmem:[%s7545_s5 + $0x8] sm:$0xff]  }
 0x43d   : > { %5138 = vmatpush3.bf16.msra.mxu1 %v5951_v2 }
 0x43e   : > { %5139 = vmatprep.subr.bf16.mxu1 %v5952_v0 }
 0x441   : > { %5140 = vmatpush3.bf16.msra.mxu1 %v5953_v5 }
 0x442   : > { %5141 = vmatprep.subr.bf16.mxu1 %v5954_v49 }
 0x443   : > { %3791 = vmatmul.mubr.bf16.gmra.mrb[76].mxu1 %v3590_v63 }
 0x445   : > { %5142 = vmatpush3.bf16.msra.mxu1 %v5955_v56 }
 0x446   : > { %5143 = vmatprep.subr.bf16.mxu1 %v5956_v1 }
 0x449   : > { %5144 = vmatpush3.bf16.msra.mxu1 %v5957_v21 }
 0x44a   : > { %5145 = vmatprep.subr.bf16.mxu1 %v5958_v11 }
 0x44d   : > { %5146 = vmatpush3.bf16.msra.mxu1 %v5959_v43 }
 0x44e   : > { %5147 = vmatprep.subr.bf16.mxu1 %v5960_v3 }
 0x451   : > { %5148 = vmatpush3.bf16.msra.mxu1 %v5961_v57 }
 0x452   : > { %5149 = vmatprep.subr.bf16.mxu1 %v5962_v6 }
 0x455   : > { %5150 = vmatpush3.bf16.msra.mxu1 %v5963_v8 }
 0x456   : > { %5157 = vmatprep.subr.bf16.mxu1 %v5964_v10 }
 0x4de   : > { %v3722_v42 = vpop.f32.mrb[48].mxu1 }
 0x4df   : > { %v3845_v44 = vadd.f32 %v7299_v30, %v3722_v42  ;;  %v3724_v27 = vpop.f32.mrb[49].mxu1 }
 0x4e0   : > { %v3846_v39 = vadd.f32 %v7303_v25, %v3724_v27  ;;  %v3726_v52 = vpop.f32.mrb[50].mxu1 }
 0x4e1   : > { %v3877_v18 = vmax.f32 %v3845_v44, 0.0  ;;  %v3847_v51 = vadd.f32 %v7299_v30, %v3726_v52  ;;  %v3728_v60 = vpop.f32.mrb[51].mxu1 }
 0x4e2   : > { %v3878_v48 = vmax.f32 %v3846_v39, 0.0  ;;  %v3848_v12 = vadd.f32 %v7303_v25, %v3728_v60 }
 0x4e3   : > { %v3879_v38 = vmax.f32 %v3847_v51, 0.0 }
 0x4e4   : > { %v3909_v34 = vmax.f32 %v3877_v18, %v3878_v48  ;;  %v3880_v50 = vmax.f32 %v3848_v12, 0.0 }
 0x4e6   : > { %3925 = vst [vmem:[#allocation4] sm:$0xff] %v3909_v34  ;;  %v3910_v45 = vmax.f32 %v3879_v38, %v3880_v50  ;;  %v3732_v35 = vpop.f32.mrb[52].mxu1 }
 0x4e7   : > { %v3849_v58 = vadd.f32 %v7299_v30, %v3732_v35  ;;  %v3734_v20 = vpop.f32.mrb[53].mxu1 }
 0x4e8   : > { %3926 = vst [vmem:[#allocation4 + $0x8] sm:$0xff] %v3910_v45  ;;  %v3850_v31 = vadd.f32 %v7303_v25, %v3734_v20  ;;  %v3736_v59 = vpop.f32.mrb[54].mxu1 }
 0x4e9   : > { %v3881_v40 = vmax.f32 %v3849_v58, 0.0  ;;  %v3851_v22 = vadd.f32 %v7299_v30, %v3736_v59  ;;  %v3738_v41 = vpop.f32.mrb[55].mxu1 }
 0x4ea   : > { %v3882_v16 = vmax.f32 %v3850_v31, 0.0  ;;  %v3852_v53 = vadd.f32 %v7303_v25, %v3738_v41 }
 0x4eb   : > { %v3883_v36 = vmax.f32 %v3851_v22, 0.0 }
 0x4ec   : > { %v3911_v61 = vmax.f32 %v3881_v40, %v3882_v16  ;;  %v3884_v62 = vmax.f32 %v3852_v53, 0.0 }
 0x4ee   : > { %3927 = vst [vmem:[#allocation4 + $0x10] sm:$0xff] %v3911_v61  ;;  %v3912_v32 = vmax.f32 %v3883_v36, %v3884_v62  ;;  %v3742_v29 = vpop.f32.mrb[56].mxu1 }
 0x4ef   : > { %v3853_v33 = vadd.f32 %v7299_v30, %v3742_v29  ;;  %v3744_v46 = vpop.f32.mrb[57].mxu1 }
 0x4f0   : > { %3928 = vst [vmem:[#allocation4 + $0x18] sm:$0xff] %v3912_v32  ;;  %v3854_v28 = vadd.f32 %v7303_v25, %v3744_v46  ;;  %v3746_v14 = vpop.f32.mrb[58].mxu1 }
 0x4f1   : > { %v3885_v17 = vmax.f32 %v3853_v33, 0.0  ;;  %v3855_v9 = vadd.f32 %v7299_v30, %v3746_v14  ;;  %v3748_v15 = vpop.f32.mrb[59].mxu1 }
 0x4f2   : > { %v3886_v47 = vmax.f32 %v3854_v28, 0.0  ;;  %v3856_v13 = vadd.f32 %v7303_v25, %v3748_v15 }
 0x4f3   : > { %v3887_v54 = vmax.f32 %v3855_v9, 0.0 }
 0x4f4   : > { %v3913_v19 = vmax.f32 %v3885_v17, %v3886_v47  ;;  %v3888_v63 = vmax.f32 %v3856_v13, 0.0 }
 0x4f6   : > { %3929 = vst [vmem:[#allocation4 + $0x20] sm:$0xff] %v3913_v19  ;;  %v3914_v4 = vmax.f32 %v3887_v54, %v3888_v63  ;;  %v3752_v55 = vpop.f32.mrb[60].mxu1 }
 0x4f7   : > { %v3857_v7 = vadd.f32 %v7299_v30, %v3752_v55  ;;  %v3754_v2 = vpop.f32.mrb[61].mxu1 }
 0x4f8   : > { %3930 = vst [vmem:[#allocation4 + $0x28] sm:$0xff] %v3914_v4  ;;  %v3858_v0 = vadd.f32 %v7303_v25, %v3754_v2  ;;  %v3756_v5 = vpop.f32.mrb[62].mxu1 }
 0x4f9   : > { %v3889_v49 = vmax.f32 %v3857_v7, 0.0  ;;  %v3859_v56 = vadd.f32 %v7299_v30, %v3756_v5  ;;  %v3758_v1 = vpop.f32.mrb[63].mxu1 }
 0x4fa   : > { %v3890_v21 = vmax.f32 %v3858_v0, 0.0  ;;  %v3860_v11 = vadd.f32 %v7303_v25, %v3758_v1 }
 0x4fb   : > { %v3891_v43 = vmax.f32 %v3859_v56, 0.0 }
 0x4fc   : > { %v3915_v3 = vmax.f32 %v3889_v49, %v3890_v21  ;;  %v3892_v57 = vmax.f32 %v3860_v11, 0.0 }
 0x4fe   : > { %3931 = vst [vmem:[#allocation4 + $0x30] sm:$0xff] %v3915_v3  ;;  %v3916_v6 = vmax.f32 %v3891_v43, %v3892_v57  ;;  %v3762_v8 = vpop.f32.mrb[64].mxu1  ;;  %v3958_v43 = vld [vmem:[#allocation4 + $0x2] ss:$16 sm:$0x3] }
 0x4ff   : > { %v3861_v10 = vadd.f32 %v7299_v30, %v3762_v8  ;;  %v3764_v26 = vpop.f32.mrb[65].mxu1  ;;  %v3966_v3 = vld [vmem:[#allocation4 + $0x3] ss:$16 sm:$0x3] }
 0x500   : > { %3932 = vst [vmem:[#allocation4 + $0x38] sm:$0xff] %v3916_v6  ;;  %v3862_v23 = vadd.f32 %v7303_v25, %v3764_v26  ;;  %v3766_v24 = vpop.f32.mrb[66].mxu1  ;;  %v3941_v8 = vld [vmem:[#allocation4] ss:$16 sm:$0x3] }
 0x501   : > { %v3893_v37 = vmax.f32 %v3861_v10, 0.0  ;;  %v3863_v42 = vadd.f32 %v7299_v30, %v3766_v24  ;;  %v3768_v44 = vpop.f32.mrb[67].mxu1  ;;  %v3949_v10 = vld [vmem:[#allocation4 + $0x1] ss:$16 sm:$0x3] }
 0x502   : > { %v3894_v27 = vmax.f32 %v3862_v23, 0.0  ;;  %v3864_v39 = vadd.f32 %v7303_v25, %v3768_v44 }
 0x503   : > { %v3895_v52 = vmax.f32 %v3863_v42, 0.0 }
 0x504   : > { %v3917_v18 = vmax.f32 %v3893_v37, %v3894_v27  ;;  %v3896_v51 = vmax.f32 %v3864_v39, 0.0  ;;  %v3992_v37 = vld [vmem:[#allocation4 + $0x6] ss:$16 sm:$0x3] }
 0x505   : > { %v3959_v21 = vld [vmem:[#allocation4 + $0x2] ss:$16 sm:$0xc]  ;;  %v3967_v11 = vld [vmem:[#allocation4 + $0x3] ss:$16 sm:$0xc] }
 0x506   : > { %3933 = vst [vmem:[#allocation4 + $0x40] sm:$0xff] %v3917_v18  ;;  %v3918_v60 = vmax.f32 %v3895_v52, %v3896_v51  ;;  %v3772_v48 = vpop.f32.mrb[68].mxu1  ;;  %v3942_v57 = vld [vmem:[#allocation4] ss:$16 sm:$0xc]  ;;  %v3960_v42 = vor.u32 %v3959_v21, %v3958_v43  ;;  %v3968_v44 = vor.u32 %v3967_v11, %v3966_v3 }
 0x507   : > { %v3865_v12 = vadd.f32 %v7299_v30, %v3772_v48  ;;  %v3774_v38 = vpop.f32.mrb[69].mxu1  ;;  %v3950_v6 = vld [vmem:[#allocation4 + $0x1] ss:$16 sm:$0xc]  ;;  %v3943_v52 = vor.u32 %v3942_v57, %v3941_v8 }
 0x508   : > { %3934 = vst [vmem:[#allocation4 + $0x48] sm:$0xff] %v3918_v60  ;;  %v3866_v34 = vadd.f32 %v7303_v25, %v3774_v38  ;;  %v3776_v50 = vpop.f32.mrb[70].mxu1  ;;  %v3993_v26 = vld [vmem:[#allocation4 + $0x6] ss:$16 sm:$0xc]  ;;  %v3951_v18 = vor.u32 %v3950_v6, %v3949_v10 }
 0x509   : > { %v3897_v45 = vmax.f32 %v3865_v12, 0.0  ;;  %v3867_v35 = vadd.f32 %v7299_v30, %v3776_v50  ;;  %v3778_v58 = vpop.f32.mrb[71].mxu1  ;;  %v3994_v38 = vor.u32 %v3993_v26, %v3992_v37  ;;  %v5976_v11 = vld [vmem:[%s7545_s5 + $0xf0] sm:$0xff]   ;;  %v5979_v37 = vld [vmem:[%s7545_s5 + $0xb8] sm:$0xff]  }
 0x50a   : > { %v3898_v20 = vmax.f32 %v3866_v34, 0.0  ;;  %v3868_v31 = vadd.f32 %v7303_v25, %v3778_v58  ;;  %v5977_v26 = vld [vmem:[%s7545_s5 + $0xb0] sm:$0xff]  }
 0x50b   : > { %v3899_v59 = vmax.f32 %v3867_v35, 0.0 }
 0x50c   : > { %v3919_v40 = vmax.f32 %v3897_v45, %v3898_v20  ;;  %v3900_v22 = vmax.f32 %v3868_v31, 0.0 }
 0x50e   : > { %3935 = vst [vmem:[#allocation4 + $0x50] sm:$0xff] %v3919_v40  ;;  %v3920_v41 = vmax.f32 %v3899_v59, %v3900_v22  ;;  %v3782_v16 = vpop.f32.mrb[72].mxu1 }
 0x50f   : > { %v3869_v53 = vadd.f32 %v7299_v30, %v3782_v16  ;;  %v3784_v36 = vpop.f32.mrb[73].mxu1 }
 0x510   : > { %3936 = vst [vmem:[#allocation4 + $0x58] sm:$0xff] %v3920_v41  ;;  %v3870_v61 = vadd.f32 %v7303_v25, %v3784_v36  ;;  %v3786_v62 = vpop.f32.mrb[74].mxu1 }
 0x511   : > { %v3901_v32 = vmax.f32 %v3869_v53, 0.0  ;;  %v3871_v29 = vadd.f32 %v7299_v30, %v3786_v62  ;;  %v3788_v33 = vpop.f32.mrb[75].mxu1 }
 0x512   : > { %v3902_v46 = vmax.f32 %v3870_v61, 0.0  ;;  %v3872_v28 = vadd.f32 %v7303_v25, %v3788_v33 }
 0x513   : > { %v3903_v14 = vmax.f32 %v3871_v29, 0.0 }
 0x514   : > { %v3921_v17 = vmax.f32 %v3901_v32, %v3902_v46  ;;  %v3904_v9 = vmax.f32 %v3872_v28, 0.0  ;;  %v5965_v28 = vld [vmem:[%s7545_s5 + $0x80] sm:$0xff]  }
 0x515   : > { %v3961_v23 = vld [vmem:[#allocation4 + $0x2] ss:$16 sm:$0x30]  ;;  %v3969_v24 = vld [vmem:[#allocation4 + $0x3] ss:$16 sm:$0x30] }
 0x516   : > { %3937 = vst [vmem:[#allocation4 + $0x60] sm:$0xff] %v3921_v17  ;;  %v3922_v15 = vmax.f32 %v3903_v14, %v3904_v9  ;;  %v3792_v47 = vpop.f32.mrb[76].mxu1  ;;  %v3944_v27 = vld [vmem:[#allocation4] ss:$16 sm:$0x30]  ;;  %v3962_v48 = vor.u32 %v3961_v23, %v3960_v42  ;;  %v3970_v12 = vor.u32 %v3969_v24, %v3968_v44  ;;  %v5966_v9 = vld [vmem:[%s7545_s5 + $0xc8] sm:$0xff]  }
 0x517   : > { %v3873_v13 = vadd.f32 %v7299_v30, %v3792_v47  ;;  %v3794_v54 = vpop.f32.mrb[77].mxu1  ;;  %v3952_v39 = vld [vmem:[#allocation4 + $0x1] ss:$16 sm:$0x30]  ;;  %v3945_v35 = vor.u32 %v3944_v27, %v3943_v52  ;;  %v5967_v47 = vld [vmem:[%s7545_s5 + $0x88] sm:$0xff]   ;;  %v6069_v27 = vmov 0.0  }
 0x518   : > { %3938 = vst [vmem:[#allocation4 + $0x68] sm:$0xff] %v3922_v15  ;;  %v3874_v19 = vadd.f32 %v7303_v25, %v3794_v54  ;;  %v3796_v63 = vpop.f32.mrb[78].mxu1  ;;  %v3995_v51 = vld [vmem:[#allocation4 + $0x6] ss:$16 sm:$0x30]  ;;  %v3953_v58 = vor.u32 %v3952_v39, %v3951_v18  ;;  %v5981_v39 = vld [vmem:[%s7545_s5 + $0x108] sm:$0xff]  }
 0x519   : > { %v3905_v4 = vmax.f32 %v3873_v13, 0.0  ;;  %v3875_v55 = vadd.f32 %v7299_v30, %v3796_v63  ;;  %v3798_v7 = vpop.f32.mrb[79].mxu1  ;;  %v4001_v30 = vld [vmem:[#allocation4 + $0x7] ss:$16 sm:$0xc]  ;;  %v3996_v22 = vor.u32 %v3995_v51, %v3994_v38  ;;  %v5971_v63 = vld [vmem:[%s7545_s5 + $0x98] sm:$0xff]  }
 0x51a   : > { %v3906_v2 = vmax.f32 %v3874_v19, 0.0  ;;  %v3876_v0 = vadd.f32 %v7303_v25, %v3798_v7  ;;  %v4000_v25 = vld [vmem:[#allocation4 + $0x7] ss:$16 sm:$0x3]  ;;  %v5970_v19 = vld [vmem:[%s7545_s5 + $0xd8] sm:$0xff]   ;;  %v5974_v7 = vld [vmem:[%s7545_s5 + $0xe8] sm:$0xff]  }
 0x51b   : > { %v3907_v5 = vmax.f32 %v3875_v55, 0.0  ;;  %v4003_v60 = vld [vmem:[#allocation4 + $0x7] ss:$16 sm:$0x30]  ;;  %v4002_v34 = vor.u32 %v4001_v30, %v4000_v25  ;;  %v5978_v30 = vld [vmem:[%s7545_s5 + $0xf8] sm:$0xff]  }
 0x51c   : > { %v3923_v49 = vmax.f32 %v3905_v4, %v3906_v2  ;;  %v3908_v56 = vmax.f32 %v3876_v0, 0.0  ;;  %v5968_v13 = vld [vmem:[%s7545_s5 + $0xd0] sm:$0xff]   ;;  %v5972_v4 = vld [vmem:[%s7545_s5 + $0xe0] sm:$0xff]   ;;  %v5975_v2 = vld [vmem:[%s7545_s5 + $0xa8] sm:$0xff]  }
 0x51d   : > { %v4004_v41 = vor.u32 %v4003_v60, %v4002_v34  ;;  %v5969_v54 = vld [vmem:[%s7545_s5 + $0x90] sm:$0xff]   ;;  %v5973_v55 = vld [vmem:[%s7545_s5 + $0xa0] sm:$0xff]   ;;  %v5983_v18 = vld [vmem:[%s7545_s5 + $0x118] sm:$0xff]  }
 0x51e   : > { %3939 = vst [vmem:[#allocation4 + $0x70] sm:$0xff] %v3923_v49  ;;  %v3924_v1 = vmax.f32 %v3907_v5, %v3908_v56  ;;  %v3976_v0 = vld [vmem:[#allocation4 + $0x4] ss:$16 sm:$0xc]  ;;  %v5985_v60 = vld [vmem:[%s7545_s5 + $0x128] sm:$0xff]  }
 0x51f   : > { %v3984_v5 = vld [vmem:[#allocation4 + $0x5] ss:$16 sm:$0xc]  ;;  %v3975_v49 = vld [vmem:[#allocation4 + $0x4] ss:$16 sm:$0x3] }
 0x520   : > { %3940 = vst [vmem:[#allocation4 + $0x78] sm:$0xf] %v3924_v1  ;;  %v3983_v56 = vld [vmem:[#allocation4 + $0x5] ss:$16 sm:$0x3]  ;;  %v3977_v43 = vor.u32 %v3976_v0, %v3975_v49 }
 0x521   : > { %v3978_v1 = vld [vmem:[#allocation4 + $0x4] ss:$16 sm:$0x30]  ;;  %v3986_v21 = vld [vmem:[#allocation4 + $0x5] ss:$16 sm:$0x30]  ;;  %v3985_v3 = vor.u32 %v3984_v5, %v3983_v56 }
 0x522   : > { %v3979_v8 = vor.u32 %v3978_v1, %v3977_v43  ;;  %v5980_v42 = vld [vmem:[%s7545_s5 + $0x100] sm:$0xff]   ;;  %v5982_v52 = vld [vmem:[%s7545_s5 + $0x110] sm:$0xff]   ;;  %v4009_v38 = vld [vmem:[#allocation4 + $0x8] ss:$16 sm:$0x3] }
 0x523   : > { %v3987_v10 = vor.u32 %v3986_v21, %v3985_v3  ;;  %v5984_v51 = vld [vmem:[%s7545_s5 + $0x120] sm:$0xff]   ;;  %v4017_v34 = vld [vmem:[#allocation4 + $0x9] ss:$16 sm:$0x3] }
 0x524   : > { %v5996_v3 = vld [vmem:[%s7549_s9] sm:$0xff]  }
 0x525   : > { %v3963_v50 = vld [vmem:[#allocation4 + $0x2] ss:$16 sm:$0xc0]  ;;  %v3971_v45 = vld [vmem:[#allocation4 + $0x3] ss:$16 sm:$0xc0] }
 0x526   : > { %v3964_v20 = vor.u32 %v3963_v50, %v3962_v48  ;;  %v3972_v31 = vor.u32 %v3971_v45, %v3970_v12  ;;  %v3946_v59 = vld [vmem:[#allocation4] ss:$16 sm:$0xc0]  ;;  %v3954_v40 = vld [vmem:[#allocation4 + $0x1] ss:$16 sm:$0xc0] }
 0x527   : > { %v3947_v16 = vor.u32 %v3946_v59, %v3945_v35  ;;  %v3955_v53 = vor.u32 %v3954_v40, %v3953_v58  ;;  %v3997_v36 = vld [vmem:[#allocation4 + $0x6] ss:$16 sm:$0xc0]  ;;  %v4005_v61 = vld [vmem:[#allocation4 + $0x7] ss:$16 sm:$0xc0] }
 0x528   : > { %v3973_v62 = vmax.f32 %v3964_v20, %v3972_v31  ;;  %v3998_v32 = vor.u32 %v3997_v36, %v3996_v22  ;;  %v4006_v29 = vor.u32 %v4005_v61, %v4004_v41  ;;  %v3980_v57 = vld [vmem:[#allocation4 + $0x4] ss:$16 sm:$0xc0]  ;;  %v3988_v6 = vld [vmem:[#allocation4 + $0x5] ss:$16 sm:$0xc0] }
 0x529   : > { %v3956_v33 = vmax.f32 %v3947_v16, %v3955_v53  ;;  %v3981_v23 = vor.u32 %v3980_v57, %v3979_v8  ;;  %v3989_v24 = vor.u32 %v3988_v6, %v3987_v10  ;;  %v4010_v48 = vld [vmem:[#allocation4 + $0x8] ss:$16 sm:$0xc]  ;;  %v4018_v12 = vld [vmem:[#allocation4 + $0x9] ss:$16 sm:$0xc] }
 0x52a   : > { %v4026_v46 = vpack.c.bf16 %v3973_v62, %v3973_v62  ;;  %v4007_v14 = vmax.f32 %v3998_v32, %v4006_v29  ;;  %v4012_v50 = vld [vmem:[#allocation4 + $0x8] ss:$16 sm:$0x30]  ;;  %v4020_v45 = vld [vmem:[#allocation4 + $0x9] ss:$16 sm:$0x30]  ;;  %v4011_v35 = vor.u32 %v4010_v48, %v4009_v38  ;;  %v4019_v58 = vor.u32 %v4018_v12, %v4017_v34 }
 0x52b   : > { %v4025_v17 = vpack.c.bf16 %v3956_v33, %v3956_v33  ;;  %v3990_v25 = vmax.f32 %v3981_v23, %v3989_v24  ;;  %v4014_v20 = vld [vmem:[#allocation4 + $0x8] ss:$16 sm:$0xc0]  ;;  %v4022_v31 = vld [vmem:[#allocation4 + $0x9] ss:$16 sm:$0xc0] }
 0x52c   : > { %4389 = vmatprep.mubr.bf16.mxu1 %v4026_v46  ;;  %v4028_v15 = vpack.c.bf16 %v4007_v14, %v4007_v14  ;;  %v4013_v59 = vor.u32 %v4012_v50, %v4011_v35  ;;  %v4021_v40 = vor.u32 %v4020_v45, %v4019_v58  ;;  %v5986_v22 = vld [vmem:[%s7545_s5 + $0x130] sm:$0xff]   ;;  %v5987_v53 = vld [vmem:[%s7545_s5 + $0x138] sm:$0xff]   ;;  %v5988_v62 = vld [vmem:[%s7547_s7] sm:$0xff]  }
 0x52d   : > { %4390 = vmatmul.mubr.bf16.vlgmr.msra.gmra.mrb[80].mxu1 %v4025_v17  ;;  %v4027_v44 = vpack.c.bf16 %v3990_v25, %v3990_v25  ;;  %v5989_v32 = vld [vmem:[%s7547_s7 + $0x8] sm:$0xff]   ;;  %v5990_v29 = vld [vmem:[%s7547_s7 + $0x10] sm:$0xff]   ;;  %v5991_v33 = vld [vmem:[%s7547_s7 + $0x18] sm:$0xff]  }
 0x52e   : > { %5158 = vmatpush3.bf16.msra.mxu1 %v5965_v28  ;;  %4429 = vmatprep.mubr.bf16.mxu1 %v4028_v15  ;;  %v4015_v41 = vor.u32 %v4014_v20, %v4013_v59  ;;  %v4023_v16 = vor.u32 %v4022_v31, %v4021_v40  ;;  %v5992_v46 = vld [vmem:[%s7547_s7 + $0x20] sm:$0xff]   ;;  %v5993_v28 = vld [vmem:[%s7547_s7 + $0x28] sm:$0xff]   ;;  %v5994_v14 = vld [vmem:[%s7547_s7 + $0x30] sm:$0xff]  }
 0x52f   : > { %5159 = vmatprep.subr.bf16.mxu1 %v5966_v9  ;;  %v5995_v17 = vld [vmem:[%s7547_s7 + $0x38] sm:$0xff]   ;;  %v5997_v6 = vld [vmem:[%s7549_s9 + $0x8] sm:$0xff]   ;;  %v5998_v8 = vld [vmem:[%s7549_s9 + $0x10] sm:$0xff]  }
 0x530   : > { %v4024_v36 = vmax.f32 %v4015_v41, %v4023_v16  ;;  %v5999_v10 = vld [vmem:[%s7549_s9 + $0x18] sm:$0xff]   ;;  %v6002_v23 = vld [vmem:[%s7549_s9 + $0x30] sm:$0xff]  }
 0x531   : > { %v6003_v24 = vld [vmem:[%s7549_s9 + $0x38] sm:$0xff]  }
 0x532   : > { %5160 = vmatpush3.bf16.msra.mxu1 %v5967_v47  ;;  %v4029_v61 = vpack.c.bf16 %v4024_v36, %v4024_v36 }
 0x533   : > { %5161 = vmatprep.subr.bf16.mxu1 %v5968_v13 }
 0x536   : > { %5162 = vmatpush3.bf16.msra.mxu1 %v5969_v54 }
 0x537   : > { %5163 = vmatprep.subr.bf16.mxu1 %v5970_v19  ;;  %v5072_v19 = vld [vmem:[%s7546_s6] ss:$0 sm:$0xff] }
 0x53a   : > { %5164 = vmatpush3.bf16.msra.mxu1 %v5971_v63 }
 0x53b   : > { %5165 = vmatprep.subr.bf16.mxu1 %v5972_v4 }
 0x53e   : > { %5166 = vmatpush3.bf16.msra.mxu1 %v5973_v55 }
 0x53f   : > { %5167 = vmatprep.subr.bf16.mxu1 %v5974_v7 }
 0x542   : > { %5168 = vmatpush3.bf16.msra.mxu1 %v5975_v2 }
 0x543   : > { %5169 = vmatprep.subr.bf16.mxu1 %v5976_v11 }
 0x546   : > { %5170 = vmatpush3.bf16.msra.mxu1 %v5977_v26  ;;  %v6000_v26 = vld [vmem:[%s7549_s9 + $0x20] sm:$0xff]  }
 0x547   : > { %5171 = vmatprep.subr.bf16.mxu1 %v5978_v30  ;;  %v6001_v30 = vld [vmem:[%s7549_s9 + $0x28] sm:$0xff]  }
 0x54a   : > { %5172 = vmatpush3.bf16.msra.mxu1 %v5979_v37  ;;  %v5113_v37 = vld [vmem:[%s7548_s8] ss:$0 sm:$0xff] }
 0x54b   : > { %5206 = vmatprep.subr.bf16.mxu1 %v6069_v27 }
 0x54d   : > { %4430 = vmatmul.mubr.bf16.vlgmr.msra.gmra.mrb[84].mxu1 %v4027_v44 }
 0x54e   : > { %5207 = vmatpush3.bf16.msra.mxu1 %v5980_v42  ;;  %5222 = vmatprep.mubr.msk.bf16.mxu1 %vm6070_vm0, %v6069_v27 }
 0x54f   : > { %5208 = vmatprep.subr.bf16.mxu1 %v6069_v27 }
 0x552   : > { %5209 = vmatpush3.bf16.msra.mxu1 %v5981_v39 }
 0x553   : > { %5210 = vmatprep.subr.bf16.mxu1 %v6069_v27 }
 0x556   : > { %5211 = vmatpush3.bf16.msra.mxu1 %v5982_v52 }
 0x557   : > { %5212 = vmatprep.subr.bf16.mxu1 %v6069_v27 }
 0x55a   : > { %5213 = vmatpush3.bf16.msra.mxu1 %v5983_v18 }
 0x55b   : > { %5214 = vmatprep.subr.bf16.mxu1 %v6069_v27 }
 0x55e   : > { %5215 = vmatpush3.bf16.msra.mxu1 %v5984_v51 }
 0x55f   : > { %5216 = vmatprep.subr.bf16.mxu1 %v6069_v27 }
 0x562   : > { %5217 = vmatpush3.bf16.msra.mxu1 %v5985_v60 }
 0x563   : > { %5218 = vmatprep.subr.bf16.mxu1 %v6069_v27 }
 0x566   : > { %5219 = vmatpush3.bf16.msra.mxu1 %v5986_v22 }
 0x567   : > { %5220 = vmatprep.subr.bf16.mxu1 %v6069_v27 }
 0x56a   : > { %5221 = vmatpush3.bf16.msra.mxu1 %v5987_v53 }
 0x56b   : > { %5226 = vmatprep.subr.bf16.mxu1 %v6069_v27 }
 0x56d   : > { %5223 = vmatmul.mubr.bf16.vlgmr.msra.gmra.mrb[88].mxu1 %v4029_v61 }
 0x56e   : > { %5242 = vmatprep.mubr.msk.bf16.mxu1 %vm6070_vm0, %v6069_v27  ;;  %5227 = vmatpush3.bf16.msra.mxu1 %v5988_v62 }
 0x56f   : > { %5228 = vmatprep.subr.bf16.mxu1 %v6069_v27 }
 0x572   : > { %5229 = vmatpush3.bf16.msra.mxu1 %v5989_v32 }
 0x573   : > { %5230 = vmatprep.subr.bf16.mxu1 %v6069_v27 }
 0x576   : > { %5231 = vmatpush3.bf16.msra.mxu1 %v5990_v29 }
 0x577   : > { %5232 = vmatprep.subr.bf16.mxu1 %v6069_v27 }
 0x57a   : > { %5233 = vmatpush3.bf16.msra.mxu1 %v5991_v33 }
 0x57b   : > { %5234 = vmatprep.subr.bf16.mxu1 %v6069_v27 }
 0x57e   : > { %5235 = vmatpush3.bf16.msra.mxu1 %v5992_v46 }
 0x57f   : > { %5236 = vmatprep.subr.bf16.mxu1 %v6069_v27 }
 0x582   : > { %5237 = vmatpush3.bf16.msra.mxu1 %v5993_v28 }
 0x583   : > { %5238 = vmatprep.subr.bf16.mxu1 %v6069_v27 }
 0x586   : > { %5239 = vmatpush3.bf16.msra.mxu1 %v5994_v14 }
 0x587   : > { %5240 = vmatprep.subr.bf16.mxu1 %v6069_v27 }
 0x58a   : > { %5241 = vmatpush3.bf16.msra.mxu1 %v5995_v17 }
 0x58b   : > { %5246 = vmatprep.subr.bf16.mxu1 %v6069_v27 }
 0x600   : > { %v5151_v9 = vpop.f32.mrb[80].mxu1 }
 0x601   : > { %v5152_v15 = vpop.f32.mrb[81].mxu1 }
 0x602   : > { %v5153_v47 = vadd.f32 %v5152_v15, %v5151_v9  ;;  %v5154_v13 = vpop.f32.mrb[82].mxu1 }
 0x603   : > { %v5155_v54 = vpop.f32.mrb[83].mxu1 }
 0x604   : > { %v4392_v55 = vadd.f32 %v5153_v47, %v5072_v19 }
 0x620   : > { %v5173_v63 = vpop.f32.mrb[84].mxu1 }
 0x621   : > { %v5174_v4 = vpop.f32.mrb[85].mxu1 }
 0x622   : > { %v5175_v7 = vadd.f32 %v5174_v4, %v5173_v63  ;;  %v5176_v2 = vpop.f32.mrb[86].mxu1 }
 0x623   : > { %v5177_v0 = vpop.f32.mrb[87].mxu1 }
 0x624   : > { %v4432_v5 = vadd.f32 %v5175_v7, %v4392_v55 }
 0x640   : > { %v4471_v49 = vpop.f32.mrb[88].mxu1 }
 0x641   : > { %v4472_v56 = vadd.f32 %v4471_v49, %v4432_v5  ;;  %v5224_v1 = vpop.f32.mrb[89].mxu1 }
 0x642   : > { %v4474_v21 = vpop.f32.mrb[90].mxu1 }
 0x643   : > { %v4477_v11 = vmax.f32 %v4472_v56, 0.0  ;;  %v5225_v43 = vpop.f32.mrb[91].mxu1 }
 0x645   : > { %v4478_v57 = vpack.c.bf16 %v4477_v11, %v4477_v11 }
 0x647   : > { %5243 = vmatmul.mubr.bf16.vlgmr.msra.gmra.mrb[92].mxu1 %v4478_v57 }
 0x648   : > { %5247 = vmatpush3.bf16.msra.mxu1 %v5996_v3  ;;  %5262 = vmatprep.mubr.msk.bf16.mxu1 %vm6070_vm0, %v6069_v27 }
 0x649   : > { %5248 = vmatprep.subr.bf16.mxu1 %v6069_v27 }
 0x64c   : > { %5249 = vmatpush3.bf16.msra.mxu1 %v5997_v6 }
 0x64d   : > { %5250 = vmatprep.subr.bf16.mxu1 %v6069_v27 }
 0x650   : > { %5251 = vmatpush3.bf16.msra.mxu1 %v5998_v8 }
 0x651   : > { %5252 = vmatprep.subr.bf16.mxu1 %v6069_v27 }
 0x654   : > { %5253 = vmatpush3.bf16.msra.mxu1 %v5999_v10 }
 0x655   : > { %5254 = vmatprep.subr.bf16.mxu1 %v6069_v27 }
 0x658   : > { %5255 = vmatpush3.bf16.msra.mxu1 %v6000_v26 }
 0x659   : > { %5256 = vmatprep.subr.bf16.mxu1 %v6069_v27 }
 0x65c   : > { %5257 = vmatpush3.bf16.msra.mxu1 %v6001_v30 }
 0x65d   : > { %5258 = vmatprep.subr.bf16.mxu1 %v6069_v27 }
 0x660   : > { %5259 = vmatpush3.bf16.msra.mxu1 %v6002_v23 }
 0x661   : > { %5260 = vmatprep.subr.bf16.mxu1 %v6069_v27  ;;  %v5122_v27 = vld [vmem:[%s7550_s10] ss:$0 sm:$0xff] }
 0x664   : > { %5261 = vmatpush3.bf16.msra.mxu1 %v6003_v24 }
 0x71a   : > { %v4584_v25 = vpop.f32.mrb[92].mxu1 }
 0x71b   : > { %v4585_v42 = vadd.f32 %v5113_v37, %v4584_v25  ;;  %v5244_v44 = vpop.f32.mrb[93].mxu1 }
 0x71c   : > { %v4587_v39 = vpop.f32.mrb[94].mxu1 }
 0x71d   : > { %v4590_v52 = vmax.f32 %v4585_v42, 0.0  ;;  %v5245_v18 = vpop.f32.mrb[95].mxu1 }
 0x71f   : > { %v4591_v51 = vpack.c.bf16 %v4590_v52, %v4590_v52 }
 0x721   : > { %5263 = vmatmul.mubr.bf16.vlgmr.msra.gmra.mrb[96].mxu1 %v4591_v51 }
 0x7f4   : > { %v4697_v60 = vpop.f32.mrb[96].mxu1 }
 0x7f5   : > { %v4698_v48 = vadd.f32 %v5122_v27, %v4697_v60  ;;  %v5264_v12 = vpop.f32.mrb[97].mxu1 }
 0x7f6   : > { %v4700_v38 = vpop.f32.mrb[98].mxu1 }
 0x7f7   : > { %4703 = vst [vmem:[%s380_s16] sm:$0xff] %v4698_v48  ;;  %v5265_v34 = vpop.f32.mrb[99].mxu1 }
 0x7f8   : > { %6017 = shalt.err (!%p6014_p3)
}
 0x7f9   : > { %s6018_s30 = scalar_lea.hbm %s7498_s25, 128  ;;  %s6022_s24 = scalar_lea.hbm %s7551_s11, 256 }
 0x7fa   : > { %p6019_p4 = scmp.ne.s32.totalorder %s7498_s25, %s6018_s30  ;;  %p6023_p9 = scmp.lt.u32.totalorder %s7498_s25, %s7551_s11 }
 0x7fb   : > { %p6024_p10 = scmp.lt.u32.totalorder %s6022_s24, %s6018_s30  ;;  %p6026_p12 = scmp.lt.u32.totalorder %s6018_s30, %s7498_s25 }
 0x7fc   : > { %p6020_p7 = pnand %p6019_p4, %p6170_p5 }
 0x7fd   : > { %p6025_p11 = por %p6024_p10, %p6023_p9 }
 0x7fe   : > { %p6021_p8 = pneg %p6020_p7 }
 0x7ff   : > { %p6027_p13 = por %p6026_p12, %p6025_p11 }
 0x801   : > { %p6028_p0 = pnand %p6027_p13, %p6021_p8 }
 0x803   : > { %6031 = shalt.err (!%p6028_p0)
}
 0x804   : > { %5666 = dma.vmem_to_hbm [thread:$0]  (%p6170_p5), %s7500_s22, 128, %s7498_s25, %s4705_s29  }
 0x805 PF: > { %p5672_p1 = scmp.ge.s32.totalorder %s6066_s20, 2  ;;  %s4730_s21 = sand.u32 1, %s6054_s17  }
 0x806   : > { %s4731_s13 = scalar_lea.sflag [#allocation6], %s4730_s21 }
 0x807   : > { %p5669_p2 = pnand %p5672_p1, %p6174_p6 }
 0x809   : > { %6049 = dma.done.wait (!%p5669_p2), %s4731_s13, 128  }
 0x80a   : > { %6051 = vsyncadd (!%p5669_p2), %s4731_s13, 4294967168  ;;  %s7576_s15 = sld [smem:[#allocation8_spill]]  ;;  %p21_p3 = scmp.ge.s32.totalorder %s6157_s23, 4  }
 0x80b   : > { %s7577_s17 = smov %s6058_s18  ;;  %s7578_s18 = smov %s6062_s19 }
 0x80c   : > { %s7580_s20 = smov %s6157_s23  ;;  %23 = sbr.rel (!%p21_p3) target bundleno = 3 (0x3), region = 147 }
 0x810   : > { %s7579_s19 = smov %s7576_s15 }
 0x813   :  { %4736 = vsyncpa [#allocation6], 1 }
 0x814   :  { %4738 = vsyncpa [#allocation6 + $0x1], 1 }

</bundles_post_ra>
